<compile_context>
chip_gen: v5e
topology: v5e:2x2
jax: 0.10.0
libtpu: 0.0.40
codegen_flags: <defaults>
</compile_context>

<pallas_src>
import math

import jax
import jax.numpy as jnp
from jax.experimental import pallas as pl
from jax.experimental.pallas import tpu as pltpu

# ----------------------- model hyper-parameters (small) ---------------------
NUM_LAYERS = 2
D_MODEL = 32
NHEAD = 4
HEAD_DIM = D_MODEL // NHEAD
DIM_FF = 64
T_TGT = 8      # number of object queries
S_MEM = 16     # memory (encoder) sequence length
BATCH = 2      # must be a power of two (batch-id mask uses a bitwise AND)
LN_EPS = 1e-5

NT = T_TGT * BATCH     # query rows   (seq-major: row = t * BATCH + b)
NS = S_MEM * BATCH     # memory rows

assert BATCH > 0 and (BATCH & (BATCH - 1)) == 0, "BATCH must be a power of two"

# ------------------------ packed-parameter layout ----------------------------
W_LANES = 128                 # every packed (D, *) weight entry padded to 128 lanes
V_LANES = 3 * D_MODEL         # every packed bias / LN row padded to 96 lanes

W_PER_LAYER = 5
W_SA_QKV, W_SA_O, W_CA_Q, W_CA_O, W_FF1 = range(W_PER_LAYER)
W_CA_KV = W_PER_LAYER * NUM_LAYERS        # layer-stacked cross-attn K/V weight (shared)

V_PER_LAYER = 14
(V_SA_BQKV, V_SA_BO, V_CA_BQ, V_CA_BK, V_CA_BV, V_CA_BO,
 V_FF1_B, V_FF2_B, V_N1_G, V_N1_B, V_N2_G, V_N2_B, V_N3_G, V_N3_B) = range(V_PER_LAYER)
V_FN_G = V_PER_LAYER * NUM_LAYERS
V_FN_B = V_FN_G + 1

assert 2 * NUM_LAYERS * D_MODEL <= W_LANES
assert DIM_FF <= V_LANES and 3 * D_MODEL <= V_LANES

PARAM_ORDER = [
    "sa_in_w", "sa_in_b", "sa_out_w", "sa_out_b",
    "ca_in_w", "ca_in_b", "ca_out_w", "ca_out_b",
    "l1_w", "l1_b", "l2_w", "l2_b",
    "n1_g", "n1_b", "n2_g", "n2_b", "n3_g", "n3_b",
    "fn_g", "fn_b",
]


# ------------------------------- Pallas kernel ------------------------------
def decoder_kernel(tgt_ref, mem_ref, qp_ref, pos_ref, w32_ref, wff2_ref, vec_ref,
                   out_ref):
    D = D_MODEL
    x = tgt_ref[...]        # (NT, D)  seq-major rows (t-major, batch-minor)
    qp = qp_ref[...]        # (NT, D)
    mem = mem_ref[...]      # (NS, D)
    mp = pos_ref[...]       # (NS, D)

    def wmat(idx, width):                       # packed (D, width) weight entry
        return w32_ref[idx][:, :width]

    def vrow(idx, width):                       # packed (1, width) bias / LN row
        return vec_ref[idx:idx + 1, :width]

    def layer_norm(v, g_idx, b_idx):
        mu = jnp.mean(v, axis=-1, keepdims=True)
        var = jnp.mean((v - mu) * (v - mu), axis=-1, keepdims=True)
        return (v - mu) * jax.lax.rsqrt(var + LN_EPS) * vrow(g_idx, D) + vrow(b_idx, D)

    def batch_mask(rows, cols):
        # Rows/cols are seq-major (t-major, batch-minor): batch id = index & (BATCH-1).
        r = jax.lax.broadcasted_iota(jnp.int32, (rows, cols), 0)
        c = jax.lax.broadcasted_iota(jnp.int32, (rows, cols), 1)
        same = (r & (BATCH - 1)) == (c & (BATCH - 1))
        return jnp.where(same, 0.0, -1e30)

    mask_self = batch_mask(NT, NT)     # hoisted: reused by every layer
    mask_cross = batch_mask(NT, NS)

    def attention(q2, k2, v2, wo, bo, mask):
        # Batch stays folded into the rows; cross-batch scores are masked out, so no
        # head/batch transposes or reshapes are needed.  Heads are static lane slices;
        # their outputs are lane-concatenated so the output projection is ONE
        # (rows, D) @ (D, D) matmul.
        outs = []
        for h in range(NHEAD):                                   # static unroll
            lo = h * HEAD_DIM
            qh = q2[:, lo:lo + HEAD_DIM]
            kh = k2[:, lo:lo + HEAD_DIM]
            vh = v2[:, lo:lo + HEAD_DIM]
            s = jnp.einsum("qd,kd->qk", qh, kh,
                           preferred_element_type=jnp.float32) + mask
            s = s - jnp.max(s, axis=-1, keepdims=True)
            p = jnp.exp(s)
            p = p / jnp.sum(p, axis=-1, keepdims=True)           # exact softmax divide
            outs.append(jnp.dot(p, vh, preferred_element_type=jnp.float32))
        o2 = jnp.concatenate(outs, axis=-1)                      # (rows, D)
        return jnp.dot(o2, wo, preferred_element_type=jnp.float32) + bo

    # Cross-attention K/V depend only on memory/pos: hoist the projections of ALL
    # layers out of the layer loop as ONE full-128-lane matmul on a stacked
    # [memory+pos ; memory] operand.
    kv_in = jnp.concatenate([mem + mp, mem], axis=0)             # (2*NS, D)
    kv_all = jnp.dot(kv_in, w32_ref[W_CA_KV],
                     preferred_element_type=jnp.float32)         # (2*NS, 2*L*D)

    for l in range(NUM_LAYERS):                                  # static unroll
        wb = W_PER_LAYER * l
        vb = V_PER_LAYER * l

        # ---- self-attention: one fused [Q|K|V] matmul on stacked [x+qp ; x] ----
        sa_in = jnp.concatenate([x + qp, x], axis=0)             # (2*NT, D)
        qkv = (jnp.dot(sa_in, wmat(wb + W_SA_QKV, 3 * D),
                       preferred_element_type=jnp.float32)
               + vrow(vb + V_SA_BQKV, 3 * D))
        q2 = qkv[:NT, 0:D]                # from x + query_pos (scale pre-folded)
        k2 = qkv[:NT, D:2 * D]            # from x + query_pos
        v2 = qkv[NT:, 2 * D:3 * D]        # from x
        t2 = attention(q2, k2, v2, wmat(wb + W_SA_O, D), vrow(vb + V_SA_BO, D),
                       mask_self)
        x = layer_norm(x + t2, vb + V_N1_G, vb + V_N1_B)

        # ---- cross-attention: Q projected here, K/V sliced from hoisted kv_all ----
        q2 = (jnp.dot(x + qp, wmat(wb + W_CA_Q, D),
                      preferred_element_type=jnp.float32) + vrow(vb + V_CA_BQ, D))
        col = 2 * D * l
        k2 = kv_all[:NS, col:col + D] + vrow(vb + V_CA_BK, D)          # (mem+pos) @ Wk
        v2 = kv_all[NS:, col + D:col + 2 * D] + vrow(vb + V_CA_BV, D)  # mem @ Wv
        t2 = attention(q2, k2, v2, wmat(wb + W_CA_O, D), vrow(vb + V_CA_BO, D),
                       mask_cross)
        x = layer_norm(x + t2, vb + V_N2_G, vb + V_N2_B)

        # ---- feed-forward ----
        h1 = jnp.maximum(
            jnp.dot(x, wmat(wb + W_FF1, DIM_FF), preferred_element_type=jnp.float32)
            + vrow(vb + V_FF1_B, DIM_FF), 0.0)
        t2 = (jnp.dot(h1, wff2_ref[l], preferred_element_type=jnp.float32)
              + vrow(vb + V_FF2_B, D))
        x = layer_norm(x + t2, vb + V_N3_G, vb + V_N3_B)

    x = layer_norm(x, V_FN_G, V_FN_B)          # final decoder norm (self.norm)
    out_ref[...] = x


# ----------------------- host-side one-time parameter packing ----------------
def pack_params(params):
    """Pack the ~29 PyTorch-style parameter tensors into 3 stacked arrays so the
    grid-less kernel issues only a handful of prologue DMAs."""
    L, D = NUM_LAYERS, D_MODEL
    scale = 1.0 / math.sqrt(HEAD_DIM)

    def pad_w(a):                               # (D, w) -> (D, W_LANES)
        return jnp.pad(a, ((0, 0), (0, W_LANES - a.shape[1])))

    def pad_v(v):                               # (w,) -> (V_LANES,)
        return jnp.pad(v, (0, V_LANES - v.shape[0]))

    w_entries, v_rows, ca_kv_cols, ff2 = [], [], [], []
    for l in range(L):
        saw, sab = params["sa_in_w"][l], params["sa_in_b"][l]
        caw, cab = params["ca_in_w"][l], params["ca_in_b"][l]
        # fused self-attn [Q|K|V], (in, out) layout, softmax scale folded into Q
        w_sa_qkv = jnp.concatenate(
            [saw[:D].T * scale, saw[D:2 * D].T, saw[2 * D:].T], axis=1)
        w_entries += [pad_w(w_sa_qkv),
                      pad_w(params["sa_out_w"][l].T),
                      pad_w(caw[:D].T * scale),
                      pad_w(params["ca_out_w"][l].T),
                      pad_w(params["l1_w"][l].T)]
        ca_kv_cols.append(jnp.concatenate([caw[D:2 * D].T, caw[2 * D:].T], axis=1))
        ff2.append(params["l2_w"][l].T)

        v_rows += [pad_v(jnp.concatenate([sab[:D] * scale, sab[D:2 * D], sab[2 * D:]])),
                   pad_v(params["sa_out_b"][l]),
                   pad_v(cab[:D] * scale),
                   pad_v(cab[D:2 * D]),
                   pad_v(cab[2 * D:]),
                   pad_v(params["ca_out_b"][l]),
                   pad_v(params["l1_b"][l]),
                   pad_v(params["l2_b"][l]),
                   pad_v(params["n1_g"][l]), pad_v(params["n1_b"][l]),
                   pad_v(params["n2_g"][l]), pad_v(params["n2_b"][l]),
                   pad_v(params["n3_g"][l]), pad_v(params["n3_b"][l])]

    # layer-stacked cross-attn [K|V] weight, applied once to [mem+pos ; mem]
    w_entries.append(pad_w(jnp.concatenate(ca_kv_cols, axis=1)))       # (D, 2*L*D)
    v_rows += [pad_v(params["fn_g"]), pad_v(params["fn_b"])]

    w32 = jnp.stack(w_entries)       # (5L+1, D, 128)
    wff2 = jnp.stack(ff2)            # (L, FF, D)
    vecs = jnp.stack(v_rows)         # (14L+2, 96)
    return w32, wff2, vecs


# --------------------------------- wrapper ----------------------------------
@jax.jit
def transformer_decoder(tgt, memory, query_pos, pos, w32, wff2, vecs):
    """tgt/query_pos: (T, B, D), memory/pos: (S, B, D) — PyTorch seq-first layout."""
    T, B, D = tgt.shape
    S = memory.shape[0]

    # Seq-major flattening: pure reshapes (no transposes).  Under jit these are
    # layout-only glue around the single pallas_call.
    tgt2 = tgt.reshape(T * B, D)
    mem2 = memory.reshape(S * B, D)
    qp2 = query_pos.reshape(T * B, D)
    pos2 = pos.reshape(S * B, D)

    vmem = pl.BlockSpec(memory_space=pltpu.MemorySpace.VMEM)
    out = pl.pallas_call(
        decoder_kernel,
        out_shape=jax.ShapeDtypeStruct((T * B, D), jnp.float32),
        in_specs=[vmem] * 7,
        out_specs=vmem,
    )(tgt2, mem2, qp2, pos2, w32, wff2, vecs)

    # Rows are already (t, b) ordered: unsqueeze(0) + un-flatten is a pure reshape.
    return out.reshape(1, T, B, D)


# ------------------------- pure-JAX reference (check) ------------------------
def reference_decoder(tgt, memory, query_pos, pos, params):
    def layer_norm(v, g, b):
        mu = jnp.mean(v, axis=-1, keepdims=True)
        var = jnp.mean((v - mu) ** 2, axis=-1, keepdims=True)
        return (v - mu) * jax.lax.rsqrt(var + LN_EPS) * g + b

    def mha(q_in, k_in, v_in, in_w, in_b, out_w, out_b):
        def proj(x, w, b):
            return jnp.einsum("lbd,ed->lbe", x, w) + b
        q = proj(q_in, in_w[0:D_MODEL], in_b[0:D_MODEL])
        k = proj(k_in, in_w[D_MODEL:2 * D_MODEL], in_b[D_MODEL:2 * D_MODEL])
        v = proj(v_in, in_w[2 * D_MODEL:], in_b[2 * D_MODEL:])
        Tq, B, _ = q.shape
        Sk = k.shape[0]
        q = q.reshape(Tq, B, NHEAD, HEAD_DIM) / math.sqrt(HEAD_DIM)
        k = k.reshape(Sk, B, NHEAD, HEAD_DIM)
        v = v.reshape(Sk, B, NHEAD, HEAD_DIM)
        s = jnp.einsum("tbhd,sbhd->bhts", q, k)
        p = jax.nn.softmax(s, axis=-1)
        o = jnp.einsum("bhts,sbhd->tbhd", p, v).reshape(Tq, B, D_MODEL)
        return jnp.einsum("tbd,ed->tbe", o, out_w) + out_b

    x = tgt
    for l in range(NUM_LAYERS):
        qk = x + query_pos
        t2 = mha(qk, qk, x, params["sa_in_w"][l], params["sa_in_b"][l],
                 params["sa_out_w"][l], params["sa_out_b"][l])
        x = layer_norm(x + t2, params["n1_g"][l], params["n1_b"][l])
        t2 = mha(x + query_pos, memory + pos, memory,
                 params["ca_in_w"][l], params["ca_in_b"][l],
                 params["ca_out_w"][l], params["ca_out_b"][l])
        x = layer_norm(x + t2, params["n2_g"][l], params["n2_b"][l])
        h = jax.nn.relu(jnp.einsum("tbd,fd->tbf", x, params["l1_w"][l]) + params["l1_b"][l])
        t2 = jnp.einsum("tbf,df->tbd", h, params["l2_w"][l]) + params["l2_b"][l]
        x = layer_norm(x + t2, params["n3_g"][l], params["n3_b"][l])
    x = layer_norm(x, params["fn_g"], params["fn_b"])
    return x[None]


# ----------------------------- parameter init --------------------------------
def init_params(key):
    L, D, FF = NUM_LAYERS, D_MODEL, DIM_FF
    shapes = {
        "sa_in_w": (L, 3 * D, D), "sa_in_b": (L, 3 * D),
        "sa_out_w": (L, D, D), "sa_out_b": (L, D),
        "ca_in_w": (L, 3 * D, D), "ca_in_b": (L, 3 * D),
        "ca_out_w": (L, D, D), "ca_out_b": (L, D),
        "l1_w": (L, FF, D), "l1_b": (L, FF),
        "l2_w": (L, D, FF), "l2_b": (L, D),
        "n1_g": (L, D), "n1_b": (L, D),
        "n2_g": (L, D), "n2_b": (L, D),
        "n3_g": (L, D), "n3_b": (L, D),
        "fn_g": (D,), "fn_b": (D,),
    }
    params = {}
    keys = jax.random.split(key, len(PARAM_ORDER))
    for k_rng, name in zip(keys, PARAM_ORDER):
        shp = shapes[name]
        if name.endswith("_g"):           # layernorm gains -> ones
            params[name] = jnp.ones(shp, jnp.float32)
        elif name.endswith("_b") and name[:2] in ("n1", "n2", "n3", "fn"):
            params[name] = jnp.zeros(shp, jnp.float32)   # layernorm biases
        elif name.endswith("_b"):         # linear / attn biases -> small
            params[name] = 0.01 * jax.random.normal(k_rng, shp, jnp.float32)
        else:                             # weights
            params[name] = 0.05 * jax.random.normal(k_rng, shp, jnp.float32)
    return params


# ----------------------------------- main ------------------------------------
if __name__ == "__main__":
    key = jax.random.PRNGKey(0)
    k1, k2, k3, k4, kp = jax.random.split(key, 5)

    tgt = jax.random.normal(k1, (T_TGT, BATCH, D_MODEL), jnp.float32)
    memory = jax.random.normal(k2, (S_MEM, BATCH, D_MODEL), jnp.float32)
    query_pos = jax.random.normal(k3, (T_TGT, BATCH, D_MODEL), jnp.float32)
    pos = jax.random.normal(k4, (S_MEM, BATCH, D_MODEL), jnp.float32)
    params = init_params(kp)

    # one-time weight packing (3 arrays -> 3 prologue DMAs instead of ~29)
    w32, wff2, vecs = pack_params(params)

    out = transformer_decoder(tgt, memory, query_pos, pos, w32, wff2, vecs)
    out = jax.block_until_ready(out)

    ref = reference_decoder(tgt, memory, query_pos, pos, params)
    assert out.shape == (1, T_TGT, BATCH, D_MODEL), out.shape
    # Exact softmax divide in-kernel: remaining differences are pure f32 reassociation.
    assert jnp.allclose(out, ref, atol=5e-4, rtol=5e-4), \
        float(jnp.max(jnp.abs(out - ref)))

    print("KERNEL_OK")
</pallas_src>

<mosaic_0001>
module attributes {stable_mosaic.version = 11 : i64} {
  func.func @decoder_kernel(%arg0: memref<16x32xf32, #tpu.memory_space<vmem>>, %arg1: memref<32x32xf32, #tpu.memory_space<vmem>>, %arg2: memref<16x32xf32, #tpu.memory_space<vmem>>, %arg3: memref<32x32xf32, #tpu.memory_space<vmem>>, %arg4: memref<11x32x128xf32, #tpu.memory_space<vmem>>, %arg5: memref<2x64x32xf32, #tpu.memory_space<vmem>>, %arg6: memref<30x96xf32, #tpu.memory_space<vmem>>, %arg7: memref<16x32xf32, #tpu.memory_space<vmem>>) attributes {dimension_semantics = [], scalar_prefetch = 0 : i64, scratch_operands = 0 : i64, tpu.core_type = #tpu.core_type<tc>} {
    %c0 = arith.constant 0 : index
    %c0_0 = arith.constant 0 : index
    %0 = vector.load %arg0[%c0, %c0_0] : memref<16x32xf32, #tpu.memory_space<vmem>>, vector<16x32xf32>
    %c0_1 = arith.constant 0 : index
    %c0_2 = arith.constant 0 : index
    %1 = vector.load %arg2[%c0_1, %c0_2] : memref<16x32xf32, #tpu.memory_space<vmem>>, vector<16x32xf32>
    %c0_3 = arith.constant 0 : index
    %c0_4 = arith.constant 0 : index
    %2 = vector.load %arg1[%c0_3, %c0_4] : memref<32x32xf32, #tpu.memory_space<vmem>>, vector<32x32xf32>
    %c0_5 = arith.constant 0 : index
    %c0_6 = arith.constant 0 : index
    %3 = vector.load %arg3[%c0_5, %c0_6] : memref<32x32xf32, #tpu.memory_space<vmem>>, vector<32x32xf32>
    %4 = tpu.iota {dimensions = array<i32: 0>} : vector<16x16xi32>
    %5 = tpu.iota {dimensions = array<i32: 1>} : vector<16x16xi32>
    %c1_i32 = arith.constant 1 : i32
    %6 = vector.broadcast %c1_i32 : i32 to vector<16x16xi32>
    %7 = arith.andi %4, %6 : vector<16x16xi32>
    %c1_i32_7 = arith.constant 1 : i32
    %8 = vector.broadcast %c1_i32_7 : i32 to vector<16x16xi32>
    %9 = arith.andi %5, %8 : vector<16x16xi32>
    %10 = arith.cmpi eq, %7, %9 : vector<16x16xi32>
    %cst = arith.constant 0.000000e+00 : f32
    %cst_8 = arith.constant -1.000000e+30 : f32
    %11 = vector.broadcast %cst : f32 to vector<16x16xf32>
    %12 = vector.broadcast %cst_8 : f32 to vector<16x16xf32>
    %13 = arith.select %10, %11, %12 : vector<16x16xi1>, vector<16x16xf32>
    %14 = tpu.iota {dimensions = array<i32: 0>} : vector<16x32xi32>
    %15 = tpu.iota {dimensions = array<i32: 1>} : vector<16x32xi32>
    %c1_i32_9 = arith.constant 1 : i32
    %16 = vector.broadcast %c1_i32_9 : i32 to vector<16x32xi32>
    %17 = arith.andi %14, %16 : vector<16x32xi32>
    %c1_i32_10 = arith.constant 1 : i32
    %18 = vector.broadcast %c1_i32_10 : i32 to vector<16x32xi32>
    %19 = arith.andi %15, %18 : vector<16x32xi32>
    %20 = arith.cmpi eq, %17, %19 : vector<16x32xi32>
    %cst_11 = arith.constant 0.000000e+00 : f32
    %cst_12 = arith.constant -1.000000e+30 : f32
    %21 = vector.broadcast %cst_11 : f32 to vector<16x32xf32>
    %22 = vector.broadcast %cst_12 : f32 to vector<16x32xf32>
    %23 = arith.select %20, %21, %22 : vector<16x32xi1>, vector<16x32xf32>
    %24 = arith.addf %2, %3 : vector<32x32xf32>
    %25 = tpu.concatenate %24, %2 in 0 : vector<32x32xf32>, vector<32x32xf32> -> vector<64x32xf32>
    %c10 = arith.constant 10 : index
    %c0_13 = arith.constant 0 : index
    %c0_14 = arith.constant 0 : index
    %26 = vector.load %arg4[%c10, %c0_13, %c0_14] : memref<11x32x128xf32, #tpu.memory_space<vmem>>, vector<1x32x128xf32>
    %27 = vector.shape_cast %26 : vector<1x32x128xf32> to vector<32x128xf32>
    %cst_15 = arith.constant dense<0.000000e+00> : vector<64x128xf32>
    %28 = tpu.matmul %25, %27, %cst_15 {dimension_numbers = #tpu.dot_dimension_numbers<[1], [0], [0], [1], [0, 0, 1, 1], [], []>} : vector<64x32xf32>, vector<32x128xf32>, vector<64x128xf32> -> vector<64x128xf32>
    %29 = arith.addf %0, %1 : vector<16x32xf32>
    %30 = tpu.concatenate %29, %0 in 0 : vector<16x32xf32>, vector<16x32xf32> -> vector<32x32xf32>
    %c0_16 = arith.constant 0 : index
    %c0_17 = arith.constant 0 : index
    %c0_18 = arith.constant 0 : index
    %31 = vector.load %arg4[%c0_16, %c0_17, %c0_18] : memref<11x32x128xf32, #tpu.memory_space<vmem>>, vector<1x32x128xf32>
    %32 = vector.shape_cast %31 : vector<1x32x128xf32> to vector<32x128xf32>
    %33 = vector.extract_strided_slice %32 {offsets = [0, 0], sizes = [32, 96], strides = [1, 1]} : vector<32x128xf32> to vector<32x96xf32>
    %cst_19 = arith.constant dense<0.000000e+00> : vector<32x96xf32>
    %34 = tpu.matmul %30, %33, %cst_19 {dimension_numbers = #tpu.dot_dimension_numbers<[1], [0], [0], [1], [0, 0, 1, 1], [], []>} : vector<32x32xf32>, vector<32x96xf32>, vector<32x96xf32> -> vector<32x96xf32>
    %c0_20 = arith.constant 0 : index
    %c0_21 = arith.constant 0 : index
    %35 = vector.load %arg6[%c0_20, %c0_21] : memref<30x96xf32, #tpu.memory_space<vmem>>, vector<1x96xf32>
    %36 = vector.broadcast %35 : vector<1x96xf32> to vector<32x96xf32>
    %37 = arith.addf %34, %36 : vector<32x96xf32>
    %38 = vector.extract_strided_slice %37 {offsets = [0, 0], sizes = [16, 32], strides = [1, 1]} : vector<32x96xf32> to vector<16x32xf32>
    %39 = vector.extract_strided_slice %37 {offsets = [0, 32], sizes = [16, 32], strides = [1, 1]} : vector<32x96xf32> to vector<16x32xf32>
    %40 = vector.extract_strided_slice %37 {offsets = [16, 64], sizes = [16, 32], strides = [1, 1]} : vector<32x96xf32> to vector<16x32xf32>
    %c1 = arith.constant 1 : index
    %c0_22 = arith.constant 0 : index
    %c0_23 = arith.constant 0 : index
    %41 = vector.load %arg4[%c1, %c0_22, %c0_23] : memref<11x32x128xf32, #tpu.memory_space<vmem>>, vector<1x32x128xf32>
    %42 = vector.shape_cast %41 : vector<1x32x128xf32> to vector<32x128xf32>
    %43 = vector.extract_strided_slice %42 {offsets = [0, 0], sizes = [32, 32], strides = [1, 1]} : vector<32x128xf32> to vector<32x32xf32>
    %c1_24 = arith.constant 1 : index
    %c0_25 = arith.constant 0 : index
    %44 = vector.load %arg6[%c1_24, %c0_25] : memref<30x96xf32, #tpu.memory_space<vmem>>, vector<1x32xf32>
    %45 = vector.extract_strided_slice %38 {offsets = [0, 0], sizes = [16, 8], strides = [1, 1]} : vector<16x32xf32> to vector<16x8xf32>
    %46 = vector.extract_strided_slice %39 {offsets = [0, 0], sizes = [16, 8], strides = [1, 1]} : vector<16x32xf32> to vector<16x8xf32>
    %47 = vector.extract_strided_slice %40 {offsets = [0, 0], sizes = [16, 8], strides = [1, 1]} : vector<16x32xf32> to vector<16x8xf32>
    "tpu.trace_start"() <{level = 10 : i32, message = "qd,kd->qk"}> : () -> ()
    %cst_26 = arith.constant dense<0.000000e+00> : vector<16x16xf32>
    %48 = tpu.matmul %45, %46, %cst_26 {dimension_numbers = #tpu.dot_dimension_numbers<[1], [1], [0], [0], [0, 0, 1, 0], [], []>} : vector<16x8xf32>, vector<16x8xf32>, vector<16x16xf32> -> vector<16x16xf32>
    "tpu.trace_stop"() : () -> ()
    %49 = arith.addf %48, %13 : vector<16x16xf32>
    %cst_27 = arith.constant dense<0xFF800000> : vector<16xf32>
    %50 = vector.multi_reduction <maximumf>, %49, %cst_27 [1] : vector<16x16xf32> to vector<16xf32>
    %51 = vector.shape_cast %50 : vector<16xf32> to vector<16x1xf32>
    %52 = vector.broadcast %51 : vector<16x1xf32> to vector<16x16xf32>
    %53 = arith.subf %49, %52 : vector<16x16xf32>
    %54 = math.exp %53 : vector<16x16xf32>
    %cst_28 = arith.constant dense<0.000000e+00> : vector<16xf32>
    %55 = vector.multi_reduction <add>, %54, %cst_28 [1] : vector<16x16xf32> to vector<16xf32>
    %56 = vector.shape_cast %55 : vector<16xf32> to vector<16x1xf32>
    %57 = vector.broadcast %56 : vector<16x1xf32> to vector<16x16xf32>
    %58 = arith.divf %54, %57 : vector<16x16xf32>
    %cst_29 = arith.constant dense<0.000000e+00> : vector<16x8xf32>
    %59 = tpu.matmul %58, %47, %cst_29 {dimension_numbers = #tpu.dot_dimension_numbers<[1], [0], [0], [1], [0, 0, 1, 1], [], []>} : vector<16x16xf32>, vector<16x8xf32>, vector<16x8xf32> -> vector<16x8xf32>
    %60 = vector.extract_strided_slice %38 {offsets = [0, 8], sizes = [16, 8], strides = [1, 1]} : vector<16x32xf32> to vector<16x8xf32>
    %61 = vector.extract_strided_slice %39 {offsets = [0, 8], sizes = [16, 8], strides = [1, 1]} : vector<16x32xf32> to vector<16x8xf32>
    %62 = vector.extract_strided_slice %40 {offsets = [0, 8], sizes = [16, 8], strides = [1, 1]} : vector<16x32xf32> to vector<16x8xf32>
    "tpu.trace_start"() <{level = 10 : i32, message = "qd,kd->qk"}> : () -> ()
    %cst_30 = arith.constant dense<0.000000e+00> : vector<16x16xf32>
    %63 = tpu.matmul %60, %61, %cst_30 {dimension_numbers = #tpu.dot_dimension_numbers<[1], [1], [0], [0], [0, 0, 1, 0], [], []>} : vector<16x8xf32>, vector<16x8xf32>, vector<16x16xf32> -> vector<16x16xf32>
    "tpu.trace_stop"() : () -> ()
    %64 = arith.addf %63, %13 : vector<16x16xf32>
    %cst_31 = arith.constant dense<0xFF800000> : vector<16xf32>
    %65 = vector.multi_reduction <maximumf>, %64, %cst_31 [1] : vector<16x16xf32> to vector<16xf32>
    %66 = vector.shape_cast %65 : vector<16xf32> to vector<16x1xf32>
    %67 = vector.broadcast %66 : vector<16x1xf32> to vector<16x16xf32>
    %68 = arith.subf %64, %67 : vector<16x16xf32>
    %69 = math.exp %68 : vector<16x16xf32>
    %cst_32 = arith.constant dense<0.000000e+00> : vector<16xf32>
    %70 = vector.multi_reduction <add>, %69, %cst_32 [1] : vector<16x16xf32> to vector<16xf32>
    %71 = vector.shape_cast %70 : vector<16xf32> to vector<16x1xf32>
    %72 = vector.broadcast %71 : vector<16x1xf32> to vector<16x16xf32>
    %73 = arith.divf %69, %72 : vector<16x16xf32>
    %cst_33 = arith.constant dense<0.000000e+00> : vector<16x8xf32>
    %74 = tpu.matmul %73, %62, %cst_33 {dimension_numbers = #tpu.dot_dimension_numbers<[1], [0], [0], [1], [0, 0, 1, 1], [], []>} : vector<16x16xf32>, vector<16x8xf32>, vector<16x8xf32> -> vector<16x8xf32>
    %75 = vector.extract_strided_slice %38 {offsets = [0, 16], sizes = [16, 8], strides = [1, 1]} : vector<16x32xf32> to vector<16x8xf32>
    %76 = vector.extract_strided_slice %39 {offsets = [0, 16], sizes = [16, 8], strides = [1, 1]} : vector<16x32xf32> to vector<16x8xf32>
    %77 = vector.extract_strided_slice %40 {offsets = [0, 16], sizes = [16, 8], strides = [1, 1]} : vector<16x32xf32> to vector<16x8xf32>
    "tpu.trace_start"() <{level = 10 : i32, message = "qd,kd->qk"}> : () -> ()
    %cst_34 = arith.constant dense<0.000000e+00> : vector<16x16xf32>
    %78 = tpu.matmul %75, %76, %cst_34 {dimension_numbers = #tpu.dot_dimension_numbers<[1], [1], [0], [0], [0, 0, 1, 0], [], []>} : vector<16x8xf32>, vector<16x8xf32>, vector<16x16xf32> -> vector<16x16xf32>
    "tpu.trace_stop"() : () -> ()
    %79 = arith.addf %78, %13 : vector<16x16xf32>
    %cst_35 = arith.constant dense<0xFF800000> : vector<16xf32>
    %80 = vector.multi_reduction <maximumf>, %79, %cst_35 [1] : vector<16x16xf32> to vector<16xf32>
    %81 = vector.shape_cast %80 : vector<16xf32> to vector<16x1xf32>
    %82 = vector.broadcast %81 : vector<16x1xf32> to vector<16x16xf32>
    %83 = arith.subf %79, %82 : vector<16x16xf32>
    %84 = math.exp %83 : vector<16x16xf32>
    %cst_36 = arith.constant dense<0.000000e+00> : vector<16xf32>
    %85 = vector.multi_reduction <add>, %84, %cst_36 [1] : vector<16x16xf32> to vector<16xf32>
    %86 = vector.shape_cast %85 : vector<16xf32> to vector<16x1xf32>
    %87 = vector.broadcast %86 : vector<16x1xf32> to vector<16x16xf32>
    %88 = arith.divf %84, %87 : vector<16x16xf32>
    %cst_37 = arith.constant dense<0.000000e+00> : vector<16x8xf32>
    %89 = tpu.matmul %88, %77, %cst_37 {dimension_numbers = #tpu.dot_dimension_numbers<[1], [0], [0], [1], [0, 0, 1, 1], [], []>} : vector<16x16xf32>, vector<16x8xf32>, vector<16x8xf32> -> vector<16x8xf32>
    %90 = vector.extract_strided_slice %38 {offsets = [0, 24], sizes = [16, 8], strides = [1, 1]} : vector<16x32xf32> to vector<16x8xf32>
    %91 = vector.extract_strided_slice %39 {offsets = [0, 24], sizes = [16, 8], strides = [1, 1]} : vector<16x32xf32> to vector<16x8xf32>
    %92 = vector.extract_strided_slice %40 {offsets = [0, 24], sizes = [16, 8], strides = [1, 1]} : vector<16x32xf32> to vector<16x8xf32>
    "tpu.trace_start"() <{level = 10 : i32, message = "qd,kd->qk"}> : () -> ()
    %cst_38 = arith.constant dense<0.000000e+00> : vector<16x16xf32>
    %93 = tpu.matmul %90, %91, %cst_38 {dimension_numbers = #tpu.dot_dimension_numbers<[1], [1], [0], [0], [0, 0, 1, 0], [], []>} : vector<16x8xf32>, vector<16x8xf32>, vector<16x16xf32> -> vector<16x16xf32>
    "tpu.trace_stop"() : () -> ()
    %94 = arith.addf %93, %13 : vector<16x16xf32>
    %cst_39 = arith.constant dense<0xFF800000> : vector<16xf32>
    %95 = vector.multi_reduction <maximumf>, %94, %cst_39 [1] : vector<16x16xf32> to vector<16xf32>
    %96 = vector.shape_cast %95 : vector<16xf32> to vector<16x1xf32>
    %97 = vector.broadcast %96 : vector<16x1xf32> to vector<16x16xf32>
    %98 = arith.subf %94, %97 : vector<16x16xf32>
    %99 = math.exp %98 : vector<16x16xf32>
    %cst_40 = arith.constant dense<0.000000e+00> : vector<16xf32>
    %100 = vector.multi_reduction <add>, %99, %cst_40 [1] : vector<16x16xf32> to vector<16xf32>
    %101 = vector.shape_cast %100 : vector<16xf32> to vector<16x1xf32>
    %102 = vector.broadcast %101 : vector<16x1xf32> to vector<16x16xf32>
    %103 = arith.divf %99, %102 : vector<16x16xf32>
    %cst_41 = arith.constant dense<0.000000e+00> : vector<16x8xf32>
    %104 = tpu.matmul %103, %92, %cst_41 {dimension_numbers = #tpu.dot_dimension_numbers<[1], [0], [0], [1], [0, 0, 1, 1], [], []>} : vector<16x16xf32>, vector<16x8xf32>, vector<16x8xf32> -> vector<16x8xf32>
    %105 = tpu.concatenate %59, %74, %89, %104 in 1 : vector<16x8xf32>, vector<16x8xf32>, vector<16x8xf32>, vector<16x8xf32> -> vector<16x32xf32>
    %cst_42 = arith.constant dense<0.000000e+00> : vector<16x32xf32>
    %106 = tpu.matmul %105, %43, %cst_42 {dimension_numbers = #tpu.dot_dimension_numbers<[1], [0], [0], [1], [0, 0, 1, 1], [], []>} : vector<16x32xf32>, vector<32x32xf32>, vector<16x32xf32> -> vector<16x32xf32>
    %107 = vector.broadcast %44 : vector<1x32xf32> to vector<16x32xf32>
    %108 = arith.addf %106, %107 : vector<16x32xf32>
    %109 = arith.addf %0, %108 : vector<16x32xf32>
    %cst_43 = arith.constant dense<0.000000e+00> : vector<16xf32>
    %110 = vector.multi_reduction <add>, %109, %cst_43 [1] : vector<16x32xf32> to vector<16xf32>
    %111 = vector.shape_cast %110 : vector<16xf32> to vector<16x1xf32>
    %cst_44 = arith.constant 3.200000e+01 : f32
    %112 = vector.broadcast %cst_44 : f32 to vector<16x1xf32>
    %113 = arith.divf %111, %112 : vector<16x1xf32>
    %114 = vector.broadcast %113 : vector<16x1xf32> to vector<16x32xf32>
    %115 = arith.subf %109, %114 : vector<16x32xf32>
    %116 = vector.broadcast %113 : vector<16x1xf32> to vector<16x32xf32>
    %117 = arith.subf %109, %116 : vector<16x32xf32>
    %118 = arith.mulf %115, %117 : vector<16x32xf32>
    %cst_45 = arith.constant dense<0.000000e+00> : vector<16xf32>
    %119 = vector.multi_reduction <add>, %118, %cst_45 [1] : vector<16x32xf32> to vector<16xf32>
    %120 = vector.shape_cast %119 : vector<16xf32> to vector<16x1xf32>
    %cst_46 = arith.constant 3.200000e+01 : f32
    %121 = vector.broadcast %cst_46 : f32 to vector<16x1xf32>
    %122 = arith.divf %120, %121 : vector<16x1xf32>
    %123 = vector.broadcast %113 : vector<16x1xf32> to vector<16x32xf32>
    %124 = arith.subf %109, %123 : vector<16x32xf32>
    %cst_47 = arith.constant 9.99999974E-6 : f32
    %125 = vector.broadcast %cst_47 : f32 to vector<16x1xf32>
    %126 = arith.addf %122, %125 : vector<16x1xf32>
    %127 = math.rsqrt %126 : vector<16x1xf32>
    %128 = vector.broadcast %127 : vector<16x1xf32> to vector<16x32xf32>
    %129 = arith.mulf %124, %128 : vector<16x32xf32>
    %c8 = arith.constant 8 : index
    %c0_48 = arith.constant 0 : index
    %130 = vector.load %arg6[%c8, %c0_48] : memref<30x96xf32, #tpu.memory_space<vmem>>, vector<1x32xf32>
    %131 = vector.broadcast %130 : vector<1x32xf32> to vector<16x32xf32>
    %132 = arith.mulf %129, %131 : vector<16x32xf32>
    %c9 = arith.constant 9 : index
    %c0_49 = arith.constant 0 : index
    %133 = vector.load %arg6[%c9, %c0_49] : memref<30x96xf32, #tpu.memory_space<vmem>>, vector<1x32xf32>
    %134 = vector.broadcast %133 : vector<1x32xf32> to vector<16x32xf32>
    %135 = arith.addf %132, %134 : vector<16x32xf32>
    %136 = arith.addf %135, %1 : vector<16x32xf32>
    %c2 = arith.constant 2 : index
    %c0_50 = arith.constant 0 : index
    %c0_51 = arith.constant 0 : index
    %137 = vector.load %arg4[%c2, %c0_50, %c0_51] : memref<11x32x128xf32, #tpu.memory_space<vmem>>, vector<1x32x128xf32>
    %138 = vector.shape_cast %137 : vector<1x32x128xf32> to vector<32x128xf32>
    %139 = vector.extract_strided_slice %138 {offsets = [0, 0], sizes = [32, 32], strides = [1, 1]} : vector<32x128xf32> to vector<32x32xf32>
    %cst_52 = arith.constant dense<0.000000e+00> : vector<16x32xf32>
    %140 = tpu.matmul %136, %139, %cst_52 {dimension_numbers = #tpu.dot_dimension_numbers<[1], [0], [0], [1], [0, 0, 1, 1], [], []>} : vector<16x32xf32>, vector<32x32xf32>, vector<16x32xf32> -> vector<16x32xf32>
    %c2_53 = arith.constant 2 : index
    %c0_54 = arith.constant 0 : index
    %141 = vector.load %arg6[%c2_53, %c0_54] : memref<30x96xf32, #tpu.memory_space<vmem>>, vector<1x32xf32>
    %142 = vector.broadcast %141 : vector<1x32xf32> to vector<16x32xf32>
    %143 = arith.addf %140, %142 : vector<16x32xf32>
    %144 = vector.extract_strided_slice %28 {offsets = [0, 0], sizes = [32, 32], strides = [1, 1]} : vector<64x128xf32> to vector<32x32xf32>
    %c3 = arith.constant 3 : index
    %c0_55 = arith.constant 0 : index
    %145 = vector.load %arg6[%c3, %c0_55] : memref<30x96xf32, #tpu.memory_space<vmem>>, vector<1x32xf32>
    %146 = vector.broadcast %145 : vector<1x32xf32> to vector<32x32xf32>
    %147 = arith.addf %144, %146 : vector<32x32xf32>
    %148 = vector.extract_strided_slice %28 {offsets = [32, 32], sizes = [32, 32], strides = [1, 1]} : vector<64x128xf32> to vector<32x32xf32>
    %c4 = arith.constant 4 : index
    %c0_56 = arith.constant 0 : index
    %149 = vector.load %arg6[%c4, %c0_56] : memref<30x96xf32, #tpu.memory_space<vmem>>, vector<1x32xf32>
    %150 = vector.broadcast %149 : vector<1x32xf32> to vector<32x32xf32>
    %151 = arith.addf %148, %150 : vector<32x32xf32>
    %c3_57 = arith.constant 3 : index
    %c0_58 = arith.constant 0 : index
    %c0_59 = arith.constant 0 : index
    %152 = vector.load %arg4[%c3_57, %c0_58, %c0_59] : memref<11x32x128xf32, #tpu.memory_space<vmem>>, vector<1x32x128xf32>
    %153 = vector.shape_cast %152 : vector<1x32x128xf32> to vector<32x128xf32>
    %154 = vector.extract_strided_slice %153 {offsets = [0, 0], sizes = [32, 32], strides = [1, 1]} : vector<32x128xf32> to vector<32x32xf32>
    %c5 = arith.constant 5 : index
    %c0_60 = arith.constant 0 : index
    %155 = vector.load %arg6[%c5, %c0_60] : memref<30x96xf32, #tpu.memory_space<vmem>>, vector<1x32xf32>
    %156 = vector.extract_strided_slice %143 {offsets = [0, 0], sizes = [16, 8], strides = [1, 1]} : vector<16x32xf32> to vector<16x8xf32>
    %157 = vector.extract_strided_slice %147 {offsets = [0, 0], sizes = [32, 8], strides = [1, 1]} : vector<32x32xf32> to vector<32x8xf32>
    %158 = vector.extract_strided_slice %151 {offsets = [0, 0], sizes = [32, 8], strides = [1, 1]} : vector<32x32xf32> to vector<32x8xf32>
    "tpu.trace_start"() <{level = 10 : i32, message = "qd,kd->qk"}> : () -> ()
    %cst_61 = arith.constant dense<0.000000e+00> : vector<16x32xf32>
    %159 = tpu.matmul %156, %157, %cst_61 {dimension_numbers = #tpu.dot_dimension_numbers<[1], [1], [0], [0], [0, 0, 1, 0], [], []>} : vector<16x8xf32>, vector<32x8xf32>, vector<16x32xf32> -> vector<16x32xf32>
    "tpu.trace_stop"() : () -> ()
    %160 = arith.addf %159, %23 : vector<16x32xf32>
    %cst_62 = arith.constant dense<0xFF800000> : vector<16xf32>
    %161 = vector.multi_reduction <maximumf>, %160, %cst_62 [1] : vector<16x32xf32> to vector<16xf32>
    %162 = vector.shape_cast %161 : vector<16xf32> to vector<16x1xf32>
    %163 = vector.broadcast %162 : vector<16x1xf32> to vector<16x32xf32>
    %164 = arith.subf %160, %163 : vector<16x32xf32>
    %165 = math.exp %164 : vector<16x32xf32>
    %cst_63 = arith.constant dense<0.000000e+00> : vector<16xf32>
    %166 = vector.multi_reduction <add>, %165, %cst_63 [1] : vector<16x32xf32> to vector<16xf32>
    %167 = vector.shape_cast %166 : vector<16xf32> to vector<16x1xf32>
    %168 = vector.broadcast %167 : vector<16x1xf32> to vector<16x32xf32>
    %169 = arith.divf %165, %168 : vector<16x32xf32>
    %cst_64 = arith.constant dense<0.000000e+00> : vector<16x8xf32>
    %170 = tpu.matmul %169, %158, %cst_64 {dimension_numbers = #tpu.dot_dimension_numbers<[1], [0], [0], [1], [0, 0, 1, 1], [], []>} : vector<16x32xf32>, vector<32x8xf32>, vector<16x8xf32> -> vector<16x8xf32>
    %171 = vector.extract_strided_slice %143 {offsets = [0, 8], sizes = [16, 8], strides = [1, 1]} : vector<16x32xf32> to vector<16x8xf32>
    %172 = vector.extract_strided_slice %147 {offsets = [0, 8], sizes = [32, 8], strides = [1, 1]} : vector<32x32xf32> to vector<32x8xf32>
    %173 = vector.extract_strided_slice %151 {offsets = [0, 8], sizes = [32, 8], strides = [1, 1]} : vector<32x32xf32> to vector<32x8xf32>
    "tpu.trace_start"() <{level = 10 : i32, message = "qd,kd->qk"}> : () -> ()
    %cst_65 = arith.constant dense<0.000000e+00> : vector<16x32xf32>
    %174 = tpu.matmul %171, %172, %cst_65 {dimension_numbers = #tpu.dot_dimension_numbers<[1], [1], [0], [0], [0, 0, 1, 0], [], []>} : vector<16x8xf32>, vector<32x8xf32>, vector<16x32xf32> -> vector<16x32xf32>
    "tpu.trace_stop"() : () -> ()
    %175 = arith.addf %174, %23 : vector<16x32xf32>
    %cst_66 = arith.constant dense<0xFF800000> : vector<16xf32>
    %176 = vector.multi_reduction <maximumf>, %175, %cst_66 [1] : vector<16x32xf32> to vector<16xf32>
    %177 = vector.shape_cast %176 : vector<16xf32> to vector<16x1xf32>
    %178 = vector.broadcast %177 : vector<16x1xf32> to vector<16x32xf32>
    %179 = arith.subf %175, %178 : vector<16x32xf32>
    %180 = math.exp %179 : vector<16x32xf32>
    %cst_67 = arith.constant dense<0.000000e+00> : vector<16xf32>
    %181 = vector.multi_reduction <add>, %180, %cst_67 [1] : vector<16x32xf32> to vector<16xf32>
    %182 = vector.shape_cast %181 : vector<16xf32> to vector<16x1xf32>
    %183 = vector.broadcast %182 : vector<16x1xf32> to vector<16x32xf32>
    %184 = arith.divf %180, %183 : vector<16x32xf32>
    %cst_68 = arith.constant dense<0.000000e+00> : vector<16x8xf32>
    %185 = tpu.matmul %184, %173, %cst_68 {dimension_numbers = #tpu.dot_dimension_numbers<[1], [0], [0], [1], [0, 0, 1, 1], [], []>} : vector<16x32xf32>, vector<32x8xf32>, vector<16x8xf32> -> vector<16x8xf32>
    %186 = vector.extract_strided_slice %143 {offsets = [0, 16], sizes = [16, 8], strides = [1, 1]} : vector<16x32xf32> to vector<16x8xf32>
    %187 = vector.extract_strided_slice %147 {offsets = [0, 16], sizes = [32, 8], strides = [1, 1]} : vector<32x32xf32> to vector<32x8xf32>
    %188 = vector.extract_strided_slice %151 {offsets = [0, 16], sizes = [32, 8], strides = [1, 1]} : vector<32x32xf32> to vector<32x8xf32>
    "tpu.trace_start"() <{level = 10 : i32, message = "qd,kd->qk"}> : () -> ()
    %cst_69 = arith.constant dense<0.000000e+00> : vector<16x32xf32>
    %189 = tpu.matmul %186, %187, %cst_69 {dimension_numbers = #tpu.dot_dimension_numbers<[1], [1], [0], [0], [0, 0, 1, 0], [], []>} : vector<16x8xf32>, vector<32x8xf32>, vector<16x32xf32> -> vector<16x32xf32>
    "tpu.trace_stop"() : () -> ()
    %190 = arith.addf %189, %23 : vector<16x32xf32>
    %cst_70 = arith.constant dense<0xFF800000> : vector<16xf32>
    %191 = vector.multi_reduction <maximumf>, %190, %cst_70 [1] : vector<16x32xf32> to vector<16xf32>
    %192 = vector.shape_cast %191 : vector<16xf32> to vector<16x1xf32>
    %193 = vector.broadcast %192 : vector<16x1xf32> to vector<16x32xf32>
    %194 = arith.subf %190, %193 : vector<16x32xf32>
    %195 = math.exp %194 : vector<16x32xf32>
    %cst_71 = arith.constant dense<0.000000e+00> : vector<16xf32>
    %196 = vector.multi_reduction <add>, %195, %cst_71 [1] : vector<16x32xf32> to vector<16xf32>
    %197 = vector.shape_cast %196 : vector<16xf32> to vector<16x1xf32>
    %198 = vector.broadcast %197 : vector<16x1xf32> to vector<16x32xf32>
    %199 = arith.divf %195, %198 : vector<16x32xf32>
    %cst_72 = arith.constant dense<0.000000e+00> : vector<16x8xf32>
    %200 = tpu.matmul %199, %188, %cst_72 {dimension_numbers = #tpu.dot_dimension_numbers<[1], [0], [0], [1], [0, 0, 1, 1], [], []>} : vector<16x32xf32>, vector<32x8xf32>, vector<16x8xf32> -> vector<16x8xf32>
    %201 = vector.extract_strided_slice %143 {offsets = [0, 24], sizes = [16, 8], strides = [1, 1]} : vector<16x32xf32> to vector<16x8xf32>
    %202 = vector.extract_strided_slice %147 {offsets = [0, 24], sizes = [32, 8], strides = [1, 1]} : vector<32x32xf32> to vector<32x8xf32>
    %203 = vector.extract_strided_slice %151 {offsets = [0, 24], sizes = [32, 8], strides = [1, 1]} : vector<32x32xf32> to vector<32x8xf32>
    "tpu.trace_start"() <{level = 10 : i32, message = "qd,kd->qk"}> : () -> ()
    %cst_73 = arith.constant dense<0.000000e+00> : vector<16x32xf32>
    %204 = tpu.matmul %201, %202, %cst_73 {dimension_numbers = #tpu.dot_dimension_numbers<[1], [1], [0], [0], [0, 0, 1, 0], [], []>} : vector<16x8xf32>, vector<32x8xf32>, vector<16x32xf32> -> vector<16x32xf32>
    "tpu.trace_stop"() : () -> ()
    %205 = arith.addf %204, %23 : vector<16x32xf32>
    %cst_74 = arith.constant dense<0xFF800000> : vector<16xf32>
    %206 = vector.multi_reduction <maximumf>, %205, %cst_74 [1] : vector<16x32xf32> to vector<16xf32>
    %207 = vector.shape_cast %206 : vector<16xf32> to vector<16x1xf32>
    %208 = vector.broadcast %207 : vector<16x1xf32> to vector<16x32xf32>
    %209 = arith.subf %205, %208 : vector<16x32xf32>
    %210 = math.exp %209 : vector<16x32xf32>
    %cst_75 = arith.constant dense<0.000000e+00> : vector<16xf32>
    %211 = vector.multi_reduction <add>, %210, %cst_75 [1] : vector<16x32xf32> to vector<16xf32>
    %212 = vector.shape_cast %211 : vector<16xf32> to vector<16x1xf32>
    %213 = vector.broadcast %212 : vector<16x1xf32> to vector<16x32xf32>
    %214 = arith.divf %210, %213 : vector<16x32xf32>
    %cst_76 = arith.constant dense<0.000000e+00> : vector<16x8xf32>
    %215 = tpu.matmul %214, %203, %cst_76 {dimension_numbers = #tpu.dot_dimension_numbers<[1], [0], [0], [1], [0, 0, 1, 1], [], []>} : vector<16x32xf32>, vector<32x8xf32>, vector<16x8xf32> -> vector<16x8xf32>
    %216 = tpu.concatenate %170, %185, %200, %215 in 1 : vector<16x8xf32>, vector<16x8xf32>, vector<16x8xf32>, vector<16x8xf32> -> vector<16x32xf32>
    %cst_77 = arith.constant dense<0.000000e+00> : vector<16x32xf32>
    %217 = tpu.matmul %216, %154, %cst_77 {dimension_numbers = #tpu.dot_dimension_numbers<[1], [0], [0], [1], [0, 0, 1, 1], [], []>} : vector<16x32xf32>, vector<32x32xf32>, vector<16x32xf32> -> vector<16x32xf32>
    %218 = vector.broadcast %155 : vector<1x32xf32> to vector<16x32xf32>
    %219 = arith.addf %217, %218 : vector<16x32xf32>
    %220 = arith.addf %135, %219 : vector<16x32xf32>
    %cst_78 = arith.constant dense<0.000000e+00> : vector<16xf32>
    %221 = vector.multi_reduction <add>, %220, %cst_78 [1] : vector<16x32xf32> to vector<16xf32>
    %222 = vector.shape_cast %221 : vector<16xf32> to vector<16x1xf32>
    %cst_79 = arith.constant 3.200000e+01 : f32
    %223 = vector.broadcast %cst_79 : f32 to vector<16x1xf32>
    %224 = arith.divf %222, %223 : vector<16x1xf32>
    %225 = vector.broadcast %224 : vector<16x1xf32> to vector<16x32xf32>
    %226 = arith.subf %220, %225 : vector<16x32xf32>
    %227 = vector.broadcast %224 : vector<16x1xf32> to vector<16x32xf32>
    %228 = arith.subf %220, %227 : vector<16x32xf32>
    %229 = arith.mulf %226, %228 : vector<16x32xf32>
    %cst_80 = arith.constant dense<0.000000e+00> : vector<16xf32>
    %230 = vector.multi_reduction <add>, %229, %cst_80 [1] : vector<16x32xf32> to vector<16xf32>
    %231 = vector.shape_cast %230 : vector<16xf32> to vector<16x1xf32>
    %cst_81 = arith.constant 3.200000e+01 : f32
    %232 = vector.broadcast %cst_81 : f32 to vector<16x1xf32>
    %233 = arith.divf %231, %232 : vector<16x1xf32>
    %234 = vector.broadcast %224 : vector<16x1xf32> to vector<16x32xf32>
    %235 = arith.subf %220, %234 : vector<16x32xf32>
    %cst_82 = arith.constant 9.99999974E-6 : f32
    %236 = vector.broadcast %cst_82 : f32 to vector<16x1xf32>
    %237 = arith.addf %233, %236 : vector<16x1xf32>
    %238 = math.rsqrt %237 : vector<16x1xf32>
    %239 = vector.broadcast %238 : vector<16x1xf32> to vector<16x32xf32>
    %240 = arith.mulf %235, %239 : vector<16x32xf32>
    %c10_83 = arith.constant 10 : index
    %c0_84 = arith.constant 0 : index
    %241 = vector.load %arg6[%c10_83, %c0_84] : memref<30x96xf32, #tpu.memory_space<vmem>>, vector<1x32xf32>
    %242 = vector.broadcast %241 : vector<1x32xf32> to vector<16x32xf32>
    %243 = arith.mulf %240, %242 : vector<16x32xf32>
    %c11 = arith.constant 11 : index
    %c0_85 = arith.constant 0 : index
    %244 = vector.load %arg6[%c11, %c0_85] : memref<30x96xf32, #tpu.memory_space<vmem>>, vector<1x32xf32>
    %245 = vector.broadcast %244 : vector<1x32xf32> to vector<16x32xf32>
    %246 = arith.addf %243, %245 : vector<16x32xf32>
    %c4_86 = arith.constant 4 : index
    %c0_87 = arith.constant 0 : index
    %c0_88 = arith.constant 0 : index
    %247 = vector.load %arg4[%c4_86, %c0_87, %c0_88] : memref<11x32x128xf32, #tpu.memory_space<vmem>>, vector<1x32x128xf32>
    %248 = vector.shape_cast %247 : vector<1x32x128xf32> to vector<32x128xf32>
    %249 = vector.extract_strided_slice %248 {offsets = [0, 0], sizes = [32, 64], strides = [1, 1]} : vector<32x128xf32> to vector<32x64xf32>
    %cst_89 = arith.constant dense<0.000000e+00> : vector<16x64xf32>
    %250 = tpu.matmul %246, %249, %cst_89 {dimension_numbers = #tpu.dot_dimension_numbers<[1], [0], [0], [1], [0, 0, 1, 1], [], []>} : vector<16x32xf32>, vector<32x64xf32>, vector<16x64xf32> -> vector<16x64xf32>
    %c6 = arith.constant 6 : index
    %c0_90 = arith.constant 0 : index
    %251 = vector.load %arg6[%c6, %c0_90] : memref<30x96xf32, #tpu.memory_space<vmem>>, vector<1x64xf32>
    %252 = vector.broadcast %251 : vector<1x64xf32> to vector<16x64xf32>
    %253 = arith.addf %250, %252 : vector<16x64xf32>
    %cst_91 = arith.constant 0.000000e+00 : f32
    %254 = vector.broadcast %cst_91 : f32 to vector<16x64xf32>
    %255 = arith.maximumf %253, %254 : vector<16x64xf32>
    %c0_92 = arith.constant 0 : index
    %c0_93 = arith.constant 0 : index
    %c0_94 = arith.constant 0 : index
    %256 = vector.load %arg5[%c0_92, %c0_93, %c0_94] : memref<2x64x32xf32, #tpu.memory_space<vmem>>, vector<1x64x32xf32>
    %257 = vector.shape_cast %256 : vector<1x64x32xf32> to vector<64x32xf32>
    %cst_95 = arith.constant dense<0.000000e+00> : vector<16x32xf32>
    %258 = tpu.matmul %255, %257, %cst_95 {dimension_numbers = #tpu.dot_dimension_numbers<[1], [0], [0], [1], [0, 0, 1, 1], [], []>} : vector<16x64xf32>, vector<64x32xf32>, vector<16x32xf32> -> vector<16x32xf32>
    %c7 = arith.constant 7 : index
    %c0_96 = arith.constant 0 : index
    %259 = vector.load %arg6[%c7, %c0_96] : memref<30x96xf32, #tpu.memory_space<vmem>>, vector<1x32xf32>
    %260 = vector.broadcast %259 : vector<1x32xf32> to vector<16x32xf32>
    %261 = arith.addf %258, %260 : vector<16x32xf32>
    %262 = arith.addf %246, %261 : vector<16x32xf32>
    %cst_97 = arith.constant dense<0.000000e+00> : vector<16xf32>
    %263 = vector.multi_reduction <add>, %262, %cst_97 [1] : vector<16x32xf32> to vector<16xf32>
    %264 = vector.shape_cast %263 : vector<16xf32> to vector<16x1xf32>
    %cst_98 = arith.constant 3.200000e+01 : f32
    %265 = vector.broadcast %cst_98 : f32 to vector<16x1xf32>
    %266 = arith.divf %264, %265 : vector<16x1xf32>
    %267 = vector.broadcast %266 : vector<16x1xf32> to vector<16x32xf32>
    %268 = arith.subf %262, %267 : vector<16x32xf32>
    %269 = vector.broadcast %266 : vector<16x1xf32> to vector<16x32xf32>
    %270 = arith.subf %262, %269 : vector<16x32xf32>
    %271 = arith.mulf %268, %270 : vector<16x32xf32>
    %cst_99 = arith.constant dense<0.000000e+00> : vector<16xf32>
    %272 = vector.multi_reduction <add>, %271, %cst_99 [1] : vector<16x32xf32> to vector<16xf32>
    %273 = vector.shape_cast %272 : vector<16xf32> to vector<16x1xf32>
    %cst_100 = arith.constant 3.200000e+01 : f32
    %274 = vector.broadcast %cst_100 : f32 to vector<16x1xf32>
    %275 = arith.divf %273, %274 : vector<16x1xf32>
    %276 = vector.broadcast %266 : vector<16x1xf32> to vector<16x32xf32>
    %277 = arith.subf %262, %276 : vector<16x32xf32>
    %cst_101 = arith.constant 9.99999974E-6 : f32
    %278 = vector.broadcast %cst_101 : f32 to vector<16x1xf32>
    %279 = arith.addf %275, %278 : vector<16x1xf32>
    %280 = math.rsqrt %279 : vector<16x1xf32>
    %281 = vector.broadcast %280 : vector<16x1xf32> to vector<16x32xf32>
    %282 = arith.mulf %277, %281 : vector<16x32xf32>
    %c12 = arith.constant 12 : index
    %c0_102 = arith.constant 0 : index
    %283 = vector.load %arg6[%c12, %c0_102] : memref<30x96xf32, #tpu.memory_space<vmem>>, vector<1x32xf32>
    %284 = vector.broadcast %283 : vector<1x32xf32> to vector<16x32xf32>
    %285 = arith.mulf %282, %284 : vector<16x32xf32>
    %c13 = arith.constant 13 : index
    %c0_103 = arith.constant 0 : index
    %286 = vector.load %arg6[%c13, %c0_103] : memref<30x96xf32, #tpu.memory_space<vmem>>, vector<1x32xf32>
    %287 = vector.broadcast %286 : vector<1x32xf32> to vector<16x32xf32>
    %288 = arith.addf %285, %287 : vector<16x32xf32>
    %289 = arith.addf %288, %1 : vector<16x32xf32>
    %290 = tpu.concatenate %289, %288 in 0 : vector<16x32xf32>, vector<16x32xf32> -> vector<32x32xf32>
    %c5_104 = arith.constant 5 : index
    %c0_105 = arith.constant 0 : index
    %c0_106 = arith.constant 0 : index
    %291 = vector.load %arg4[%c5_104, %c0_105, %c0_106] : memref<11x32x128xf32, #tpu.memory_space<vmem>>, vector<1x32x128xf32>
    %292 = vector.shape_cast %291 : vector<1x32x128xf32> to vector<32x128xf32>
    %293 = vector.extract_strided_slice %292 {offsets = [0, 0], sizes = [32, 96], strides = [1, 1]} : vector<32x128xf32> to vector<32x96xf32>
    %cst_107 = arith.constant dense<0.000000e+00> : vector<32x96xf32>
    %294 = tpu.matmul %290, %293, %cst_107 {dimension_numbers = #tpu.dot_dimension_numbers<[1], [0], [0], [1], [0, 0, 1, 1], [], []>} : vector<32x32xf32>, vector<32x96xf32>, vector<32x96xf32> -> vector<32x96xf32>
    %c14 = arith.constant 14 : index
    %c0_108 = arith.constant 0 : index
    %295 = vector.load %arg6[%c14, %c0_108] : memref<30x96xf32, #tpu.memory_space<vmem>>, vector<1x96xf32>
    %296 = vector.broadcast %295 : vector<1x96xf32> to vector<32x96xf32>
    %297 = arith.addf %294, %296 : vector<32x96xf32>
    %298 = vector.extract_strided_slice %297 {offsets = [0, 0], sizes = [16, 32], strides = [1, 1]} : vector<32x96xf32> to vector<16x32xf32>
    %299 = vector.extract_strided_slice %297 {offsets = [0, 32], sizes = [16, 32], strides = [1, 1]} : vector<32x96xf32> to vector<16x32xf32>
    %300 = vector.extract_strided_slice %297 {offsets = [16, 64], sizes = [16, 32], strides = [1, 1]} : vector<32x96xf32> to vector<16x32xf32>
    %c6_109 = arith.constant 6 : index
    %c0_110 = arith.constant 0 : index
    %c0_111 = arith.constant 0 : index
    %301 = vector.load %arg4[%c6_109, %c0_110, %c0_111] : memref<11x32x128xf32, #tpu.memory_space<vmem>>, vector<1x32x128xf32>
    %302 = vector.shape_cast %301 : vector<1x32x128xf32> to vector<32x128xf32>
    %303 = vector.extract_strided_slice %302 {offsets = [0, 0], sizes = [32, 32], strides = [1, 1]} : vector<32x128xf32> to vector<32x32xf32>
    %c15 = arith.constant 15 : index
    %c0_112 = arith.constant 0 : index
    %304 = vector.load %arg6[%c15, %c0_112] : memref<30x96xf32, #tpu.memory_space<vmem>>, vector<1x32xf32>
    %305 = vector.extract_strided_slice %298 {offsets = [0, 0], sizes = [16, 8], strides = [1, 1]} : vector<16x32xf32> to vector<16x8xf32>
    %306 = vector.extract_strided_slice %299 {offsets = [0, 0], sizes = [16, 8], strides = [1, 1]} : vector<16x32xf32> to vector<16x8xf32>
    %307 = vector.extract_strided_slice %300 {offsets = [0, 0], sizes = [16, 8], strides = [1, 1]} : vector<16x32xf32> to vector<16x8xf32>
    "tpu.trace_start"() <{level = 10 : i32, message = "qd,kd->qk"}> : () -> ()
    %cst_113 = arith.constant dense<0.000000e+00> : vector<16x16xf32>
    %308 = tpu.matmul %305, %306, %cst_113 {dimension_numbers = #tpu.dot_dimension_numbers<[1], [1], [0], [0], [0, 0, 1, 0], [], []>} : vector<16x8xf32>, vector<16x8xf32>, vector<16x16xf32> -> vector<16x16xf32>
    "tpu.trace_stop"() : () -> ()
    %309 = arith.addf %308, %13 : vector<16x16xf32>
    %cst_114 = arith.constant dense<0xFF800000> : vector<16xf32>
    %310 = vector.multi_reduction <maximumf>, %309, %cst_114 [1] : vector<16x16xf32> to vector<16xf32>
    %311 = vector.shape_cast %310 : vector<16xf32> to vector<16x1xf32>
    %312 = vector.broadcast %311 : vector<16x1xf32> to vector<16x16xf32>
    %313 = arith.subf %309, %312 : vector<16x16xf32>
    %314 = math.exp %313 : vector<16x16xf32>
    %cst_115 = arith.constant dense<0.000000e+00> : vector<16xf32>
    %315 = vector.multi_reduction <add>, %314, %cst_115 [1] : vector<16x16xf32> to vector<16xf32>
    %316 = vector.shape_cast %315 : vector<16xf32> to vector<16x1xf32>
    %317 = vector.broadcast %316 : vector<16x1xf32> to vector<16x16xf32>
    %318 = arith.divf %314, %317 : vector<16x16xf32>
    %cst_116 = arith.constant dense<0.000000e+00> : vector<16x8xf32>
    %319 = tpu.matmul %318, %307, %cst_116 {dimension_numbers = #tpu.dot_dimension_numbers<[1], [0], [0], [1], [0, 0, 1, 1], [], []>} : vector<16x16xf32>, vector<16x8xf32>, vector<16x8xf32> -> vector<16x8xf32>
    %320 = vector.extract_strided_slice %298 {offsets = [0, 8], sizes = [16, 8], strides = [1, 1]} : vector<16x32xf32> to vector<16x8xf32>
    %321 = vector.extract_strided_slice %299 {offsets = [0, 8], sizes = [16, 8], strides = [1, 1]} : vector<16x32xf32> to vector<16x8xf32>
    %322 = vector.extract_strided_slice %300 {offsets = [0, 8], sizes = [16, 8], strides = [1, 1]} : vector<16x32xf32> to vector<16x8xf32>
    "tpu.trace_start"() <{level = 10 : i32, message = "qd,kd->qk"}> : () -> ()
    %cst_117 = arith.constant dense<0.000000e+00> : vector<16x16xf32>
    %323 = tpu.matmul %320, %321, %cst_117 {dimension_numbers = #tpu.dot_dimension_numbers<[1], [1], [0], [0], [0, 0, 1, 0], [], []>} : vector<16x8xf32>, vector<16x8xf32>, vector<16x16xf32> -> vector<16x16xf32>
    "tpu.trace_stop"() : () -> ()
    %324 = arith.addf %323, %13 : vector<16x16xf32>
    %cst_118 = arith.constant dense<0xFF800000> : vector<16xf32>
    %325 = vector.multi_reduction <maximumf>, %324, %cst_118 [1] : vector<16x16xf32> to vector<16xf32>
    %326 = vector.shape_cast %325 : vector<16xf32> to vector<16x1xf32>
    %327 = vector.broadcast %326 : vector<16x1xf32> to vector<16x16xf32>
    %328 = arith.subf %324, %327 : vector<16x16xf32>
    %329 = math.exp %328 : vector<16x16xf32>
    %cst_119 = arith.constant dense<0.000000e+00> : vector<16xf32>
    %330 = vector.multi_reduction <add>, %329, %cst_119 [1] : vector<16x16xf32> to vector<16xf32>
    %331 = vector.shape_cast %330 : vector<16xf32> to vector<16x1xf32>
    %332 = vector.broadcast %331 : vector<16x1xf32> to vector<16x16xf32>
    %333 = arith.divf %329, %332 : vector<16x16xf32>
    %cst_120 = arith.constant dense<0.000000e+00> : vector<16x8xf32>
    %334 = tpu.matmul %333, %322, %cst_120 {dimension_numbers = #tpu.dot_dimension_numbers<[1], [0], [0], [1], [0, 0, 1, 1], [], []>} : vector<16x16xf32>, vector<16x8xf32>, vector<16x8xf32> -> vector<16x8xf32>
    %335 = vector.extract_strided_slice %298 {offsets = [0, 16], sizes = [16, 8], strides = [1, 1]} : vector<16x32xf32> to vector<16x8xf32>
    %336 = vector.extract_strided_slice %299 {offsets = [0, 16], sizes = [16, 8], strides = [1, 1]} : vector<16x32xf32> to vector<16x8xf32>
    %337 = vector.extract_strided_slice %300 {offsets = [0, 16], sizes = [16, 8], strides = [1, 1]} : vector<16x32xf32> to vector<16x8xf32>
    "tpu.trace_start"() <{level = 10 : i32, message = "qd,kd->qk"}> : () -> ()
    %cst_121 = arith.constant dense<0.000000e+00> : vector<16x16xf32>
    %338 = tpu.matmul %335, %336, %cst_121 {dimension_numbers = #tpu.dot_dimension_numbers<[1], [1], [0], [0], [0, 0, 1, 0], [], []>} : vector<16x8xf32>, vector<16x8xf32>, vector<16x16xf32> -> vector<16x16xf32>
    "tpu.trace_stop"() : () -> ()
    %339 = arith.addf %338, %13 : vector<16x16xf32>
    %cst_122 = arith.constant dense<0xFF800000> : vector<16xf32>
    %340 = vector.multi_reduction <maximumf>, %339, %cst_122 [1] : vector<16x16xf32> to vector<16xf32>
    %341 = vector.shape_cast %340 : vector<16xf32> to vector<16x1xf32>
    %342 = vector.broadcast %341 : vector<16x1xf32> to vector<16x16xf32>
    %343 = arith.subf %339, %342 : vector<16x16xf32>
    %344 = math.exp %343 : vector<16x16xf32>
    %cst_123 = arith.constant dense<0.000000e+00> : vector<16xf32>
    %345 = vector.multi_reduction <add>, %344, %cst_123 [1] : vector<16x16xf32> to vector<16xf32>
    %346 = vector.shape_cast %345 : vector<16xf32> to vector<16x1xf32>
    %347 = vector.broadcast %346 : vector<16x1xf32> to vector<16x16xf32>
    %348 = arith.divf %344, %347 : vector<16x16xf32>
    %cst_124 = arith.constant dense<0.000000e+00> : vector<16x8xf32>
    %349 = tpu.matmul %348, %337, %cst_124 {dimension_numbers = #tpu.dot_dimension_numbers<[1], [0], [0], [1], [0, 0, 1, 1], [], []>} : vector<16x16xf32>, vector<16x8xf32>, vector<16x8xf32> -> vector<16x8xf32>
    %350 = vector.extract_strided_slice %298 {offsets = [0, 24], sizes = [16, 8], strides = [1, 1]} : vector<16x32xf32> to vector<16x8xf32>
    %351 = vector.extract_strided_slice %299 {offsets = [0, 24], sizes = [16, 8], strides = [1, 1]} : vector<16x32xf32> to vector<16x8xf32>
    %352 = vector.extract_strided_slice %300 {offsets = [0, 24], sizes = [16, 8], strides = [1, 1]} : vector<16x32xf32> to vector<16x8xf32>
    "tpu.trace_start"() <{level = 10 : i32, message = "qd,kd->qk"}> : () -> ()
    %cst_125 = arith.constant dense<0.000000e+00> : vector<16x16xf32>
    %353 = tpu.matmul %350, %351, %cst_125 {dimension_numbers = #tpu.dot_dimension_numbers<[1], [1], [0], [0], [0, 0, 1, 0], [], []>} : vector<16x8xf32>, vector<16x8xf32>, vector<16x16xf32> -> vector<16x16xf32>
    "tpu.trace_stop"() : () -> ()
    %354 = arith.addf %353, %13 : vector<16x16xf32>
    %cst_126 = arith.constant dense<0xFF800000> : vector<16xf32>
    %355 = vector.multi_reduction <maximumf>, %354, %cst_126 [1] : vector<16x16xf32> to vector<16xf32>
    %356 = vector.shape_cast %355 : vector<16xf32> to vector<16x1xf32>
    %357 = vector.broadcast %356 : vector<16x1xf32> to vector<16x16xf32>
    %358 = arith.subf %354, %357 : vector<16x16xf32>
    %359 = math.exp %358 : vector<16x16xf32>
    %cst_127 = arith.constant dense<0.000000e+00> : vector<16xf32>
    %360 = vector.multi_reduction <add>, %359, %cst_127 [1] : vector<16x16xf32> to vector<16xf32>
    %361 = vector.shape_cast %360 : vector<16xf32> to vector<16x1xf32>
    %362 = vector.broadcast %361 : vector<16x1xf32> to vector<16x16xf32>
    %363 = arith.divf %359, %362 : vector<16x16xf32>
    %cst_128 = arith.constant dense<0.000000e+00> : vector<16x8xf32>
    %364 = tpu.matmul %363, %352, %cst_128 {dimension_numbers = #tpu.dot_dimension_numbers<[1], [0], [0], [1], [0, 0, 1, 1], [], []>} : vector<16x16xf32>, vector<16x8xf32>, vector<16x8xf32> -> vector<16x8xf32>
    %365 = tpu.concatenate %319, %334, %349, %364 in 1 : vector<16x8xf32>, vector<16x8xf32>, vector<16x8xf32>, vector<16x8xf32> -> vector<16x32xf32>
    %cst_129 = arith.constant dense<0.000000e+00> : vector<16x32xf32>
    %366 = tpu.matmul %365, %303, %cst_129 {dimension_numbers = #tpu.dot_dimension_numbers<[1], [0], [0], [1], [0, 0, 1, 1], [], []>} : vector<16x32xf32>, vector<32x32xf32>, vector<16x32xf32> -> vector<16x32xf32>
    %367 = vector.broadcast %304 : vector<1x32xf32> to vector<16x32xf32>
    %368 = arith.addf %366, %367 : vector<16x32xf32>
    %369 = arith.addf %288, %368 : vector<16x32xf32>
    %cst_130 = arith.constant dense<0.000000e+00> : vector<16xf32>
    %370 = vector.multi_reduction <add>, %369, %cst_130 [1] : vector<16x32xf32> to vector<16xf32>
    %371 = vector.shape_cast %370 : vector<16xf32> to vector<16x1xf32>
    %cst_131 = arith.constant 3.200000e+01 : f32
    %372 = vector.broadcast %cst_131 : f32 to vector<16x1xf32>
    %373 = arith.divf %371, %372 : vector<16x1xf32>
    %374 = vector.broadcast %373 : vector<16x1xf32> to vector<16x32xf32>
    %375 = arith.subf %369, %374 : vector<16x32xf32>
    %376 = vector.broadcast %373 : vector<16x1xf32> to vector<16x32xf32>
    %377 = arith.subf %369, %376 : vector<16x32xf32>
    %378 = arith.mulf %375, %377 : vector<16x32xf32>
    %cst_132 = arith.constant dense<0.000000e+00> : vector<16xf32>
    %379 = vector.multi_reduction <add>, %378, %cst_132 [1] : vector<16x32xf32> to vector<16xf32>
    %380 = vector.shape_cast %379 : vector<16xf32> to vector<16x1xf32>
    %cst_133 = arith.constant 3.200000e+01 : f32
    %381 = vector.broadcast %cst_133 : f32 to vector<16x1xf32>
    %382 = arith.divf %380, %381 : vector<16x1xf32>
    %383 = vector.broadcast %373 : vector<16x1xf32> to vector<16x32xf32>
    %384 = arith.subf %369, %383 : vector<16x32xf32>
    %cst_134 = arith.constant 9.99999974E-6 : f32
    %385 = vector.broadcast %cst_134 : f32 to vector<16x1xf32>
    %386 = arith.addf %382, %385 : vector<16x1xf32>
    %387 = math.rsqrt %386 : vector<16x1xf32>
    %388 = vector.broadcast %387 : vector<16x1xf32> to vector<16x32xf32>
    %389 = arith.mulf %384, %388 : vector<16x32xf32>
    %c22 = arith.constant 22 : index
    %c0_135 = arith.constant 0 : index
    %390 = vector.load %arg6[%c22, %c0_135] : memref<30x96xf32, #tpu.memory_space<vmem>>, vector<1x32xf32>
    %391 = vector.broadcast %390 : vector<1x32xf32> to vector<16x32xf32>
    %392 = arith.mulf %389, %391 : vector<16x32xf32>
    %c23 = arith.constant 23 : index
    %c0_136 = arith.constant 0 : index
    %393 = vector.load %arg6[%c23, %c0_136] : memref<30x96xf32, #tpu.memory_space<vmem>>, vector<1x32xf32>
    %394 = vector.broadcast %393 : vector<1x32xf32> to vector<16x32xf32>
    %395 = arith.addf %392, %394 : vector<16x32xf32>
    %396 = arith.addf %395, %1 : vector<16x32xf32>
    %c7_137 = arith.constant 7 : index
    %c0_138 = arith.constant 0 : index
    %c0_139 = arith.constant 0 : index
    %397 = vector.load %arg4[%c7_137, %c0_138, %c0_139] : memref<11x32x128xf32, #tpu.memory_space<vmem>>, vector<1x32x128xf32>
    %398 = vector.shape_cast %397 : vector<1x32x128xf32> to vector<32x128xf32>
    %399 = vector.extract_strided_slice %398 {offsets = [0, 0], sizes = [32, 32], strides = [1, 1]} : vector<32x128xf32> to vector<32x32xf32>
    %cst_140 = arith.constant dense<0.000000e+00> : vector<16x32xf32>
    %400 = tpu.matmul %396, %399, %cst_140 {dimension_numbers = #tpu.dot_dimension_numbers<[1], [0], [0], [1], [0, 0, 1, 1], [], []>} : vector<16x32xf32>, vector<32x32xf32>, vector<16x32xf32> -> vector<16x32xf32>
    %c16 = arith.constant 16 : index
    %c0_141 = arith.constant 0 : index
    %401 = vector.load %arg6[%c16, %c0_141] : memref<30x96xf32, #tpu.memory_space<vmem>>, vector<1x32xf32>
    %402 = vector.broadcast %401 : vector<1x32xf32> to vector<16x32xf32>
    %403 = arith.addf %400, %402 : vector<16x32xf32>
    %404 = vector.extract_strided_slice %28 {offsets = [0, 64], sizes = [32, 32], strides = [1, 1]} : vector<64x128xf32> to vector<32x32xf32>
    %c17 = arith.constant 17 : index
    %c0_142 = arith.constant 0 : index
    %405 = vector.load %arg6[%c17, %c0_142] : memref<30x96xf32, #tpu.memory_space<vmem>>, vector<1x32xf32>
    %406 = vector.broadcast %405 : vector<1x32xf32> to vector<32x32xf32>
    %407 = arith.addf %404, %406 : vector<32x32xf32>
    %408 = vector.extract_strided_slice %28 {offsets = [32, 96], sizes = [32, 32], strides = [1, 1]} : vector<64x128xf32> to vector<32x32xf32>
    %c18 = arith.constant 18 : index
    %c0_143 = arith.constant 0 : index
    %409 = vector.load %arg6[%c18, %c0_143] : memref<30x96xf32, #tpu.memory_space<vmem>>, vector<1x32xf32>
    %410 = vector.broadcast %409 : vector<1x32xf32> to vector<32x32xf32>
    %411 = arith.addf %408, %410 : vector<32x32xf32>
    %c8_144 = arith.constant 8 : index
    %c0_145 = arith.constant 0 : index
    %c0_146 = arith.constant 0 : index
    %412 = vector.load %arg4[%c8_144, %c0_145, %c0_146] : memref<11x32x128xf32, #tpu.memory_space<vmem>>, vector<1x32x128xf32>
    %413 = vector.shape_cast %412 : vector<1x32x128xf32> to vector<32x128xf32>
    %414 = vector.extract_strided_slice %413 {offsets = [0, 0], sizes = [32, 32], strides = [1, 1]} : vector<32x128xf32> to vector<32x32xf32>
    %c19 = arith.constant 19 : index
    %c0_147 = arith.constant 0 : index
    %415 = vector.load %arg6[%c19, %c0_147] : memref<30x96xf32, #tpu.memory_space<vmem>>, vector<1x32xf32>
    %416 = vector.extract_strided_slice %403 {offsets = [0, 0], sizes = [16, 8], strides = [1, 1]} : vector<16x32xf32> to vector<16x8xf32>
    %417 = vector.extract_strided_slice %407 {offsets = [0, 0], sizes = [32, 8], strides = [1, 1]} : vector<32x32xf32> to vector<32x8xf32>
    %418 = vector.extract_strided_slice %411 {offsets = [0, 0], sizes = [32, 8], strides = [1, 1]} : vector<32x32xf32> to vector<32x8xf32>
    "tpu.trace_start"() <{level = 10 : i32, message = "qd,kd->qk"}> : () -> ()
    %cst_148 = arith.constant dense<0.000000e+00> : vector<16x32xf32>
    %419 = tpu.matmul %416, %417, %cst_148 {dimension_numbers = #tpu.dot_dimension_numbers<[1], [1], [0], [0], [0, 0, 1, 0], [], []>} : vector<16x8xf32>, vector<32x8xf32>, vector<16x32xf32> -> vector<16x32xf32>
    "tpu.trace_stop"() : () -> ()
    %420 = arith.addf %419, %23 : vector<16x32xf32>
    %cst_149 = arith.constant dense<0xFF800000> : vector<16xf32>
    %421 = vector.multi_reduction <maximumf>, %420, %cst_149 [1] : vector<16x32xf32> to vector<16xf32>
    %422 = vector.shape_cast %421 : vector<16xf32> to vector<16x1xf32>
    %423 = vector.broadcast %422 : vector<16x1xf32> to vector<16x32xf32>
    %424 = arith.subf %420, %423 : vector<16x32xf32>
    %425 = math.exp %424 : vector<16x32xf32>
    %cst_150 = arith.constant dense<0.000000e+00> : vector<16xf32>
    %426 = vector.multi_reduction <add>, %425, %cst_150 [1] : vector<16x32xf32> to vector<16xf32>
    %427 = vector.shape_cast %426 : vector<16xf32> to vector<16x1xf32>
    %428 = vector.broadcast %427 : vector<16x1xf32> to vector<16x32xf32>
    %429 = arith.divf %425, %428 : vector<16x32xf32>
    %cst_151 = arith.constant dense<0.000000e+00> : vector<16x8xf32>
    %430 = tpu.matmul %429, %418, %cst_151 {dimension_numbers = #tpu.dot_dimension_numbers<[1], [0], [0], [1], [0, 0, 1, 1], [], []>} : vector<16x32xf32>, vector<32x8xf32>, vector<16x8xf32> -> vector<16x8xf32>
    %431 = vector.extract_strided_slice %403 {offsets = [0, 8], sizes = [16, 8], strides = [1, 1]} : vector<16x32xf32> to vector<16x8xf32>
    %432 = vector.extract_strided_slice %407 {offsets = [0, 8], sizes = [32, 8], strides = [1, 1]} : vector<32x32xf32> to vector<32x8xf32>
    %433 = vector.extract_strided_slice %411 {offsets = [0, 8], sizes = [32, 8], strides = [1, 1]} : vector<32x32xf32> to vector<32x8xf32>
    "tpu.trace_start"() <{level = 10 : i32, message = "qd,kd->qk"}> : () -> ()
    %cst_152 = arith.constant dense<0.000000e+00> : vector<16x32xf32>
    %434 = tpu.matmul %431, %432, %cst_152 {dimension_numbers = #tpu.dot_dimension_numbers<[1], [1], [0], [0], [0, 0, 1, 0], [], []>} : vector<16x8xf32>, vector<32x8xf32>, vector<16x32xf32> -> vector<16x32xf32>
    "tpu.trace_stop"() : () -> ()
    %435 = arith.addf %434, %23 : vector<16x32xf32>
    %cst_153 = arith.constant dense<0xFF800000> : vector<16xf32>
    %436 = vector.multi_reduction <maximumf>, %435, %cst_153 [1] : vector<16x32xf32> to vector<16xf32>
    %437 = vector.shape_cast %436 : vector<16xf32> to vector<16x1xf32>
    %438 = vector.broadcast %437 : vector<16x1xf32> to vector<16x32xf32>
    %439 = arith.subf %435, %438 : vector<16x32xf32>
    %440 = math.exp %439 : vector<16x32xf32>
    %cst_154 = arith.constant dense<0.000000e+00> : vector<16xf32>
    %441 = vector.multi_reduction <add>, %440, %cst_154 [1] : vector<16x32xf32> to vector<16xf32>
    %442 = vector.shape_cast %441 : vector<16xf32> to vector<16x1xf32>
    %443 = vector.broadcast %442 : vector<16x1xf32> to vector<16x32xf32>
    %444 = arith.divf %440, %443 : vector<16x32xf32>
    %cst_155 = arith.constant dense<0.000000e+00> : vector<16x8xf32>
    %445 = tpu.matmul %444, %433, %cst_155 {dimension_numbers = #tpu.dot_dimension_numbers<[1], [0], [0], [1], [0, 0, 1, 1], [], []>} : vector<16x32xf32>, vector<32x8xf32>, vector<16x8xf32> -> vector<16x8xf32>
    %446 = vector.extract_strided_slice %403 {offsets = [0, 16], sizes = [16, 8], strides = [1, 1]} : vector<16x32xf32> to vector<16x8xf32>
    %447 = vector.extract_strided_slice %407 {offsets = [0, 16], sizes = [32, 8], strides = [1, 1]} : vector<32x32xf32> to vector<32x8xf32>
    %448 = vector.extract_strided_slice %411 {offsets = [0, 16], sizes = [32, 8], strides = [1, 1]} : vector<32x32xf32> to vector<32x8xf32>
    "tpu.trace_start"() <{level = 10 : i32, message = "qd,kd->qk"}> : () -> ()
    %cst_156 = arith.constant dense<0.000000e+00> : vector<16x32xf32>
    %449 = tpu.matmul %446, %447, %cst_156 {dimension_numbers = #tpu.dot_dimension_numbers<[1], [1], [0], [0], [0, 0, 1, 0], [], []>} : vector<16x8xf32>, vector<32x8xf32>, vector<16x32xf32> -> vector<16x32xf32>
    "tpu.trace_stop"() : () -> ()
    %450 = arith.addf %449, %23 : vector<16x32xf32>
    %cst_157 = arith.constant dense<0xFF800000> : vector<16xf32>
    %451 = vector.multi_reduction <maximumf>, %450, %cst_157 [1] : vector<16x32xf32> to vector<16xf32>
    %452 = vector.shape_cast %451 : vector<16xf32> to vector<16x1xf32>
    %453 = vector.broadcast %452 : vector<16x1xf32> to vector<16x32xf32>
    %454 = arith.subf %450, %453 : vector<16x32xf32>
    %455 = math.exp %454 : vector<16x32xf32>
    %cst_158 = arith.constant dense<0.000000e+00> : vector<16xf32>
    %456 = vector.multi_reduction <add>, %455, %cst_158 [1] : vector<16x32xf32> to vector<16xf32>
    %457 = vector.shape_cast %456 : vector<16xf32> to vector<16x1xf32>
    %458 = vector.broadcast %457 : vector<16x1xf32> to vector<16x32xf32>
    %459 = arith.divf %455, %458 : vector<16x32xf32>
    %cst_159 = arith.constant dense<0.000000e+00> : vector<16x8xf32>
    %460 = tpu.matmul %459, %448, %cst_159 {dimension_numbers = #tpu.dot_dimension_numbers<[1], [0], [0], [1], [0, 0, 1, 1], [], []>} : vector<16x32xf32>, vector<32x8xf32>, vector<16x8xf32> -> vector<16x8xf32>
    %461 = vector.extract_strided_slice %403 {offsets = [0, 24], sizes = [16, 8], strides = [1, 1]} : vector<16x32xf32> to vector<16x8xf32>
    %462 = vector.extract_strided_slice %407 {offsets = [0, 24], sizes = [32, 8], strides = [1, 1]} : vector<32x32xf32> to vector<32x8xf32>
    %463 = vector.extract_strided_slice %411 {offsets = [0, 24], sizes = [32, 8], strides = [1, 1]} : vector<32x32xf32> to vector<32x8xf32>
    "tpu.trace_start"() <{level = 10 : i32, message = "qd,kd->qk"}> : () -> ()
    %cst_160 = arith.constant dense<0.000000e+00> : vector<16x32xf32>
    %464 = tpu.matmul %461, %462, %cst_160 {dimension_numbers = #tpu.dot_dimension_numbers<[1], [1], [0], [0], [0, 0, 1, 0], [], []>} : vector<16x8xf32>, vector<32x8xf32>, vector<16x32xf32> -> vector<16x32xf32>
    "tpu.trace_stop"() : () -> ()
    %465 = arith.addf %464, %23 : vector<16x32xf32>
    %cst_161 = arith.constant dense<0xFF800000> : vector<16xf32>
    %466 = vector.multi_reduction <maximumf>, %465, %cst_161 [1] : vector<16x32xf32> to vector<16xf32>
    %467 = vector.shape_cast %466 : vector<16xf32> to vector<16x1xf32>
    %468 = vector.broadcast %467 : vector<16x1xf32> to vector<16x32xf32>
    %469 = arith.subf %465, %468 : vector<16x32xf32>
    %470 = math.exp %469 : vector<16x32xf32>
    %cst_162 = arith.constant dense<0.000000e+00> : vector<16xf32>
    %471 = vector.multi_reduction <add>, %470, %cst_162 [1] : vector<16x32xf32> to vector<16xf32>
    %472 = vector.shape_cast %471 : vector<16xf32> to vector<16x1xf32>
    %473 = vector.broadcast %472 : vector<16x1xf32> to vector<16x32xf32>
    %474 = arith.divf %470, %473 : vector<16x32xf32>
    %cst_163 = arith.constant dense<0.000000e+00> : vector<16x8xf32>
    %475 = tpu.matmul %474, %463, %cst_163 {dimension_numbers = #tpu.dot_dimension_numbers<[1], [0], [0], [1], [0, 0, 1, 1], [], []>} : vector<16x32xf32>, vector<32x8xf32>, vector<16x8xf32> -> vector<16x8xf32>
    %476 = tpu.concatenate %430, %445, %460, %475 in 1 : vector<16x8xf32>, vector<16x8xf32>, vector<16x8xf32>, vector<16x8xf32> -> vector<16x32xf32>
    %cst_164 = arith.constant dense<0.000000e+00> : vector<16x32xf32>
    %477 = tpu.matmul %476, %414, %cst_164 {dimension_numbers = #tpu.dot_dimension_numbers<[1], [0], [0], [1], [0, 0, 1, 1], [], []>} : vector<16x32xf32>, vector<32x32xf32>, vector<16x32xf32> -> vector<16x32xf32>
    %478 = vector.broadcast %415 : vector<1x32xf32> to vector<16x32xf32>
    %479 = arith.addf %477, %478 : vector<16x32xf32>
    %480 = arith.addf %395, %479 : vector<16x32xf32>
    %cst_165 = arith.constant dense<0.000000e+00> : vector<16xf32>
    %481 = vector.multi_reduction <add>, %480, %cst_165 [1] : vector<16x32xf32> to vector<16xf32>
    %482 = vector.shape_cast %481 : vector<16xf32> to vector<16x1xf32>
    %cst_166 = arith.constant 3.200000e+01 : f32
    %483 = vector.broadcast %cst_166 : f32 to vector<16x1xf32>
    %484 = arith.divf %482, %483 : vector<16x1xf32>
    %485 = vector.broadcast %484 : vector<16x1xf32> to vector<16x32xf32>
    %486 = arith.subf %480, %485 : vector<16x32xf32>
    %487 = vector.broadcast %484 : vector<16x1xf32> to vector<16x32xf32>
    %488 = arith.subf %480, %487 : vector<16x32xf32>
    %489 = arith.mulf %486, %488 : vector<16x32xf32>
    %cst_167 = arith.constant dense<0.000000e+00> : vector<16xf32>
    %490 = vector.multi_reduction <add>, %489, %cst_167 [1] : vector<16x32xf32> to vector<16xf32>
    %491 = vector.shape_cast %490 : vector<16xf32> to vector<16x1xf32>
    %cst_168 = arith.constant 3.200000e+01 : f32
    %492 = vector.broadcast %cst_168 : f32 to vector<16x1xf32>
    %493 = arith.divf %491, %492 : vector<16x1xf32>
    %494 = vector.broadcast %484 : vector<16x1xf32> to vector<16x32xf32>
    %495 = arith.subf %480, %494 : vector<16x32xf32>
    %cst_169 = arith.constant 9.99999974E-6 : f32
    %496 = vector.broadcast %cst_169 : f32 to vector<16x1xf32>
    %497 = arith.addf %493, %496 : vector<16x1xf32>
    %498 = math.rsqrt %497 : vector<16x1xf32>
    %499 = vector.broadcast %498 : vector<16x1xf32> to vector<16x32xf32>
    %500 = arith.mulf %495, %499 : vector<16x32xf32>
    %c24 = arith.constant 24 : index
    %c0_170 = arith.constant 0 : index
    %501 = vector.load %arg6[%c24, %c0_170] : memref<30x96xf32, #tpu.memory_space<vmem>>, vector<1x32xf32>
    %502 = vector.broadcast %501 : vector<1x32xf32> to vector<16x32xf32>
    %503 = arith.mulf %500, %502 : vector<16x32xf32>
    %c25 = arith.constant 25 : index
    %c0_171 = arith.constant 0 : index
    %504 = vector.load %arg6[%c25, %c0_171] : memref<30x96xf32, #tpu.memory_space<vmem>>, vector<1x32xf32>
    %505 = vector.broadcast %504 : vector<1x32xf32> to vector<16x32xf32>
    %506 = arith.addf %503, %505 : vector<16x32xf32>
    %c9_172 = arith.constant 9 : index
    %c0_173 = arith.constant 0 : index
    %c0_174 = arith.constant 0 : index
    %507 = vector.load %arg4[%c9_172, %c0_173, %c0_174] : memref<11x32x128xf32, #tpu.memory_space<vmem>>, vector<1x32x128xf32>
    %508 = vector.shape_cast %507 : vector<1x32x128xf32> to vector<32x128xf32>
    %509 = vector.extract_strided_slice %508 {offsets = [0, 0], sizes = [32, 64], strides = [1, 1]} : vector<32x128xf32> to vector<32x64xf32>
    %cst_175 = arith.constant dense<0.000000e+00> : vector<16x64xf32>
    %510 = tpu.matmul %506, %509, %cst_175 {dimension_numbers = #tpu.dot_dimension_numbers<[1], [0], [0], [1], [0, 0, 1, 1], [], []>} : vector<16x32xf32>, vector<32x64xf32>, vector<16x64xf32> -> vector<16x64xf32>
    %c20 = arith.constant 20 : index
    %c0_176 = arith.constant 0 : index
    %511 = vector.load %arg6[%c20, %c0_176] : memref<30x96xf32, #tpu.memory_space<vmem>>, vector<1x64xf32>
    %512 = vector.broadcast %511 : vector<1x64xf32> to vector<16x64xf32>
    %513 = arith.addf %510, %512 : vector<16x64xf32>
    %cst_177 = arith.constant 0.000000e+00 : f32
    %514 = vector.broadcast %cst_177 : f32 to vector<16x64xf32>
    %515 = arith.maximumf %513, %514 : vector<16x64xf32>
    %c1_178 = arith.constant 1 : index
    %c0_179 = arith.constant 0 : index
    %c0_180 = arith.constant 0 : index
    %516 = vector.load %arg5[%c1_178, %c0_179, %c0_180] : memref<2x64x32xf32, #tpu.memory_space<vmem>>, vector<1x64x32xf32>
    %517 = vector.shape_cast %516 : vector<1x64x32xf32> to vector<64x32xf32>
    %cst_181 = arith.constant dense<0.000000e+00> : vector<16x32xf32>
    %518 = tpu.matmul %515, %517, %cst_181 {dimension_numbers = #tpu.dot_dimension_numbers<[1], [0], [0], [1], [0, 0, 1, 1], [], []>} : vector<16x64xf32>, vector<64x32xf32>, vector<16x32xf32> -> vector<16x32xf32>
    %c21 = arith.constant 21 : index
    %c0_182 = arith.constant 0 : index
    %519 = vector.load %arg6[%c21, %c0_182] : memref<30x96xf32, #tpu.memory_space<vmem>>, vector<1x32xf32>
    %520 = vector.broadcast %519 : vector<1x32xf32> to vector<16x32xf32>
    %521 = arith.addf %518, %520 : vector<16x32xf32>
    %522 = arith.addf %506, %521 : vector<16x32xf32>
    %cst_183 = arith.constant dense<0.000000e+00> : vector<16xf32>
    %523 = vector.multi_reduction <add>, %522, %cst_183 [1] : vector<16x32xf32> to vector<16xf32>
    %524 = vector.shape_cast %523 : vector<16xf32> to vector<16x1xf32>
    %cst_184 = arith.constant 3.200000e+01 : f32
    %525 = vector.broadcast %cst_184 : f32 to vector<16x1xf32>
    %526 = arith.divf %524, %525 : vector<16x1xf32>
    %527 = vector.broadcast %526 : vector<16x1xf32> to vector<16x32xf32>
    %528 = arith.subf %522, %527 : vector<16x32xf32>
    %529 = vector.broadcast %526 : vector<16x1xf32> to vector<16x32xf32>
    %530 = arith.subf %522, %529 : vector<16x32xf32>
    %531 = arith.mulf %528, %530 : vector<16x32xf32>
    %cst_185 = arith.constant dense<0.000000e+00> : vector<16xf32>
    %532 = vector.multi_reduction <add>, %531, %cst_185 [1] : vector<16x32xf32> to vector<16xf32>
    %533 = vector.shape_cast %532 : vector<16xf32> to vector<16x1xf32>
    %cst_186 = arith.constant 3.200000e+01 : f32
    %534 = vector.broadcast %cst_186 : f32 to vector<16x1xf32>
    %535 = arith.divf %533, %534 : vector<16x1xf32>
    %536 = vector.broadcast %526 : vector<16x1xf32> to vector<16x32xf32>
    %537 = arith.subf %522, %536 : vector<16x32xf32>
    %cst_187 = arith.constant 9.99999974E-6 : f32
    %538 = vector.broadcast %cst_187 : f32 to vector<16x1xf32>
    %539 = arith.addf %535, %538 : vector<16x1xf32>
    %540 = math.rsqrt %539 : vector<16x1xf32>
    %541 = vector.broadcast %540 : vector<16x1xf32> to vector<16x32xf32>
    %542 = arith.mulf %537, %541 : vector<16x32xf32>
    %c26 = arith.constant 26 : index
    %c0_188 = arith.constant 0 : index
    %543 = vector.load %arg6[%c26, %c0_188] : memref<30x96xf32, #tpu.memory_space<vmem>>, vector<1x32xf32>
    %544 = vector.broadcast %543 : vector<1x32xf32> to vector<16x32xf32>
    %545 = arith.mulf %542, %544 : vector<16x32xf32>
    %c27 = arith.constant 27 : index
    %c0_189 = arith.constant 0 : index
    %546 = vector.load %arg6[%c27, %c0_189] : memref<30x96xf32, #tpu.memory_space<vmem>>, vector<1x32xf32>
    %547 = vector.broadcast %546 : vector<1x32xf32> to vector<16x32xf32>
    %548 = arith.addf %545, %547 : vector<16x32xf32>
    %cst_190 = arith.constant dense<0.000000e+00> : vector<16xf32>
    %549 = vector.multi_reduction <add>, %548, %cst_190 [1] : vector<16x32xf32> to vector<16xf32>
    %550 = vector.shape_cast %549 : vector<16xf32> to vector<16x1xf32>
    %cst_191 = arith.constant 3.200000e+01 : f32
    %551 = vector.broadcast %cst_191 : f32 to vector<16x1xf32>
    %552 = arith.divf %550, %551 : vector<16x1xf32>
    %553 = vector.broadcast %552 : vector<16x1xf32> to vector<16x32xf32>
    %554 = arith.subf %548, %553 : vector<16x32xf32>
    %555 = vector.broadcast %552 : vector<16x1xf32> to vector<16x32xf32>
    %556 = arith.subf %548, %555 : vector<16x32xf32>
    %557 = arith.mulf %554, %556 : vector<16x32xf32>
    %cst_192 = arith.constant dense<0.000000e+00> : vector<16xf32>
    %558 = vector.multi_reduction <add>, %557, %cst_192 [1] : vector<16x32xf32> to vector<16xf32>
    %559 = vector.shape_cast %558 : vector<16xf32> to vector<16x1xf32>
    %cst_193 = arith.constant 3.200000e+01 : f32
    %560 = vector.broadcast %cst_193 : f32 to vector<16x1xf32>
    %561 = arith.divf %559, %560 : vector<16x1xf32>
    %562 = vector.broadcast %552 : vector<16x1xf32> to vector<16x32xf32>
    %563 = arith.subf %548, %562 : vector<16x32xf32>
    %cst_194 = arith.constant 9.99999974E-6 : f32
    %564 = vector.broadcast %cst_194 : f32 to vector<16x1xf32>
    %565 = arith.addf %561, %564 : vector<16x1xf32>
    %566 = math.rsqrt %565 : vector<16x1xf32>
    %567 = vector.broadcast %566 : vector<16x1xf32> to vector<16x32xf32>
    %568 = arith.mulf %563, %567 : vector<16x32xf32>
    %c28 = arith.constant 28 : index
    %c0_195 = arith.constant 0 : index
    %569 = vector.load %arg6[%c28, %c0_195] : memref<30x96xf32, #tpu.memory_space<vmem>>, vector<1x32xf32>
    %570 = vector.broadcast %569 : vector<1x32xf32> to vector<16x32xf32>
    %571 = arith.mulf %568, %570 : vector<16x32xf32>
    %c29 = arith.constant 29 : index
    %c0_196 = arith.constant 0 : index
    %572 = vector.load %arg6[%c29, %c0_196] : memref<30x96xf32, #tpu.memory_space<vmem>>, vector<1x32xf32>
    %573 = vector.broadcast %572 : vector<1x32xf32> to vector<16x32xf32>
    %574 = arith.addf %571, %573 : vector<16x32xf32>
    %c0_197 = arith.constant 0 : index
    %c0_198 = arith.constant 0 : index
    %575 = vector.load %arg7[%c0_197, %c0_198] : memref<16x32xf32, #tpu.memory_space<vmem>>, vector<16x32xf32>
    tpu.vector_store %arg7[%c0_197, %c0_198], %574 {strides = array<i32>} : memref<16x32xf32, #tpu.memory_space<vmem>>, vector<16x32xf32>,
    return
  }
}

</mosaic_0001>

<bundles_post_ra>
// kernel: transformer_decoder.1
= control target key start
LH: loop header
LB: loop body
LE: loop exit
PB: predicated region body
PF: predicated region fallthrough
CT: control target
= control target key end

     0   :  { %12 = vsyncpa [#allocation3], 0  ;;  %s4832_s0 = inlined_call_operand.vmem [shape: f32[16,32], index: 0, kind: input, shape index: {}]   ;;  %s4833_s1 = inlined_call_operand.vmem [shape: f32[32,32], index: 1, kind: input, shape index: {}]   ;;  %s4834_s2 = inlined_call_operand.vmem [shape: f32[16,32], index: 2, kind: input, shape index: {}]   ;;  %s4835_s3 = inlined_call_operand.vmem [shape: f32[32,32], index: 3, kind: input, shape index: {}]   ;;  %s4836_s4 = inlined_call_operand.hbm [shape: f32[11,32,128], index: 4, kind: input, shape index: {}]   ;;  %s4837_s5 = inlined_call_operand.vmem [shape: f32[2,64,32], index: 5, kind: input, shape index: {}]   ;;  %s4838_s6 = inlined_call_operand.vmem [shape: f32[30,96], index: 6, kind: input, shape index: {}]   ;;  %s4839_s7 = inlined_call_operand.hbm [shape: f32[16,32], index: 7, kind: output, shape index: {}]  }
   0x1   :  { %13 = vsyncpa [#allocation4], 0  ;;  %s26_s26 = sshll.u32 %s4836_s4, 4  ;;  %s3793_s27 = smov [#allocation2]   ;;  %s27_s26 = int_to_ptr.hbm [resolvable:$true] %s26_s26 }
   0x2   :  { %s28_s28 = sshll.u32 %s3793_s27, 4  ;;  %s3794_s29 = smov 128   ;;  %s29_s28 = int_to_ptr.vmem [resolvable:$true] %s28_s28 }
   0x3   :  { %s3795_s30 = smov 8  }
   0x4   :  { %34 = dma.hbm_to_vmem [thread:$0]  %s27_s26, 5632, %s29_s28, [#allocation3], %s3794_s29, %s3794_s29, %s3795_s30  }
   0x5   :  { %3789 = dma.done.wait [#allocation3], 5632  }
   0x6   :  { %3790 = vsyncadd [#allocation3], 4294961664  ;;  %v75_v0 = vld [vmem:[#allocation2 + $0x158] sm:$0xff]  ;;  %v74_v1 = vld [vmem:[#allocation2 + $0x150] sm:$0xff]  ;;  %vm76_vm0 = vcmask 261120   ;;  %s3796_s18 = smov 96   ;;  %v55_v33 = vlaneseq }
   0x7   :  { %3404 = vmatpush.msra.mxu1 %v75_v0  ;;  %113 = vmatpush.msra.mxu0 %v75_v0  ;;  %v73_v2 = vld [vmem:[#allocation2 + $0x148] sm:$0xff]  ;;  %v72_v3 = vld [vmem:[#allocation2 + $0x140] sm:$0xff]  ;;  %v3862_v4 = vld [vmem:[%s4833_s1 + $0x18] sm:$0xff]  ;;  %s3797_s19 = smov 88   ;;  %s3798_s20 = smov 64   ;;  %vm203_vm1 = vcmask 64512  }
   0x8   :  { %v147_v5 = vld [vmem:[#allocation2 + $0x18] sm:$0xff]  ;;  %v146_v6 = vld [vmem:[#allocation2 + $0x10] sm:$0xff]  ;;  %v3867_v7 = vld [vmem:[%s4832_s0] sm:$0xff]  ;;  %s3799_s21 = smov 120   ;;  %v56_v34 = vshrl.u32 %v55_v33, 7  ;;  %v59_v35 = vand.u32 127, %v55_v33 }
   0x9   :  { %3405 = vmatpush.msra.mxu1 %v74_v1  ;;  %114 = vmatpush.msra.mxu0 %v74_v1  ;;  %v45_v8 = vld [vmem:[%s4834_s2] sm:$0xff]  ;;  %v145_v9 = vld [vmem:[#allocation2 + $0x8] sm:$0xff]  ;;  %v3800_v39 = vmov -1e+30   ;;  %vm235_vm3 = vcmask 130048   ;;  %s3801_s22 = smov 56  }
   0xa   :  { %v144_v10 = vld [vmem:[#allocation2] sm:$0xff]  ;;  %v142_v11 = vadd.f32 %v45_v8, %v3867_v7  ;;  %v3879_v12 = vld [vmem:[%s4832_s0 + $0x8] sm:$0xff]  ;;  %v60_v36 = vand.u32 1, %v56_v34  ;;  %v62_v37 = vand.u32 1, %v59_v35  ;;  %v57_v38 = vadd.s32 8, %v56_v34  ;;  %s3802_s23 = smov 80  }
   0xb   :  { %3406 = vmatpush.msra.mxu1 %v73_v2  ;;  %115 = vmatpush.msra.mxu0 %v73_v2  ;;  %v3884_v13 = vld [vmem:[%s4834_s2 + $0x8] sm:$0xff]  ;;  %v3550_v17 = vld [vmem:[%s4838_s6] ss:$0 sm:$0xff]  ;;  %s3803_s24 = smov 72   ;;  %s3804_s25 = smov 112  }
   0xc   :  { %v143_v14 = vadd.f32 %v3884_v13, %v3879_v12  ;;  %vm63_vm2 = vcmp.eq.s32.totalorder %v60_v36, %v62_v37  ;;  %v61_v41 = vand.u32 1, %v57_v38  ;;  %s3805_s26 = smov 104   ;;  %s3806_s27 = smov 40  }
   0xd   :  { %3407 = vmatpush.msra.mxu1 %v72_v3  ;;  %116 = vmatpush.msra.mxu0 %v72_v3  ;;  %v3924_v40 = vsel %vm63_vm2, 0.0, %v3800_v39  ;;  %s3807_s28 = smov 48   ;;  %s3808_s4 = smov 24  }
   0xe   :  { %3255 = vmatmul.msk.f32.vlgmr.msra.gmra.mxu1 %vm76_vm0, %v3862_v4  ;;  %vm64_vm4 = vcmp.eq.s32.totalorder %v61_v41, %v62_v37  ;;  %s3809_s8 = smov 16   ;;  %s3812_s11 = smov [#allocation5]  }
   0xf   :  { %174 = vmatpush.msrb.mxu1 %v147_v5  ;;  %v3928_v45 = vsel %vm64_vm4, 0.0, %v3800_v39  ;;  %s3233_s12 = sshll.u32 %s3812_s11, 4  ;;  %s3234_s12 = int_to_ptr.vmem [resolvable:$true] %s3233_s12 }
  0x11   :  { %175 = vmatpush.msrb.mxu1 %v146_v6 }
  0x13   :  { %176 = vmatpush.msrb.mxu1 %v145_v9 }
  0x15   :  { %177 = vmatpush.msrb.mxu1 %v144_v10 }
  0x16   :  { %3256 = vmatmul.msk.f32.vlgmr.msrb.gmra.mxu1 %vm76_vm0, %v142_v11 }
  0x1e   :  { %3257 = vmatmul.msk.f32.gmra.mxu1 %vm76_vm0, %v143_v14 }
  0x26   :  { %3258 = vmatmul.msk.f32.gmra.mxu1 %vm76_vm0, %v3867_v7 }
  0x2e   :  { %3259 = vmatmul.msk.f32.gmra.mxu1 %vm76_vm0, %v3879_v12 }
  0x8b   :  { %v3893_v15 = vpop.f32.mrf.mxu1 }
  0x93   :  { %v179_v16 = vpop.f32.mrf.mxu1 }
  0x94   :  { %v3902_v21 = vadd.f32 %v3550_v17, %v179_v16 }
  0x9b   :  { %v182_v18 = vpop.f32.mrf.mxu1 }
  0x9c   :  { %v3898_v19 = vadd.f32 %v3550_v17, %v182_v18 }
  0x9e   :  { %201 = vrot.lane.b32.xlu0 %v3898_v19, %s3796_s18 }
  0xa3   :  { %v185_v20 = vpop.f32.mrf.mxu1 }
  0xa4   :  { %v186_v22 = vadd.f32 %v3550_v17, %v185_v20 }
  0xa6   :  { %199 = vrot.lane.b32.xlu0 %v3902_v21, %s3796_s18 }
  0xab   :  { %v188_v23 = vpop.f32.mrf.mxu1 }
  0xac   :  { %v189_v24 = vadd.f32 %v3550_v17, %v188_v23 }
  0xae   :  { %325 = vrot.lane.b32.xlu0 %v3902_v21, %s3797_s19  ;;  %v3908_v25 = vpack.i.bf16 %v186_v22, %v189_v24 }
  0xb0   :  { %3431 = vrot.lane.b32.xlu2 %v3908_v25, %s3798_s20 }
  0xb8   :  { %327 = vrot.lane.b32.xlu2 %v3898_v19, %s3797_s19 }
  0xc0   :  { %323 = vrot.lane.b32.xlu2 %v3898_v19, %s3799_s21 }
 0x10a   :  { %v3432_v26 = vpop.permute.xlu2 %3431 }
 0x10b   :  { %v3433_v27 = vunpack.i.l.bf16 %v3432_v26  ;;  %v3434_v28 = vunpack.i.h.bf16 %v3432_v26 }
 0x10d   :  { %3408 = vmatpush.msra.mxu3 %v3433_v27 }
 0x10f   :  { %3409 = vmatpush.msra.mxu3 %v3434_v28 }
 0x110   :  { %v202_v29 = vpop.permute.xlu0 %201 }
 0x111   :  { %3260 = vmatpush.xpose.msk.msra.mxu2 %vm203_vm1, %v202_v29 }
 0x112   :  { %v328_v30 = vpop.permute.xlu2 %327 }
 0x113   :  { %3266 = vmatpush.xpose.msk.msrb.mxu3 %vm203_vm1, %v328_v30 }
 0x118   :  { %v200_v31 = vpop.permute.xlu0 %199 }
 0x119   :  { %3261 = vmatpush.xpose.msk.msra.mxu2 %vm203_vm1, %v200_v31 }
 0x11a   :  { %v324_v10 = vpop.permute.xlu2 %323 }
 0x11c   :  { %3262 = vmatmul.msk.f32.vlgmr.msra.gmra.mxu2 %vm203_vm1, %v3902_v21 }
 0x11d   :  { %312 = vmatpush.msrb.mxu2 %v3433_v27 }
 0x11f   :  { %313 = vmatpush.msrb.mxu2 %v3434_v28 }
 0x120   :  { %v326_v32 = vpop.permute.xlu0 %325 }
 0x121   :  { %3267 = vmatpush.xpose.msk.msrb.mxu3 %vm203_vm1, %v326_v32 }
 0x124   :  { %3263 = vmatmul.msk.f32.gmra.mxu2 %vm203_vm1, %v3898_v19 }
 0x19f   :  { %v229_v42 = vpop.f32.mrf.mxu2 }
 0x1a0   :  { %v230_v43 = vadd.f32 %v229_v42, %v3924_v40 }
 0x1a2   :  { %v236_v44 = vsel %vm235_vm3, %v230_v43, -inf }
 0x1a3   :  { %237 = vmax.xlane.f32.xlu0 %v236_v44 }
 0x1a7   :  { %v232_v46 = vpop.f32.mrf.mxu2 }
 0x1a8   :  { %v233_v47 = vadd.f32 %v232_v46, %v3928_v45 }
 0x1aa   :  { %v239_v48 = vsel %vm235_vm3, %v233_v47, -inf }
 0x1ab   :  { %240 = vmax.xlane.f32.xlu1 %v239_v48 }
 0x1b7   :  { %3436 = vrot.lane.b32.xlu0 %v3908_v25, %s3801_s22 }
 0x1bf   :  { %449 = vrot.lane.b32.xlu0 %v3898_v19, %s3802_s23 }
 0x216   :  { %v238_v51 = vpop.xlane.xlu0 %237 }
 0x217   :  { %v242_v14 = vsub.f32 %v230_v43, %v238_v51 }
 0x219   :  { %v244_v16 = vmul.f32 1.442695, %v242_v14 }
 0x21e   :  { %v241_v49 = vpop.xlane.xlu1 %240 }
 0x21f   :  { %v243_v50 = vsub.f32 %v233_v47, %v241_v49 }
 0x221   :  { %v246_v52 = vmul.f32 1.442695, %v243_v50 }
 0x223   :  { %3580 = vpow2.f32 %v246_v52 }
 0x229   :  { %v3581_v53 = vpop.eup %3580  ;;  %v3437_v54 = vpop.permute.xlu0 %3436 }
 0x22a   :  { %v3439_v55 = vunpack.i.h.bf16 %v3437_v54  ;;  %v3438_v56 = vunpack.i.l.bf16 %v3437_v54  ;;  %v251_v57 = vsel %vm235_vm3, %v3581_v53, 0.0 }
 0x22b   :  { %252 = vadd.xlane.f32.xlu1 %v251_v57 }
 0x22c   :  { %434 = vmatpush.msra.mxu2 %v3438_v56 }
 0x22e   :  { %435 = vmatpush.msra.mxu2 %v3439_v55 }
 0x231   :  { %v450_v8 = vpop.permute.xlu0 %449 }
 0x244   :  { %321 = vrot.lane.b32.xlu1 %v3902_v21, %s3799_s21 }
 0x29e   :  { %v253_v58 = vpop.xlane.xlu1 %252 }
 0x29f   :  { %3582 = vrcp.f32 %v253_v58  ;;  %v280_v62 = vand.u32 2147483648, %v253_v58  ;;  %v278_v0 = vand.u32 2147483647, %v253_v58  ;;  %vm274_vm6 = vweird.f32 %v253_v58 }
 0x2a0   :  { %3584 = vpow2.f32 %v244_v16 }
 0x2a1   :  { %v281_v2 = vor.u32 1.1754944e-38, %v280_v62  ;;  %vm279_vm8 = vcmp.eq.f32.partialorder %v278_v0, 8.507059e+37 }
 0x2a5   :  { %v3583_v59 = vpop.eup %3582 }
 0x2a6   :  { %v270_v60 = vmul.f32 %v3583_v59, %v253_v58  ;;  %vm275_vm5 = vweird.f32 %v3583_v59  ;;  %v3585_v22 = vpop.eup %3584 }
 0x2a7   :  { %vm276_vm7 = vmor %vm274_vm6, %vm275_vm5  ;;  %v248_v27 = vsel %vm235_vm3, %v3585_v22, 0.0 }
 0x2a8   :  { %v271_v61 = vsub.f32 1.0, %v270_v60 }
 0x2aa   :  { %v272_v63 = vmul.f32 %v3583_v59, %v271_v61 }
 0x2ac   :  { %v273_v1 = vadd.f32 %v3583_v59, %v272_v63 }
 0x2ae   :  { %v277_v3 = vsel %vm276_vm7, %v3583_v59, %v273_v1 }
 0x2af   :  { %v282_v5 = vsel %vm279_vm8, %v281_v2, %v277_v3 }
 0x2b0   :  { %v283_v6 = vmul.f32 %v3581_v53, %v282_v5 }
 0x2b2   :  { %3265 = vmatmul.msk.f32.vlgmr.msra.gmra.mxu3 %vm235_vm3, %v283_v6 }
 0x2b3   :  { %3272 = vmatpush.xpose.msk.msra.mxu3 %vm203_vm1, %v450_v8 }
 0x2b6   :  { %v322_v9 = vpop.permute.xlu1 %321 }
 0x2ba   :  { %3268 = vmatmul.msk.f32.vlgmr.msrb.gmra.mxu3 %vm203_vm1, %v322_v9 }
 0x2c2   :  { %3269 = vmatmul.msk.f32.gmra.mxu3 %vm203_vm1, %v324_v10 }
 0x335   :  { %v3943_v11 = vpop.f32.mrf.mxu3 }
 0x33d   :  { %v354_v17 = vpop.f32.mrf.mxu3 }
 0x33e   :  { %v355_v18 = vadd.f32 %v354_v17, %v3924_v40 }
 0x340   :  { %v360_v20 = vsel %vm235_vm3, %v355_v18, -inf }
 0x341   :  { %361 = vmax.xlane.f32.xlu2 %v360_v20 }
 0x345   :  { %v357_v23 = vpop.f32.mrf.mxu3 }
 0x346   :  { %v358_v24 = vadd.f32 %v357_v23, %v3928_v45 }
 0x348   :  { %v363_v26 = vsel %vm235_vm3, %v358_v24, -inf }
 0x349   :  { %364 = vmax.xlane.f32.xlu1 %v363_v26  ;;  %249 = vadd.xlane.f32.xlu2 %v248_v27 }
 0x361   :  { %571 = vrot.lane.b32.xlu2 %v3898_v19, %s3803_s24 }
 0x362   :  { %569 = vrot.lane.b32.xlu1 %v3902_v21, %s3803_s24 }
 0x369   :  { %447 = vrot.lane.b32.xlu2 %v3902_v21, %s3802_s23 }
 0x36a   :  { %443 = vrot.lane.b32.xlu1 %v3902_v21, %s3804_s25 }
 0x3b4   :  { %v362_v28 = vpop.xlane.xlu2 %361 }
 0x3b5   :  { %v366_v29 = vsub.f32 %v355_v18, %v362_v28 }
 0x3b7   :  { %v368_v30 = vmul.f32 1.442695, %v366_v29 }
 0x3b9   :  { %3586 = vpow2.f32 %v368_v30 }
 0x3bc   :  { %v365_v31 = vpop.xlane.xlu1 %364  ;;  %v250_v32 = vpop.xlane.xlu2 %249 }
 0x3bd   :  { %v367_v33 = vsub.f32 %v358_v24, %v365_v31  ;;  %3588 = vrcp.f32 %v250_v32  ;;  %v265_v43 = vand.u32 2147483648, %v250_v32  ;;  %v263_v47 = vand.u32 2147483647, %v250_v32 }
 0x3be   :  { %vm259_vm10 = vweird.f32 %v250_v32 }
 0x3bf   :  { %v3587_v34 = vpop.eup %3586  ;;  %v370_v35 = vmul.f32 1.442695, %v367_v33  ;;  %v266_v49 = vor.u32 1.1754944e-38, %v265_v43  ;;  %vm264_vm12 = vcmp.eq.f32.partialorder %v263_v47, 8.507059e+37 }
 0x3c0   :  { %v372_v36 = vsel %vm235_vm3, %v3587_v34, 0.0 }
 0x3c1   :  { %3590 = vpow2.f32 %v370_v35  ;;  %373 = vadd.xlane.f32.xlu0 %v372_v36 }
 0x3c3   :  { %v3589_v37 = vpop.eup %3588 }
 0x3c4   :  { %v255_v38 = vmul.f32 %v3589_v37, %v250_v32  ;;  %v572_v39 = vpop.permute.xlu2 %571  ;;  %vm260_vm9 = vweird.f32 %v3589_v37 }
 0x3c5   :  { %vm261_vm11 = vmor %vm259_vm10, %vm260_vm9 }
 0x3c6   :  { %v256_v41 = vsub.f32 1.0, %v255_v38 }
 0x3c7   :  { %v3959_v42 = vpop.eup %3590 }
 0x3c8   :  { %v257_v44 = vmul.f32 %v3589_v37, %v256_v41  ;;  %v375_v46 = vsel %vm235_vm3, %v3959_v42, 0.0 }
 0x3c9   :  { %376 = vadd.xlane.f32.xlu2 %v375_v46 }
 0x3ca   :  { %v258_v48 = vadd.f32 %v3589_v37, %v257_v44 }
 0x3cc   :  { %v448_v50 = vpop.permute.xlu2 %447  ;;  %v262_v51 = vsel %vm261_vm11, %v3589_v37, %v258_v48 }
 0x3cd   :  { %3273 = vmatpush.xpose.msk.msra.mxu3 %vm203_vm1, %v448_v50  ;;  %v267_v52 = vsel %vm264_vm12, %v266_v49, %v262_v51 }
 0x3ce   :  { %v268_v53 = vmul.f32 %v3585_v22, %v267_v52 }
 0x3d0   :  { %3264 = vmatmul.msk.f32.vlgmr.msrb.gmra.mxu2 %vm235_vm3, %v268_v53 }
 0x3d1   :  { %3278 = vmatpush.xpose.msk.msrb.mxu2 %vm203_vm1, %v572_v39 }
 0x3d4   :  { %v570_v54 = vpop.permute.xlu1 %569 }
 0x3d5   :  { %565 = vrot.lane.b32.xlu0 %v3902_v21, %s3805_s26  ;;  %3279 = vmatpush.xpose.msk.msrb.mxu2 %vm203_vm1, %v570_v54 }
 0x3dc   :  { %v444_v55 = vpop.permute.xlu1 %443 }
 0x3dd   :  { %567 = vrot.lane.b32.xlu0 %v3898_v19, %s3805_s26  ;;  %3274 = vmatmul.msk.f32.vlgmr.msra.gmra.mxu3 %vm203_vm1, %v444_v55 }
 0x3e1   :  { %445 = vrot.lane.b32.xlu2 %v3898_v19, %s3804_s25 }
 0x434   :  { %v374_v56 = vpop.xlane.xlu0 %373 }
 0x435   :  { %3592 = vrcp.f32 %v374_v56  ;;  %v389_v61 = vand.u32 2147483648, %v374_v56  ;;  %v387_v62 = vand.u32 2147483647, %v374_v56  ;;  %vm383_vm14 = vweird.f32 %v374_v56 }
 0x437   :  { %v390_v1 = vor.u32 1.1754944e-38, %v389_v61  ;;  %vm388_vm2 = vcmp.eq.f32.partialorder %v387_v62, 8.507059e+37 }
 0x43b   :  { %v3593_v57 = vpop.eup %3592 }
 0x43c   :  { %v379_v58 = vmul.f32 %v3593_v57, %v374_v56  ;;  %v377_v59 = vpop.xlane.xlu2 %376  ;;  %vm384_vm13 = vweird.f32 %v3593_v57 }
 0x43d   :  { %3594 = vrcp.f32 %v377_v59  ;;  %vm385_vm15 = vmor %vm383_vm14, %vm384_vm13  ;;  %v404_v9 = vand.u32 2147483648, %v377_v59  ;;  %v402_v14 = vand.u32 2147483647, %v377_v59  ;;  %vm398_vm5 = vweird.f32 %v377_v59 }
 0x43e   :  { %v380_v60 = vsub.f32 1.0, %v379_v58 }
 0x43f   :  { %v405_v17 = vor.u32 1.1754944e-38, %v404_v9  ;;  %vm403_vm7 = vcmp.eq.f32.partialorder %v402_v14, 8.507059e+37 }
 0x440   :  { %v381_v21 = vmul.f32 %v3593_v57, %v380_v60 }
 0x442   :  { %v382_v63 = vadd.f32 %v3593_v57, %v381_v21 }
 0x443   :  { %v3595_v0 = vpop.eup %3594 }
 0x444   :  { %v386_v2 = vsel %vm385_vm15, %v3593_v57, %v382_v63  ;;  %v394_v3 = vmul.f32 %v3595_v0, %v377_v59  ;;  %v446_v19 = vpop.permute.xlu2 %445  ;;  %vm399_vm4 = vweird.f32 %v3595_v0 }
 0x445   :  { %3275 = vmatmul.msk.f32.gmra.mxu3 %vm203_vm1, %v446_v19  ;;  %v391_v5 = vsel %vm388_vm2, %v390_v1, %v386_v2  ;;  %vm400_vm6 = vmor %vm398_vm5, %vm399_vm4 }
 0x446   :  { %v395_v6 = vsub.f32 1.0, %v394_v3  ;;  %v392_v8 = vmul.f32 %v3587_v34, %v391_v5 }
 0x447   :  { %v566_v23 = vpop.permute.xlu0 %565 }
 0x448   :  { %3270 = vmatmul.msk.f32.vlgmr.msra.gmra.mxu2 %vm235_vm3, %v392_v8  ;;  %v396_v10 = vmul.f32 %v3595_v0, %v395_v6 }
 0x44a   :  { %v397_v16 = vadd.f32 %v3595_v0, %v396_v10 }
 0x44c   :  { %v401_v18 = vsel %vm400_vm6, %v3595_v0, %v397_v16 }
 0x44d   :  { %v406_v20 = vsel %vm403_vm7, %v405_v17, %v401_v18 }
 0x44e   :  { %v407_v22 = vmul.f32 %v3959_v42, %v406_v20 }
 0x44f   :  { %v568_v24 = vpop.permute.xlu0 %567 }
 0x450   :  { %3271 = vmatmul.msk.f32.gmra.mxu2 %vm235_vm3, %v407_v22 }
 0x453   :  { %v3982_v29 = vpop.f32.mrf.mxu2 }
 0x458   :  { %3280 = vmatmul.msk.f32.vlgmr.msrb.gmra.mxu2 %vm203_vm1, %v566_v23 }
 0x460   :  { %v476_v26 = vpop.f32.mrf.mxu3  ;;  %3281 = vmatmul.msk.f32.gmra.mxu2 %vm203_vm1, %v568_v24 }
 0x461   :  { %v477_v27 = vadd.f32 %v476_v26, %v3924_v40 }
 0x463   :  { %v482_v28 = vsel %vm235_vm3, %v477_v27, -inf }
 0x464   :  { %483 = vmax.xlane.f32.xlu0 %v482_v28 }
 0x4c8   :  { %v479_v37 = vpop.f32.mrf.mxu3 }
 0x4c9   :  { %v480_v39 = vadd.f32 %v479_v37, %v3928_v45 }
 0x4cb   :  { %v437_v30 = vpop.f32.mrf.mxu2  ;;  %v485_v44 = vsel %vm235_vm3, %v480_v39, -inf }
 0x4d3   :  { %v440_v31 = vpop.f32.mrf.mxu2 }
 0x4d7   :  { %v484_v32 = vpop.xlane.xlu0 %483 }
 0x4d8   :  { %v488_v35 = vsub.f32 %v477_v27, %v484_v32 }
 0x4da   :  { %v490_v38 = vmul.f32 1.442695, %v488_v35 }
 0x4db   :  { %v598_v33 = vpop.f32.mrf.mxu2 }
 0x4dc   :  { %v599_v34 = vadd.f32 %v598_v33, %v3924_v40  ;;  %3596 = vpow2.f32 %v490_v38 }
 0x4de   :  { %v604_v36 = vsel %vm235_vm3, %v599_v34, -inf }
 0x4df   :  { %605 = vmax.xlane.f32.xlu1 %v604_v36 }
 0x4e2   :  { %v3990_v46 = vpop.eup %3596 }
 0x4e3   :  { %v601_v41 = vpop.f32.mrf.mxu2  ;;  %v494_v47 = vsel %vm235_vm3, %v3990_v46, 0.0 }
 0x4e4   :  { %v602_v42 = vadd.f32 %v601_v41, %v3928_v45 }
 0x4e6   :  { %v607_v43 = vsel %vm235_vm3, %v602_v42, -inf }
 0x4e7   :  { %608 = vmax.xlane.f32.xlu2 %v607_v43  ;;  %486 = vmax.xlane.f32.xlu1 %v485_v44 }
 0x4ef   :  { %495 = vadd.xlane.f32.xlu2 %v494_v47 }
 0x507   :  { %3441 = vrot.lane.b32.xlu2 %v3908_v25, %s3806_s27 }
 0x552   :  { %v606_v48 = vpop.xlane.xlu1 %605 }
 0x553   :  { %v610_v49 = vsub.f32 %v599_v34, %v606_v48 }
 0x555   :  { %v612_v50 = vmul.f32 1.442695, %v610_v49 }
 0x557   :  { %3598 = vpow2.f32 %v612_v50 }
 0x55a   :  { %v609_v51 = vpop.xlane.xlu2 %608  ;;  %v487_v52 = vpop.xlane.xlu1 %486 }
 0x55b   :  { %v611_v53 = vsub.f32 %v602_v42, %v609_v51  ;;  %v489_v54 = vsub.f32 %v480_v39, %v487_v52 }
 0x55d   :  { %v3599_v55 = vpop.eup %3598  ;;  %v614_v56 = vmul.f32 1.442695, %v611_v53  ;;  %v492_v57 = vmul.f32 1.442695, %v489_v54 }
 0x55e   :  { %v616_v58 = vsel %vm235_vm3, %v3599_v55, 0.0 }
 0x55f   :  { %3600 = vpow2.f32 %v614_v56  ;;  %617 = vadd.xlane.f32.xlu0 %v616_v58 }
 0x560   :  { %3602 = vpow2.f32 %v492_v57 }
 0x562   :  { %v3997_v59 = vpop.xlane.xlu2 %495 }
 0x563   :  { %v511_v44 = vand.u32 2147483648, %v3997_v59  ;;  %vm505_vm4 = vweird.f32 %v3997_v59  ;;  %v509_v47 = vand.u32 2147483647, %v3997_v59 }
 0x565   :  { %v3601_v60 = vpop.eup %3600  ;;  %v512_v50 = vor.u32 1.1754944e-38, %v511_v44  ;;  %vm510_vm6 = vcmp.eq.f32.partialorder %v509_v47, 8.507059e+37  ;;  %v53_v44 = vld [vmem:[%s4835_s3 + $0x10] sm:$0xff] }
 0x566   :  { %v3999_v61 = vpop.eup %3602  ;;  %v619_v21 = vsel %vm235_vm3, %v3601_v60, 0.0 }
 0x567   :  { %620 = vadd.xlane.f32.xlu1 %v619_v21  ;;  %v497_v62 = vsel %vm235_vm3, %v3999_v61, 0.0 }
 0x568   :  { %498 = vadd.xlane.f32.xlu0 %v497_v62 }
 0x56a   :  { %v3442_v63 = vpop.permute.xlu2 %3441 }
 0x56b   :  { %v3443_v0 = vunpack.i.l.bf16 %v3442_v63  ;;  %v3444_v1 = vunpack.i.h.bf16 %v3442_v63 }
 0x56d   :  { %678 = vmatpush.msrb.mxu3 %v3443_v0 }
 0x56f   :  { %679 = vmatpush.msrb.mxu3 %v3444_v1 }
 0x57c   :  { %689 = vrot.lane.b32.xlu0 %v437_v30, %s3795_s30 }
 0x580   :  { %3446 = vrot.lane.b32.xlu1 %v3908_v25, %s3807_s28 }
 0x588   :  { %691 = vrot.lane.b32.xlu1 %v440_v31, %s3795_s30 }
 0x5d2   :  { %v618_v2 = vpop.xlane.xlu0 %617 }
 0x5d3   :  { %3604 = vrcp.f32 %v618_v2  ;;  %v633_v10 = vand.u32 2147483648, %v618_v2  ;;  %v631_v16 = vand.u32 2147483647, %v618_v2  ;;  %vm627_vm9 = vweird.f32 %v618_v2 }
 0x5d4   :  { %3606 = vrcp.f32 %v3997_v59 }
 0x5d5   :  { %v634_v20 = vor.u32 1.1754944e-38, %v633_v10  ;;  %vm632_vm11 = vcmp.eq.f32.partialorder %v631_v16, 8.507059e+37 }
 0x5d9   :  { %v3605_v3 = vpop.eup %3604 }
 0x5da   :  { %v623_v19 = vmul.f32 %v3605_v3, %v618_v2  ;;  %v621_v5 = vpop.xlane.xlu1 %620  ;;  %v3607_v9 = vpop.eup %3606  ;;  %vm628_vm8 = vweird.f32 %v3605_v3  ;;  %v195_v2 = vld [vmem:[#allocation2 + $0x38] sm:$0xff] }
 0x5db   :  { %3608 = vrcp.f32 %v621_v5  ;;  %v4009_v8 = vpop.xlane.xlu0 %498  ;;  %v501_v25 = vmul.f32 %v3607_v9, %v3997_v59  ;;  %vm629_vm10 = vmor %vm627_vm9, %vm628_vm8  ;;  %v648_v31 = vand.u32 2147483648, %v621_v5  ;;  %v646_v33 = vand.u32 2147483647, %v621_v5 }
 0x5dc   :  { %v624_v6 = vsub.f32 1.0, %v623_v19  ;;  %3610 = vrcp.f32 %v4009_v8  ;;  %vm642_vm13 = vweird.f32 %v621_v5  ;;  %vm506_vm2 = vweird.f32 %v3607_v9  ;;  %v192_v19 = vld [vmem:[#allocation2 + $0x20] sm:$0xff] }
 0x5dd   :  { %v502_v26 = vsub.f32 1.0, %v501_v25  ;;  %v649_v37 = vor.u32 1.1754944e-38, %v648_v31  ;;  %vm647_vm15 = vcmp.eq.f32.partialorder %v646_v33, 8.507059e+37  ;;  %vm507_vm5 = vmor %vm505_vm4, %vm506_vm2  ;;  %v526_v56 = vand.u32 2147483648, %v4009_v8 }
 0x5de   :  { %v625_v14 = vmul.f32 %v3605_v3, %v624_v6  ;;  %vm520_vm8 = vweird.f32 %v4009_v8  ;;  %v524_v58 = vand.u32 2147483647, %v4009_v8 }
 0x5df   :  { %v503_v34 = vmul.f32 %v3607_v9, %v502_v26 }
 0x5e0   :  { %v626_v17 = vadd.f32 %v3605_v3, %v625_v14 }
 0x5e1   :  { %v3609_v18 = vpop.eup %3608  ;;  %v504_v41 = vadd.f32 %v3607_v9, %v503_v34 }
 0x5e2   :  { %v630_v22 = vsel %vm629_vm10, %v3605_v3, %v626_v17  ;;  %v638_v23 = vmul.f32 %v3609_v18, %v621_v5  ;;  %v3611_v30 = vpop.eup %3610  ;;  %vm643_vm12 = vweird.f32 %v3609_v18  ;;  %vm525_vm10 = vcmp.eq.f32.partialorder %v524_v58, 8.507059e+37  ;;  %v194_v3 = vld [vmem:[#allocation2 + $0x30] sm:$0xff] }
 0x5e3   :  { %v635_v24 = vsel %vm632_vm11, %v634_v20, %v630_v22  ;;  %v516_v35 = vmul.f32 %v3611_v30, %v4009_v8  ;;  %vm644_vm14 = vmor %vm642_vm13, %vm643_vm12  ;;  %v508_v48 = vsel %vm507_vm5, %v3607_v9, %v504_v41  ;;  %vm521_vm7 = vweird.f32 %v3611_v30 }
 0x5e4   :  { %v639_v27 = vsub.f32 1.0, %v638_v23  ;;  %v636_v28 = vmul.f32 %v3599_v55, %v635_v24  ;;  %v513_v53 = vsel %vm510_vm6, %v512_v50, %v508_v48  ;;  %vm522_vm9 = vmor %vm520_vm8, %vm521_vm7  ;;  %vm715_vm11 = vcmask 195584  }
 0x5e5   :  { %v517_v42 = vsub.f32 1.0, %v516_v35  ;;  %v514_v57 = vmul.f32 %v3990_v46, %v513_v53  ;;  %v47_v35 = vld [vmem:[%s4833_s1] sm:$0xff] }
 0x5e6   :  { %3282 = vmatmul.msk.f32.vlgmr.msrb.gmra.mxu3 %vm235_vm3, %v636_v28  ;;  %v640_v32 = vmul.f32 %v3609_v18, %v639_v27 }
 0x5e7   :  { %v518_v49 = vmul.f32 %v3611_v30, %v517_v42 }
 0x5e8   :  { %v641_v36 = vadd.f32 %v3609_v18, %v640_v32  ;;  %v3810_v32 = vmov 32.0  }
 0x5e9   :  { %v519_v54 = vadd.f32 %v3611_v30, %v518_v49  ;;  %3612 = vrcp.f32 %v3810_v32 }
 0x5ea   :  { %v645_v38 = vsel %vm644_vm14, %v3609_v18, %v641_v36 }
 0x5eb   :  { %v650_v39 = vsel %vm647_vm15, %v649_v37, %v645_v38  ;;  %v523_v59 = vsel %vm522_vm9, %v3611_v30, %v519_v54  ;;  %v52_v38 = vld [vmem:[%s4835_s3 + $0x8] sm:$0xff] }
 0x5ec   :  { %v651_v43 = vmul.f32 %v3601_v60, %v650_v39  ;;  %v527_v60 = vor.u32 1.1754944e-38, %v526_v56 }
 0x5ee   :  { %3283 = vmatmul.msk.f32.gmra.mxu3 %vm235_vm3, %v651_v43  ;;  %v528_v21 = vsel %vm525_vm10, %v527_v60, %v523_v59  ;;  %v690_v5 = vpop.permute.xlu0 %689  ;;  %v49_v43 = vld [vmem:[%s4833_s1 + $0x10] sm:$0xff] }
 0x5ef   :  { %v529_v62 = vmul.f32 %v3999_v61, %v528_v21  ;;  %v193_v61 = vld [vmem:[#allocation2 + $0x28] sm:$0xff]  ;;  %v711_v8 = vsel %vm203_vm1, %v3982_v29, %v690_v5  ;;  %v3551_v29 = vld [vmem:[%s4838_s6 + $0x1] ss:$0 sm:$0xff]  ;;  %v3613_v33 = vpop.eup %3612  ;;  %v69_v48 = vadd.f32 %v53_v44, %v49_v43  ;;  %v814_v21 = vld [vmem:[#allocation2 + $0x50] sm:$0xff] }
 0x5f0   :  { %v757_v34 = vmul.f32 32.0, %v3613_v33  ;;  %vm761_vm12 = vweird.f32 %v3613_v33  ;;  %v3555_v44 = vld [vmem:[%s4838_s6 + $0x2] ss:$0 sm:$0xff] }
 0x5f2   :  { %v3447_v51 = vpop.permute.xlu1 %3446  ;;  %v758_v37 = vsub.f32 1.0, %v757_v34  ;;  %v3738_v34 = vld [vmem:[%s4834_s2] sm:$0xff] }
 0x5f3   :  { %v3448_v52 = vunpack.i.l.bf16 %v3447_v51  ;;  %v3449_v55 = vunpack.i.h.bf16 %v3447_v51 }
 0x5f4   :  { %v759_v39 = vmul.f32 %v3613_v33, %v758_v37 }
 0x5f5   :  { %556 = vmatpush.msra.mxu1 %v3448_v52  ;;  %v54_v52 = vld [vmem:[%s4835_s3 + $0x18] sm:$0xff] }
 0x5f6   :  { %v760_v42 = vadd.f32 %v3613_v33, %v759_v39  ;;  %v70_v54 = vadd.f32 %v54_v52, %v3862_v4  ;;  %v815_v4 = vld [vmem:[#allocation2 + $0x58] sm:$0xff] }
 0x5f7   :  { %557 = vmatpush.msra.mxu1 %v3449_v55  ;;  %836 = vmatpush.msra.mxu2 %v815_v4 }
 0x5f8   :  { %3276 = vmatmul.msk.f32.vlgmr.msra.gmra.mxu1 %vm235_vm3, %v514_v57  ;;  %v4067_v47 = vsel %vm761_vm12, %v3613_v33, %v760_v42 }
 0x5f9   :  { %737 = vmatpush.msrb.mxu1 %v195_v2  ;;  %837 = vmatpush.msra.mxu2 %v814_v21 }
 0x5fa   :  { %v692_v16 = vpop.permute.xlu1 %691 }
 0x5fb   :  { %738 = vmatpush.msrb.mxu1 %v194_v3  ;;  %v712_v17 = vsel %vm203_vm1, %v3943_v11, %v692_v16 }
 0x5fd   :  { %739 = vmatpush.msrb.mxu1 %v193_v61 }
 0x5ff   :  { %740 = vmatpush.msrb.mxu1 %v192_v19 }
 0x600   :  { %3277 = vmatmul.msk.f32.gmra.mxu1 %vm235_vm3, %v529_v62  ;;  %v813_v62 = vld [vmem:[#allocation2 + $0x48] sm:$0xff] }
 0x601   :  { %838 = vmatpush.msra.mxu2 %v813_v62 }
 0x669   :  { %v681_v63 = vpop.f32.mrf.mxu3 }
 0x66a   :  { %705 = vrot.lane.b32.xlu0 %v681_v63, %s3808_s4  ;;  %v812_v63 = vld [vmem:[#allocation2 + $0x40] sm:$0xff] }
 0x66b   :  { %839 = vmatpush.msra.mxu2 %v812_v63 }
 0x671   :  { %v684_v46 = vpop.f32.mrf.mxu3 }
 0x672   :  { %707 = vrot.lane.b32.xlu0 %v684_v46, %s3808_s4 }
 0x675   :  { %v559_v0 = vpop.f32.mrf.mxu1 }
 0x676   :  { %697 = vrot.lane.b32.xlu2 %v559_v0, %s3809_s8 }
 0x67d   :  { %v562_v1 = vpop.f32.mrf.mxu1 }
 0x67e   :  { %699 = vrot.lane.b32.xlu2 %v562_v1, %s3809_s8 }
 0x6d0   :  { %v698_v6 = vpop.permute.xlu2 %697 }
 0x6d1   :  { %v713_v9 = vsel %vm235_vm3, %v711_v8, %v698_v6 }
 0x6d8   :  { %v700_v25 = vpop.permute.xlu2 %699 }
 0x6d9   :  { %v714_v18 = vsel %vm235_vm3, %v712_v17, %v700_v25 }
 0x6dc   :  { %v706_v10 = vpop.permute.xlu0 %705 }
 0x6dd   :  { %v716_v14 = vsel %vm715_vm11, %v713_v9, %v706_v10  ;;  %v3554_v9 = vld [vmem:[%s4838_s6 + $0x3] ss:$0 sm:$0xff] }
 0x6de   :  { %3284 = vmatmul.msk.f32.vlgmr.msrb.gmra.mxu1 %vm76_vm0, %v716_v14 }
 0x6e4   :  { %v708_v20 = vpop.permute.xlu0 %707 }
 0x6e5   :  { %v717_v22 = vsel %vm715_vm11, %v714_v18, %v708_v20 }
 0x6e6   :  { %3285 = vmatmul.msk.f32.gmra.mxu1 %vm76_vm0, %v717_v22  ;;  %v3552_v22 = vld [vmem:[%s4838_s6 + $0x8] ss:$0 sm:$0xff] }
 0x75b   :  { %v742_v23 = vpop.f32.mrf.mxu1 }
 0x75c   :  { %v743_v24 = vadd.f32 %v3551_v29, %v742_v23 }
 0x75e   :  { %v748_v26 = vadd.f32 %v743_v24, %v3867_v7  ;;  %v51_v7 = vld [vmem:[%s4835_s3] sm:$0xff]  ;;  %s3235_s3 = sshll.u32 %s4839_s7, 4  ;;  %s3236_s3 = int_to_ptr.hbm [resolvable:$true] %s3235_s3 }
 0x75f   :  { %v67_v36 = vadd.f32 %v51_v7, %v47_v35 }
 0x760   :  { %v750_v27 = vsel %vm76_vm0, %v748_v26, 0.0 }
 0x761   :  { %751 = vadd.xlane.f32.xlu1 %v750_v27  ;;  %3248 = vmatmul.msk.f32.vlgmr.msra.gmra.mxu0 %vm76_vm0, %v67_v36 }
 0x763   :  { %v745_v28 = vpop.f32.mrf.mxu1 }
 0x764   :  { %v746_v11 = vadd.f32 %v3551_v29, %v745_v28 }
 0x766   :  { %v749_v30 = vadd.f32 %v746_v11, %v3879_v12  ;;  %v48_v12 = vld [vmem:[%s4833_s1 + $0x8] sm:$0xff]  ;;  %s3811_s1 = smov 32  }
 0x767   :  { %v68_v41 = vadd.f32 %v52_v38, %v48_v12 }
 0x768   :  { %v753_v31 = vsel %vm76_vm0, %v749_v30, 0.0 }
 0x769   :  { %754 = vadd.xlane.f32.xlu2 %v753_v31  ;;  %3249 = vmatmul.msk.f32.gmra.mxu0 %vm76_vm0, %v68_v41 }
 0x771   :  { %3250 = vmatmul.msk.f32.gmra.mxu0 %vm76_vm0, %v69_v48 }
 0x779   :  { %3251 = vmatmul.msk.f32.gmra.mxu0 %vm76_vm0, %v70_v54 }
 0x781   :  { %3252 = vmatmul.msk.f32.gmra.mxu0 %vm76_vm0, %v47_v35 }
 0x789   :  { %3253 = vmatmul.msk.f32.gmra.mxu0 %vm76_vm0, %v48_v12 }
 0x791   :  { %3254 = vmatmul.msk.f32.gmra.mxu0 %vm76_vm0, %v49_v43 }
 0x7d4   :  { %v752_v49 = vpop.xlane.xlu1 %751 }
 0x7d5   :  { %v763_v50 = vmul.f32 %v4067_v47, %v752_v49 }
 0x7d7   :  { %v765_v51 = vsub.f32 %v748_v26, %v763_v50  ;;  %v3553_v26 = vld [vmem:[%s4838_s6 + $0x9] ss:$0 sm:$0xff] }
 0x7d9   :  { %v767_v53 = vmul.f32 %v765_v51, %v765_v51 }
 0x7db   :  { %v769_v55 = vsel %vm76_vm0, %v767_v53, 0.0 }
 0x7dc   :  { %v755_v56 = vpop.xlane.xlu2 %754  ;;  %770 = vadd.xlane.f32.xlu0 %v769_v55 }
 0x7dd   :  { %v764_v57 = vmul.f32 %v4067_v47, %v755_v56 }
 0x7de   :  { %v4083_v2 = vpop.f32.mrf.mxu0 }
 0x7df   :  { %v766_v58 = vsub.f32 %v749_v30, %v764_v57  ;;  %v849_v36 = vadd.f32 %v3554_v9, %v4083_v2 }
 0x7e1   :  { %v768_v59 = vmul.f32 %v766_v58, %v766_v58 }
 0x7e3   :  { %v772_v60 = vsel %vm76_vm0, %v768_v59, 0.0 }
 0x7e4   :  { %773 = vadd.xlane.f32.xlu1 %v772_v60 }
 0x7e6   :  { %v4089_v10 = vpop.f32.mrf.mxu0 }
 0x7e7   :  { %v4092_v16 = vadd.f32 %v3554_v9, %v4089_v10 }
 0x7ee   :  { %v4102_v27 = vpop.f32.mrf.mxu0 }
 0x7ef   :  { %v851_v11 = vadd.f32 %v3554_v9, %v4102_v27 }
 0x7f1   :  { %1011 = vrot.lane.b32.xlu0 %v851_v11, %s3799_s21 }
 0x7f6   :  { %v4114_v12 = vpop.f32.mrf.mxu0 }
 0x7f7   :  { %v852_v38 = vadd.f32 %v3554_v9, %v4114_v12 }
 0x7f9   :  { %1007 = vrot.lane.b32.xlu0 %v849_v36, %s3799_s21  ;;  %3288 = vmatpush.xpose.msk.msra.mxu3 %vm203_vm1, %v852_v38 }
 0x7fa   :  { %1013 = vrot.lane.b32.xlu2 %v852_v38, %s3799_s21 }
 0x7fd   :  { %1009 = vrot.lane.b32.xlu1 %v4092_v16, %s3799_s21  ;;  %3289 = vmatpush.xpose.msk.msra.mxu3 %vm203_vm1, %v851_v11 }
 0x801   :  { %1149 = vrot.lane.b32.xlu0 %v852_v38, %s3804_s25  ;;  %3290 = vmatpush.xpose.msk.msra.mxu3 %vm203_vm1, %v4092_v16 }
 0x802   :  { %1147 = vrot.lane.b32.xlu2 %v851_v11, %s3804_s25 }
 0x805   :  { %1285 = vrot.lane.b32.xlu1 %v852_v38, %s3805_s26  ;;  %3291 = vmatpush.xpose.msk.msra.mxu3 %vm203_vm1, %v849_v36 }
 0x809   :  { %1283 = vrot.lane.b32.xlu0 %v851_v11, %s3805_s26 }
 0x80d   :  { %1143 = vrot.lane.b32.xlu1 %v849_v36, %s3804_s25 }
 0x811   :  { %1281 = vrot.lane.b32.xlu0 %v4092_v16, %s3805_s26 }
 0x84f   :  { %v771_v46 = vpop.xlane.xlu0 %770 }
 0x850   :  { %v775_v0 = vmul.f32 %v771_v46, %v4067_v47  ;;  %v4168_v46 = vpop.f32.mrf.mxu0 }
 0x852   :  { %v777_v1 = vadd.f32 1e-05, %v775_v0 }
 0x854   :  { %3614 = vrsqrt.f32 %v777_v1  ;;  %vm785_vm14 = vweird.f32 %v777_v1  ;;  %v1014_v43 = vpop.permute.xlu2 %1013 }
 0x855   :  { %3296 = vmatpush.xpose.msk.msra.mxu1 %vm203_vm1, %v1014_v43 }
 0x857   :  { %v774_v3 = vpop.xlane.xlu1 %773 }
 0x858   :  { %v776_v61 = vmul.f32 %v774_v3, %v4067_v47  ;;  %v4172_v3 = vpop.f32.mrf.mxu0 }
 0x85a   :  { %v3615_v19 = vpop.eup %3614  ;;  %v778_v5 = vadd.f32 1e-05, %v776_v61 }
 0x85b   :  { %v780_v6 = vmul.f32 %v3615_v19, %v777_v1  ;;  %vm786_vm13 = vweird.f32 %v3615_v19 }
 0x85c   :  { %3616 = vrsqrt.f32 %v778_v5  ;;  %vm787_vm15 = vmor %vm785_vm14, %vm786_vm13  ;;  %vm795_vm4 = vweird.f32 %v778_v5  ;;  %v1148_v56 = vpop.permute.xlu2 %1147 }
 0x85d   :  { %v781_v8 = vmul.f32 %v3615_v19, %v780_v6 }
 0x85f   :  { %v782_v14 = vmul.f32 0.5, %v781_v8 }
 0x861   :  { %v783_v25 = vsub.f32 1.5, %v782_v14 }
 0x862   :  { %v3617_v17 = vpop.eup %3616 }
 0x863   :  { %v784_v18 = vmul.f32 %v3615_v19, %v783_v25  ;;  %v790_v20 = vmul.f32 %v3617_v17, %v778_v5  ;;  %vm796_vm2 = vweird.f32 %v3617_v17  ;;  %v4175_v5 = vpop.f32.mrf.mxu0 }
 0x864   :  { %vm797_vm5 = vmor %vm795_vm4, %vm796_vm2 }
 0x865   :  { %v788_v29 = vsel %vm787_vm15, %v3615_v19, %v784_v18  ;;  %v791_v23 = vmul.f32 %v3617_v17, %v790_v20 }
 0x866   :  { %v799_v24 = vmul.f32 %v788_v29, %v765_v51 }
 0x867   :  { %v792_v28 = vmul.f32 0.5, %v791_v23 }
 0x868   :  { %v803_v30 = vmul.f32 %v3552_v22, %v799_v24 }
 0x869   :  { %v793_v31 = vsub.f32 1.5, %v792_v28 }
 0x86a   :  { %v4106_v32 = vadd.f32 %v3553_v26, %v803_v30 }
 0x86b   :  { %v794_v33 = vmul.f32 %v3617_v17, %v793_v31 }
 0x86c   :  { %v809_v35 = vadd.f32 %v3738_v34, %v4106_v32 }
 0x86d   :  { %v798_v7 = vsel %vm797_vm5, %v3617_v17, %v794_v33 }
 0x86e   :  { %3286 = vmatmul.msk.f32.vlgmr.msra.gmra.mxu2 %vm76_vm0, %v809_v35  ;;  %v800_v37 = vmul.f32 %v798_v7, %v766_v58  ;;  %v3556_v58 = vld [vmem:[%s4838_s6 + $0x4] ss:$0 sm:$0xff] }
 0x86f   :  { %v1010_v48 = vpop.permute.xlu1 %1009 }
 0x870   :  { %v804_v39 = vmul.f32 %v3552_v22, %v800_v37 }
 0x872   :  { %v4119_v41 = vadd.f32 %v3553_v26, %v804_v39 }
 0x874   :  { %v810_v42 = vadd.f32 %v4119_v41, %v3884_v13  ;;  %v1012_v13 = vpop.permute.xlu0 %1011 }
 0x875   :  { %3297 = vmatpush.xpose.msk.msra.mxu1 %vm203_vm1, %v1012_v13 }
 0x876   :  { %3287 = vmatmul.msk.f32.gmra.mxu2 %vm76_vm0, %v810_v42 }
 0x877   :  { %v1286_v54 = vpop.permute.xlu1 %1285 }
 0x879   :  { %3298 = vmatpush.xpose.msk.msra.mxu1 %vm203_vm1, %v1010_v48 }
 0x87c   :  { %v1008_v51 = vpop.permute.xlu0 %1007 }
 0x87d   :  { %3299 = vmatpush.xpose.msk.msra.mxu1 %vm203_vm1, %v1008_v51 }
 0x87f   :  { %v1144_v21 = vpop.permute.xlu1 %1143 }
 0x881   :  { %3312 = vmatpush.xpose.msk.msrb.mxu1 %vm203_vm1, %v1286_v54 }
 0x884   :  { %v1150_v55 = vpop.permute.xlu0 %1149 }
 0x885   :  { %3304 = vmatpush.xpose.msk.msrb.mxu3 %vm203_vm1, %v1150_v55 }
 0x889   :  { %3305 = vmatpush.xpose.msk.msrb.mxu3 %vm203_vm1, %v1148_v56 }
 0x88c   :  { %v1284_v57 = vpop.permute.xlu0 %1283 }
 0x88d   :  { %3313 = vmatpush.xpose.msk.msrb.mxu1 %vm203_vm1, %v1284_v57 }
 0x894   :  { %v1282_v59 = vpop.permute.xlu0 %1281 }
 0x895   :  { %3314 = vmatpush.xpose.msk.msrb.mxu1 %vm203_vm1, %v1282_v59 }
 0x8f1   :  { %v841_v49 = vpop.f32.mrf.mxu2 }
 0x8f2   :  { %v842_v50 = vadd.f32 %v3555_v44, %v841_v49 }
 0x8f4   :  { %1139 = vrot.lane.b32.xlu0 %v842_v50, %s3804_s25  ;;  %1003 = vrot.lane.b32.xlu2 %v842_v50, %s3799_s21 }
 0x8f5   :  { %3292 = vmatmul.msk.f32.vlgmr.msra.gmra.mxu3 %vm203_vm1, %v842_v50 }
 0x8f9   :  { %v844_v52 = vpop.f32.mrf.mxu2 }
 0x8fa   :  { %v845_v53 = vadd.f32 %v3555_v44, %v844_v52 }
 0x8fc   :  { %1145 = vrot.lane.b32.xlu2 %v4092_v16, %s3804_s25  ;;  %1277 = vrot.lane.b32.xlu0 %v845_v53, %s3805_s26 }
 0x8fd   :  { %1005 = vrot.lane.b32.xlu1 %v845_v53, %s3799_s21  ;;  %3293 = vmatmul.msk.f32.gmra.mxu3 %vm203_vm1, %v845_v53 }
 0x904   :  { %1279 = vrot.lane.b32.xlu2 %v849_v36, %s3805_s26 }
 0x905   :  { %1275 = vrot.lane.b32.xlu1 %v842_v50, %s3805_s26 }
 0x90c   :  { %1141 = vrot.lane.b32.xlu2 %v845_v53, %s3804_s25 }
 0x90d   :  { %856 = vrot.lane.b32.xlu1 %v3556_v58, %s3811_s1 }
 0x94e   :  { %v1004_v60 = vpop.permute.xlu2 %1003 }
 0x94f   :  { %3300 = vmatmul.msk.f32.vlgmr.msra.gmra.mxu1 %vm203_vm1, %v1004_v60 }
 0x956   :  { %v1146_v4 = vpop.permute.xlu2 %1145 }
 0x957   :  { %3306 = vmatpush.xpose.msk.msrb.mxu3 %vm203_vm1, %v1146_v4 }
 0x95b   :  { %3307 = vmatpush.xpose.msk.msrb.mxu3 %vm203_vm1, %v1144_v21 }
 0x95e   :  { %v1280_v62 = vpop.permute.xlu2 %1279 }
 0x95f   :  { %3315 = vmatpush.xpose.msk.msrb.mxu1 %vm203_vm1, %v1280_v62 }
 0x966   :  { %v1140_v63 = vpop.permute.xlu0 %1139  ;;  %v1142_v0 = vpop.permute.xlu2 %1141 }
 0x967   :  { %3308 = vmatmul.msk.f32.vlgmr.msrb.gmra.mxu3 %vm203_vm1, %v1140_v63 }
 0x96e   :  { %v1278_v6 = vpop.permute.xlu0 %1277 }
 0x96f   :  { %v1006_v1 = vpop.permute.xlu1 %1005  ;;  %3309 = vmatmul.msk.f32.gmra.mxu3 %vm203_vm1, %v1142_v0 }
 0x970   :  { %3301 = vmatmul.msk.f32.gmra.mxu1 %vm203_vm1, %v1006_v1 }
 0x977   :  { %v1276_v61 = vpop.permute.xlu1 %1275 }
 0x978   :  { %v904_v19 = vpop.f32.mrf.mxu3  ;;  %3316 = vmatmul.msk.f32.vlgmr.msrb.gmra.mxu1 %vm203_vm1, %v1276_v61 }
 0x979   :  { %v905_v23 = vadd.f32 %v904_v19, %v3924_v40 }
 0x97b   :  { %v910_v24 = vsel %vm76_vm0, %v905_v23, -inf }
 0x97f   :  { %v857_v8 = vpop.permute.xlu1 %856 }
 0x980   :  { %v861_v9 = vadd.f32 %v857_v8, %v4175_v5  ;;  %v862_v14 = vadd.f32 %v857_v8, %v3893_v15  ;;  %v907_v16 = vpop.f32.mrf.mxu3  ;;  %3317 = vmatmul.msk.f32.gmra.mxu1 %vm203_vm1, %v1278_v6  ;;  %v859_v20 = vadd.f32 %v857_v8, %v4168_v46  ;;  %v860_v22 = vadd.f32 %v857_v8, %v4172_v3 }
 0x981   :  { %v908_v25 = vadd.f32 %v907_v16, %v3928_v45 }
 0x982   :  { %v4181_v17 = vpack.i.bf16 %v861_v9, %v862_v14  ;;  %v4188_v29 = vpack.i.bf16 %v859_v20, %v860_v22 }
 0x983   :  { %v913_v18 = vsel %vm76_vm0, %v908_v25, -inf }
 0x984   :  { %914 = vmax.xlane.f32.xlu1 %v913_v18  ;;  %3451 = vrot.lane.b32.xlu2 %v4181_v17, %s3797_s19 }
 0x9ad   :  { %911 = vmax.xlane.f32.xlu2 %v910_v24 }
 0x9c5   :  { %3461 = vrot.lane.b32.xlu2 %v4181_v17, %s3796_s18 }
 0x9cc   :  { %v1044_v26 = vpop.f32.mrf.mxu1 }
 0x9cd   :  { %v1045_v28 = vadd.f32 %v1044_v26, %v3924_v40 }
 0x9cf   :  { %v1050_v11 = vsel %vm76_vm0, %v1045_v28, -inf }
 0x9d0   :  { %1051 = vmax.xlane.f32.xlu1 %v1050_v11 }
 0x9de   :  { %v3452_v30 = vpop.permute.xlu2 %3451 }
 0x9df   :  { %v3453_v31 = vunpack.i.l.bf16 %v3452_v30  ;;  %v3454_v33 = vunpack.i.h.bf16 %v3452_v30 }
 0x9e1   :  { %1128 = vmatpush.msrb.mxu2 %v3453_v31 }
 0x9e3   :  { %1129 = vmatpush.msrb.mxu2 %v3454_v33 }
 0x9e9   :  { %3471 = vrot.lane.b32.xlu1 %v4181_v17, %s3803_s24 }
 0x9ea   :  { %v1180_v34 = vpop.f32.mrf.mxu3 }
 0x9eb   :  { %v1181_v35 = vadd.f32 %v1180_v34, %v3924_v40 }
 0x9ed   :  { %v1047_v7 = vpop.f32.mrf.mxu1  ;;  %v1186_v36 = vsel %vm76_vm0, %v1181_v35, -inf }
 0x9ee   :  { %1187 = vmax.xlane.f32.xlu0 %v1186_v36  ;;  %v1048_v37 = vadd.f32 %v1047_v7, %v3928_v45 }
 0x9f0   :  { %v1053_v39 = vsel %vm76_vm0, %v1048_v37, -inf }
 0x9f2   :  { %v1183_v54 = vpop.f32.mrf.mxu3 }
 0x9f3   :  { %v4214_v56 = vadd.f32 %v1183_v54, %v3928_v45 }
 0x9f5   :  { %v1316_v38 = vpop.f32.mrf.mxu1  ;;  %v1189_v59 = vsel %vm76_vm0, %v4214_v56, -inf }
 0x9f6   :  { %v4203_v42 = vadd.f32 %v1316_v38, %v3924_v40  ;;  %1054 = vmax.xlane.f32.xlu0 %v1053_v39 }
 0x9f7   :  { %v915_v57 = vpop.xlane.xlu1 %914 }
 0x9f8   :  { %v1322_v13 = vsel %vm76_vm0, %v4203_v42, -inf  ;;  %v917_v58 = vsub.f32 %v908_v25, %v915_v57 }
 0x9f9   :  { %1323 = vmax.xlane.f32.xlu2 %v1322_v13 }
 0x9fa   :  { %v920_v60 = vmul.f32 1.442695, %v917_v58 }
 0x9fd   :  { %v1319_v43 = vpop.f32.mrf.mxu1 }
 0x9fe   :  { %v1320_v44 = vadd.f32 %v1319_v43, %v3928_v45 }
 0xa00   :  { %v1325_v48 = vsel %vm76_vm0, %v1320_v44, -inf }
 0xa01   :  { %1326 = vmax.xlane.f32.xlu2 %v1325_v48 }
 0xa0a   :  { %3456 = vrot.lane.b32.xlu0 %v4188_v29, %s3797_s19 }
 0xa19   :  { %3466 = vrot.lane.b32.xlu2 %v4188_v29, %s3796_s18 }
 0xa20   :  { %v912_v49 = vpop.xlane.xlu2 %911 }
 0xa21   :  { %v916_v52 = vsub.f32 %v905_v23, %v912_v49 }
 0xa23   :  { %v918_v55 = vmul.f32 1.442695, %v916_v52 }
 0xa25   :  { %3618 = vpow2.f32 %v918_v55 }
 0xa26   :  { %3620 = vpow2.f32 %v920_v60 }
 0xa28   :  { %v3462_v50 = vpop.permute.xlu2 %3461 }
 0xa29   :  { %v3463_v51 = vunpack.i.l.bf16 %v3462_v50  ;;  %v3464_v53 = vunpack.i.h.bf16 %v3462_v50 }
 0xa2b   :  { %992 = vmatpush.msrb.mxu0 %v3463_v51  ;;  %v4218_v4 = vpop.eup %3618 }
 0xa2c   :  { %v922_v21 = vsel %vm76_vm0, %v4218_v4, 0.0  ;;  %v4222_v62 = vpop.eup %3620 }
 0xa2d   :  { %993 = vmatpush.msrb.mxu0 %v3464_v53  ;;  %v925_v0 = vsel %vm76_vm0, %v4222_v62, 0.0 }
 0xa34   :  { %1190 = vmax.xlane.f32.xlu0 %v1189_v59 }
 0xa3c   :  { %923 = vadd.xlane.f32.xlu0 %v922_v21 }
 0xa43   :  { %v1052_v63 = vpop.xlane.xlu1 %1051 }
 0xa44   :  { %v1056_v1 = vsub.f32 %v1045_v28, %v1052_v63  ;;  %926 = vadd.xlane.f32.xlu0 %v925_v0 }
 0xa46   :  { %v1058_v61 = vmul.f32 1.442695, %v1056_v1 }
 0xa48   :  { %3622 = vpow2.f32 %v1058_v61 }
 0xa4e   :  { %v4226_v19 = vpop.eup %3622 }
 0xa4f   :  { %v1062_v6 = vsel %vm76_vm0, %v4226_v19, 0.0 }
 0xa50   :  { %1063 = vadd.xlane.f32.xlu2 %v1062_v6 }
 0xa5b   :  { %v3472_v7 = vpop.permute.xlu1 %3471 }
 0xa5c   :  { %v3473_v13 = vunpack.i.l.bf16 %v3472_v7  ;;  %v3474_v43 = vunpack.i.h.bf16 %v3472_v7 }
 0xa61   :  { %v1188_v8 = vpop.xlane.xlu0 %1187 }
 0xa62   :  { %v1192_v9 = vsub.f32 %v1181_v35, %v1188_v8 }
 0xa64   :  { %v1194_v14 = vmul.f32 1.442695, %v1192_v9 }
 0xa66   :  { %3624 = vpow2.f32 %v1194_v14 }
 0xa69   :  { %v1055_v16 = vpop.xlane.xlu0 %1054 }
 0xa6a   :  { %v1057_v25 = vsub.f32 %v1048_v37, %v1055_v16 }
 0xa6c   :  { %v4230_v18 = vpop.eup %3624  ;;  %v1060_v20 = vmul.f32 1.442695, %v1057_v25  ;;  %v1324_v22 = vpop.xlane.xlu2 %1323 }
 0xa6d   :  { %v1198_v23 = vsel %vm76_vm0, %v4230_v18, 0.0  ;;  %v1328_v49 = vsub.f32 %v4203_v42, %v1324_v22 }
 0xa6e   :  { %3626 = vpow2.f32 %v1060_v20  ;;  %1199 = vadd.xlane.f32.xlu0 %v1198_v23 }
 0xa6f   :  { %v1330_v51 = vmul.f32 1.442695, %v1328_v49 }
 0xa74   :  { %v4234_v24 = vpop.eup %3626  ;;  %v1327_v26 = vpop.xlane.xlu2 %1326 }
 0xa75   :  { %v1329_v28 = vsub.f32 %v1320_v44, %v1327_v26  ;;  %v1065_v11 = vsel %vm76_vm0, %v4234_v24, 0.0 }
 0xa76   :  { %1066 = vadd.xlane.f32.xlu2 %v1065_v11 }
 0xa77   :  { %v1332_v30 = vmul.f32 1.442695, %v1329_v28 }
 0xa79   :  { %3628 = vpow2.f32 %v1332_v30 }
 0xa7c   :  { %v3467_v31 = vpop.permute.xlu2 %3466  ;;  %v3457_v33 = vpop.permute.xlu0 %3456 }
 0xa7d   :  { %v3458_v34 = vunpack.i.l.bf16 %v3457_v33  ;;  %v3468_v35 = vunpack.i.l.bf16 %v3467_v31  ;;  %v3469_v37 = vunpack.i.h.bf16 %v3467_v31  ;;  %v3459_v38 = vunpack.i.h.bf16 %v3457_v33 }
 0xa7f   :  { %v4238_v36 = vpop.eup %3628  ;;  %994 = vmatpush.msrb.mxu0 %v3468_v35  ;;  %1130 = vmatpush.msrb.mxu2 %v3458_v34 }
 0xa80   :  { %v1337_v39 = vsel %vm76_vm0, %v4238_v36, 0.0 }
 0xa81   :  { %995 = vmatpush.msrb.mxu0 %v3469_v37  ;;  %1338 = vadd.xlane.f32.xlu2 %v1337_v39 }
 0xa82   :  { %1131 = vmatpush.msrb.mxu2 %v3459_v38  ;;  %3476 = vrot.lane.b32.xlu0 %v4188_v29, %s3803_s24 }
 0xa84   :  { %1400 = vmatpush.msra.mxu2 %v3473_v13 }
 0xa86   :  { %1401 = vmatpush.msra.mxu2 %v3474_v43 }
 0xa99   :  { %3486 = vrot.lane.b32.xlu2 %v4188_v29, %s3802_s23 }
 0xaa7   :  { %v1191_v44 = vpop.xlane.xlu0 %1190 }
 0xaa8   :  { %v1193_v48 = vsub.f32 %v4214_v56, %v1191_v44 }
 0xaaa   :  { %v1196_v50 = vmul.f32 1.442695, %v1193_v48 }
 0xaac   :  { %3630 = vpow2.f32 %v1196_v50 }
 0xaaf   :  { %v924_v52 = vpop.xlane.xlu0 %923 }
 0xab0   :  { %3632 = vrcp.f32 %v924_v52  ;;  %v939_v42 = vand.u32 2147483648, %v924_v52  ;;  %v937_v60 = vand.u32 2147483647, %v924_v52  ;;  %vm933_vm7 = vweird.f32 %v924_v52 }
 0xab1   :  { %3634 = vpow2.f32 %v1330_v51 }
 0xab2   :  { %v4248_v53 = vpop.eup %3630  ;;  %v940_v1 = vor.u32 1.1754944e-38, %v939_v42  ;;  %vm938_vm9 = vcmp.eq.f32.partialorder %v937_v60, 8.507059e+37 }
 0xab3   :  { %v1201_v54 = vsel %vm76_vm0, %v4248_v53, 0.0 }
 0xab4   :  { %1202 = vadd.xlane.f32.xlu1 %v1201_v54 }
 0xab6   :  { %v3633_v55 = vpop.eup %3632 }
 0xab7   :  { %v929_v57 = vmul.f32 %v3633_v55, %v924_v52  ;;  %v927_v29 = vpop.xlane.xlu0 %926  ;;  %v4252_v58 = vpop.eup %3634  ;;  %vm934_vm6 = vweird.f32 %v3633_v55 }
 0xab8   :  { %3636 = vrcp.f32 %v927_v29  ;;  %v1334_v21 = vsel %vm76_vm0, %v4252_v58, 0.0  ;;  %vm935_vm8 = vmor %vm933_vm7, %vm934_vm6  ;;  %v954_v16 = vand.u32 2147483648, %v927_v29  ;;  %v952_v22 = vand.u32 2147483647, %v927_v29 }
 0xab9   :  { %v930_v56 = vsub.f32 1.0, %v929_v57  ;;  %vm948_vm12 = vweird.f32 %v927_v29 }
 0xaba   :  { %v955_v26 = vor.u32 1.1754944e-38, %v954_v16  ;;  %vm953_vm14 = vcmp.eq.f32.partialorder %v952_v22, 8.507059e+37 }
 0xabb   :  { %v931_v59 = vmul.f32 %v3633_v55, %v930_v56 }
 0xabc   :  { %1335 = vadd.xlane.f32.xlu1 %v1334_v21 }
 0xabd   :  { %v932_v63 = vadd.f32 %v3633_v55, %v931_v59 }
 0xabe   :  { %v3637_v0 = vpop.eup %3636 }
 0xabf   :  { %v944_v61 = vmul.f32 %v3637_v0, %v927_v29  ;;  %v936_v6 = vsel %vm935_vm8, %v3633_v55, %v932_v63  ;;  %vm949_vm10 = vweird.f32 %v3637_v0 }
 0xac0   :  { %v941_v8 = vsel %vm938_vm9, %v940_v1, %v936_v6  ;;  %vm950_vm13 = vmor %vm948_vm12, %vm949_vm10 }
 0xac1   :  { %v945_v9 = vsub.f32 1.0, %v944_v61  ;;  %v942_v14 = vmul.f32 %v4218_v4, %v941_v8 }
 0xac3   :  { %v946_v25 = vmul.f32 %v3637_v0, %v945_v9  ;;  %3294 = vmatmul.msk.f32.vlgmr.msrb.gmra.mxu0 %vm76_vm0, %v942_v14  ;;  %v1064_v20 = vpop.xlane.xlu2 %1063 }
 0xac4   :  { %3638 = vrcp.f32 %v1064_v20  ;;  %v1079_v34 = vand.u32 2147483648, %v1064_v20  ;;  %v1077_v7 = vand.u32 2147483647, %v1064_v20  ;;  %vm1073_vm2 = vweird.f32 %v1064_v20 }
 0xac5   :  { %v947_v23 = vadd.f32 %v3637_v0, %v946_v25 }
 0xac6   :  { %v1080_v38 = vor.u32 1.1754944e-38, %v1079_v34  ;;  %vm1078_vm5 = vcmp.eq.f32.partialorder %v1077_v7, 8.507059e+37 }
 0xac7   :  { %v951_v28 = vsel %vm950_vm13, %v3637_v0, %v947_v23 }
 0xac8   :  { %v956_v11 = vsel %vm953_vm14, %v955_v26, %v951_v28 }
 0xac9   :  { %v957_v30 = vmul.f32 %v4222_v62, %v956_v11 }
 0xaca   :  { %v3639_v31 = vpop.eup %3638 }
 0xacb   :  { %v1069_v33 = vmul.f32 %v3639_v31, %v1064_v20  ;;  %3295 = vmatmul.msk.f32.gmra.mxu0 %vm76_vm0, %v957_v30  ;;  %vm1074_vm15 = vweird.f32 %v3639_v31 }
 0xacc   :  { %vm1075_vm4 = vmor %vm1073_vm2, %vm1074_vm15 }
 0xacd   :  { %v1070_v4 = vsub.f32 1.0, %v1069_v33 }
 0xacf   :  { %v1071_v35 = vmul.f32 %v3639_v31, %v1070_v4 }
 0xad1   :  { %v1072_v37 = vadd.f32 %v3639_v31, %v1071_v35 }
 0xad3   :  { %v1076_v39 = vsel %vm1075_vm4, %v3639_v31, %v1072_v37 }
 0xad4   :  { %v1081_v13 = vsel %vm1078_vm5, %v1080_v38, %v1076_v39 }
 0xad5   :  { %3481 = vrot.lane.b32.xlu1 %v4181_v17, %s3802_s23  ;;  %v1082_v62 = vmul.f32 %v4226_v19, %v1081_v13 }
 0xad7   :  { %3302 = vmatmul.msk.f32.vlgmr.msrb.gmra.mxu2 %vm76_vm0, %v1082_v62 }
 0xae1   :  { %v4264_v44 = vpop.xlane.xlu0 %1199 }
 0xae9   :  { %v1067_v43 = vpop.xlane.xlu2 %1066 }
 0xaea   :  { %3640 = vrcp.f32 %v1067_v43  ;;  %v1094_v51 = vand.u32 2147483648, %v1067_v43  ;;  %v1092_v55 = vand.u32 2147483647, %v1067_v43  ;;  %vm1088_vm7 = vweird.f32 %v1067_v43 }
 0xaec   :  { %v1095_v17 = vor.u32 1.1754944e-38, %v1094_v51  ;;  %vm1093_vm9 = vcmp.eq.f32.partialorder %v1092_v55, 8.507059e+37 }
 0xaf0   :  { %v3641_v48 = vpop.eup %3640 }
 0xaf1   :  { %v1084_v49 = vmul.f32 %v3641_v48, %v1067_v43  ;;  %vm1089_vm6 = vweird.f32 %v3641_v48  ;;  %v1215_v43 = vand.u32 2147483648, %v4264_v44 }
 0xaf2   :  { %vm1090_vm8 = vmor %vm1088_vm7, %vm1089_vm6  ;;  %vm1209_vm7 = vweird.f32 %v4264_v44 }
 0xaf3   :  { %v1085_v50 = vsub.f32 1.0, %v1084_v49  ;;  %v1213_v49 = vand.u32 2147483647, %v4264_v44 }
 0xaf4   :  { %v3477_v52 = vpop.permute.xlu0 %3476  ;;  %v1339_v60 = vpop.xlane.xlu2 %1338 }
 0xaf5   :  { %v1086_v54 = vmul.f32 %v3641_v48, %v1085_v50  ;;  %v3478_v57 = vunpack.i.l.bf16 %v3477_v52  ;;  %v3479_v56 = vunpack.i.h.bf16 %v3477_v52  ;;  %3642 = vrcp.f32 %v1339_v60 }
 0xaf6   :  { %3644 = vrcp.f32 %v4264_v44  ;;  %v1366_v4 = vand.u32 2147483648, %v1339_v60  ;;  %vm1360_vm2 = vweird.f32 %v1339_v60  ;;  %v1364_v37 = vand.u32 2147483647, %v1339_v60 }
 0xaf7   :  { %v1087_v29 = vadd.f32 %v3641_v48, %v1086_v54  ;;  %1402 = vmatpush.msra.mxu2 %v3478_v57  ;;  %v1216_v57 = vor.u32 1.1754944e-38, %v1215_v43 }
 0xaf8   :  { %v1367_v39 = vor.u32 1.1754944e-38, %v1366_v4  ;;  %vm1365_vm6 = vcmp.eq.f32.partialorder %v1364_v37, 8.507059e+37  ;;  %v3557_v37 = vld [vmem:[%s4838_s6 + $0x5] ss:$0 sm:$0xff] }
 0xaf9   :  { %v1091_v19 = vsel %vm1090_vm8, %v3641_v48, %v1087_v29  ;;  %1403 = vmatpush.msra.mxu2 %v3479_v56 }
 0xafa   :  { %v1096_v42 = vsel %vm1093_vm9, %v1095_v17, %v1091_v19  ;;  %vm1214_vm9 = vcmp.eq.f32.partialorder %v1213_v49, 8.507059e+37 }
 0xafb   :  { %v1097_v59 = vmul.f32 %v4234_v24, %v1096_v42  ;;  %v3643_v0 = vpop.eup %3642 }
 0xafc   :  { %v1356_v1 = vmul.f32 %v3643_v0, %v1339_v60  ;;  %v3645_v61 = vpop.eup %3644  ;;  %vm1361_vm15 = vweird.f32 %v3643_v0  ;;  %v3487_v52 = vpop.permute.xlu2 %3486 }
 0xafd   :  { %3303 = vmatmul.msk.f32.gmra.mxu2 %vm76_vm0, %v1097_v59  ;;  %v1205_v14 = vmul.f32 %v3645_v61, %v4264_v44  ;;  %vm1362_vm4 = vmor %vm1360_vm2, %vm1361_vm15  ;;  %vm1210_vm5 = vweird.f32 %v3645_v61  ;;  %v3488_v56 = vunpack.i.l.bf16 %v3487_v52  ;;  %v3489_v44 = vunpack.i.h.bf16 %v3487_v52 }
 0xafe   :  { %v1357_v8 = vsub.f32 1.0, %v1356_v1  ;;  %vm1211_vm8 = vmor %vm1209_vm7, %vm1210_vm5 }
 0xaff   :  { %v1206_v23 = vsub.f32 1.0, %v1205_v14 }
 0xb00   :  { %v1358_v25 = vmul.f32 %v3643_v0, %v1357_v8 }
 0xb01   :  { %v1207_v33 = vmul.f32 %v3645_v61, %v1206_v23 }
 0xb02   :  { %v1359_v31 = vadd.f32 %v3643_v0, %v1358_v25  ;;  %v865_v25 = vld [vmem:[#allocation2 + $0x68] sm:$0xff] }
 0xb03   :  { %v1208_v13 = vadd.f32 %v3645_v61, %v1207_v33 }
 0xb04   :  { %v1363_v38 = vsel %vm1362_vm4, %v3643_v0, %v1359_v31 }
 0xb05   :  { %v1368_v48 = vsel %vm1365_vm6, %v1367_v39, %v1363_v38  ;;  %v1212_v51 = vsel %vm1211_vm8, %v3645_v61, %v1208_v13  ;;  %vm1573_vm8 = vcmask 523264  }
 0xb06   :  { %v1369_v54 = vmul.f32 %v4238_v36, %v1368_v48  ;;  %v1217_v17 = vsel %vm1214_vm9, %v1216_v57, %v1212_v51 }
 0xb07   :  { %v1218_v59 = vmul.f32 %v4230_v18, %v1217_v17 }
 0xb27   :  { %v4268_v21 = vpop.xlane.xlu1 %1202 }
 0xb28   :  { %v1230_v42 = vand.u32 2147483648, %v4268_v21  ;;  %v1228_v36 = vand.u32 2147483647, %v4268_v21 }
 0xb2f   :  { %v1336_v63 = vpop.xlane.xlu1 %1335 }
 0xb30   :  { %3646 = vrcp.f32 %v1336_v63  ;;  %v1351_v16 = vand.u32 2147483648, %v1336_v63  ;;  %v1349_v22 = vand.u32 2147483647, %v1336_v63  ;;  %vm1345_vm12 = vweird.f32 %v1336_v63 }
 0xb31   :  { %3648 = vrcp.f32 %v4268_v21 }
 0xb32   :  { %v1352_v11 = vor.u32 1.1754944e-38, %v1351_v16  ;;  %vm1350_vm14 = vcmp.eq.f32.partialorder %v1349_v22, 8.507059e+37  ;;  %v866_v16 = vld [vmem:[#allocation2 + $0x70] sm:$0xff] }
 0xb36   :  { %v3647_v6 = vpop.eup %3646 }
 0xb37   :  { %v1341_v9 = vmul.f32 %v3647_v6, %v1336_v63  ;;  %vm1346_vm10 = vweird.f32 %v3647_v6  ;;  %v3649_v28 = vpop.eup %3648  ;;  %v1231_v63 = vor.u32 1.1754944e-38, %v1230_v42  ;;  %v1526_v42 = vld [vmem:[#allocation2 + $0x80] sm:$0xff] }
 0xb38   :  { %vm1347_vm13 = vmor %vm1345_vm12, %vm1346_vm10  ;;  %v1220_v35 = vmul.f32 %v3649_v28, %v4268_v21  ;;  %vm1225_vm10 = vweird.f32 %v3649_v28  ;;  %vm1224_vm12 = vweird.f32 %v4268_v21 }
 0xb39   :  { %v1342_v24 = vsub.f32 1.0, %v1341_v9 }
 0xb3a   :  { %v1221_v62 = vsub.f32 1.0, %v1220_v35 }
 0xb3b   :  { %v1343_v20 = vmul.f32 %v3647_v6, %v1342_v24 }
 0xb3c   :  { %v1222_v55 = vmul.f32 %v3649_v28, %v1221_v62 }
 0xb3d   :  { %v1344_v26 = vadd.f32 %v3647_v6, %v1343_v20  ;;  %v864_v20 = vld [vmem:[#allocation2 + $0x60] sm:$0xff] }
 0xb3e   :  { %v1223_v19 = vadd.f32 %v3649_v28, %v1222_v55 }
 0xb3f   :  { %v1348_v30 = vsel %vm1347_vm13, %v3647_v6, %v1344_v26  ;;  %vm1226_vm13 = vmor %vm1224_vm12, %vm1225_vm10 }
 0xb40   :  { %v1353_v34 = vsel %vm1350_vm14, %v1352_v11, %v1348_v30  ;;  %v1227_v60 = vsel %vm1226_vm13, %v3649_v28, %v1223_v19  ;;  %vm1229_vm14 = vcmp.eq.f32.partialorder %v1228_v36, 8.507059e+37  ;;  %v997_v18 = vpop.f32.mrf.mxu0  ;;  %v1528_v19 = vld [vmem:[#allocation2 + $0x90] sm:$0xff] }
 0xb41   :  { %v1354_v7 = vmul.f32 %v4252_v58, %v1353_v34  ;;  %v1232_v0 = vsel %vm1229_vm14, %v1231_v63, %v1227_v60  ;;  %v1570_v63 = vld [vmem:[%s4837_s5 + $0x38] sm:$0xff] }
 0xb42   :  { %v1233_v1 = vmul.f32 %v4248_v53, %v1232_v0  ;;  %v867_v53 = vld [vmem:[#allocation2 + $0x78] sm:$0xff]  ;;  %v1569_v0 = vld [vmem:[%s4837_s5 + $0x30] sm:$0xff]  ;;  %1588 = vmatpush.msra.mxu1 %v1570_v63 }
 0xb43   :  { %3318 = vmatmul.msk.f32.vlgmr.msra.gmra.mxu2 %vm76_vm0, %v1354_v7  ;;  %1460 = vmatpush.msra.mxu3 %v867_v53 }
 0xb44   :  { %1589 = vmatpush.msra.mxu1 %v1569_v0 }
 0xb45   :  { %1461 = vmatpush.msra.mxu3 %v866_v16 }
 0xb47   :  { %v3482_v50 = vpop.permute.xlu1 %3481  ;;  %1462 = vmatpush.msra.mxu3 %v865_v25 }
 0xb48   :  { %v3483_v58 = vunpack.i.l.bf16 %v3482_v50  ;;  %v3484_v29 = vunpack.i.h.bf16 %v3482_v50  ;;  %v1000_v8 = vpop.f32.mrf.mxu0 }
 0xb49   :  { %1463 = vmatpush.msra.mxu3 %v864_v20 }
 0xb4a   :  { %1264 = vmatpush.msra.mxu0 %v3483_v58 }
 0xb4b   :  { %3319 = vmatmul.msk.f32.gmra.mxu2 %vm76_vm0, %v1369_v54 }
 0xb4c   :  { %1265 = vmatpush.msra.mxu0 %v3484_v29 }
 0xb4e   :  { %1266 = vmatpush.msra.mxu0 %v3488_v56 }
 0xb50   :  { %1267 = vmatpush.msra.mxu0 %v3489_v44  ;;  %v1527_v44 = vld [vmem:[#allocation2 + $0x88] sm:$0xff] }
 0xb51   :  { %3310 = vmatmul.msk.f32.vlgmr.msra.gmra.mxu0 %vm76_vm0, %v1218_v59 }
 0xb59   :  { %3311 = vmatmul.msk.f32.gmra.mxu0 %vm76_vm0, %v1233_v1  ;;  %v1568_v1 = vld [vmem:[%s4837_s5 + $0x28] sm:$0xff] }
 0xb5a   :  { %v1133_v61 = vpop.f32.mrf.mxu2  ;;  %1590 = vmatpush.msra.mxu1 %v1568_v1 }
 0xb5b   :  { %1413 = vrot.lane.b32.xlu1 %v1133_v61, %s3795_s30 }
 0xb80   :  { %v1136_v6 = vpop.f32.mrf.mxu2 }
 0xbc6   :  { %v1405_v9 = vpop.f32.mrf.mxu2 }
 0xbc7   :  { %1429 = vrot.lane.b32.xlu1 %v1405_v9, %s3808_s4 }
 0xbcd   :  { %v1414_v22 = vpop.permute.xlu1 %1413 }
 0xbce   :  { %v1269_v21 = vpop.f32.mrf.mxu0  ;;  %v1408_v14 = vpop.f32.mrf.mxu2  ;;  %v1435_v23 = vsel %vm203_vm1, %v997_v18, %v1414_v22  ;;  %v3558_v22 = vld [vmem:[%s4838_s6 + $0xa] ss:$0 sm:$0xff] }
 0xbcf   :  { %1421 = vrot.lane.b32.xlu0 %v1269_v21, %s3809_s8  ;;  %1431 = vrot.lane.b32.xlu2 %v1408_v14, %s3808_s4  ;;  %v1566_v14 = vld [vmem:[%s4837_s5 + $0x18] sm:$0xff] }
 0xbd6   :  { %v1272_v24 = vpop.f32.mrf.mxu0 }
 0xbd7   :  { %1415 = vrot.lane.b32.xlu0 %v1136_v6, %s3795_s30  ;;  %1423 = vrot.lane.b32.xlu1 %v1272_v24, %s3809_s8  ;;  %v1567_v6 = vld [vmem:[%s4837_s5 + $0x20] sm:$0xff] }
 0xbd8   :  { %1591 = vmatpush.msra.mxu1 %v1567_v6 }
 0xbda   :  { %1592 = vmatpush.msra.mxu1 %v1566_v14  ;;  %v1660_v14 = vld [vmem:[#allocation2 + $0xa0] sm:$0xff] }
 0xc29   :  { %v1432_v34 = vpop.permute.xlu2 %1431 }
 0xc39   :  { %v1430_v26 = vpop.permute.xlu1 %1429 }
 0xc41   :  { %v1422_v28 = vpop.permute.xlu0 %1421 }
 0xc42   :  { %v1437_v11 = vsel %vm235_vm3, %v1435_v23, %v1422_v28 }
 0xc43   :  { %v1439_v30 = vsel %vm715_vm11, %v1437_v11, %v1430_v26 }
 0xc44   :  { %3320 = vmatmul.msk.f32.vlgmr.msra.gmra.mxu3 %vm76_vm0, %v1439_v30  ;;  %v3559_v30 = vld [vmem:[%s4838_s6 + $0xb] ss:$0 sm:$0xff] }
 0xc49   :  { %v1416_v31 = vpop.permute.xlu0 %1415  ;;  %v1424_v33 = vpop.permute.xlu1 %1423 }
 0xc4a   :  { %v1436_v4 = vsel %vm203_vm1, %v1000_v8, %v1416_v31 }
 0xc4b   :  { %v1438_v35 = vsel %vm235_vm3, %v1436_v4, %v1424_v33 }
 0xc4c   :  { %v1440_v7 = vsel %vm715_vm11, %v1438_v35, %v1432_v34 }
 0xc4d   :  { %3321 = vmatmul.msk.f32.gmra.mxu3 %vm76_vm0, %v1440_v7 }
 0xcc7   :  { %v1465_v38 = vpop.f32.mrf.mxu3 }
 0xcc8   :  { %v1466_v39 = vadd.f32 %v3557_v37, %v1465_v38 }
 0xcca   :  { %v1471_v13 = vadd.f32 %v1466_v39, %v4106_v32 }
 0xccc   :  { %v1473_v62 = vsel %vm76_vm0, %v1471_v13, 0.0 }
 0xccd   :  { %1474 = vadd.xlane.f32.xlu0 %v1473_v62  ;;  %v1564_v62 = vld [vmem:[%s4837_s5 + $0x8] sm:$0xff] }
 0xcd0   :  { %v1468_v43 = vpop.f32.mrf.mxu3 }
 0xcd1   :  { %v1469_v48 = vadd.f32 %v3557_v37, %v1468_v43  ;;  %v1563_v43 = vld [vmem:[%s4837_s5] sm:$0xff] }
 0xcd3   :  { %v1472_v49 = vadd.f32 %v1469_v48, %v4119_v41  ;;  %v1529_v41 = vld [vmem:[#allocation2 + $0x98] sm:$0xff]  ;;  %v3560_v48 = vld [vmem:[%s4838_s6 + $0x6] ss:$0 sm:$0xff] }
 0xcd4   :  { %1550 = vmatpush.msrb.mxu0 %v1529_v41 }
 0xcd5   :  { %v1476_v50 = vsel %vm76_vm0, %v1472_v49, 0.0 }
 0xcd6   :  { %1477 = vadd.xlane.f32.xlu1 %v1476_v50  ;;  %1551 = vmatpush.msrb.mxu0 %v1528_v19 }
 0xcd8   :  { %1552 = vmatpush.msrb.mxu0 %v1527_v44 }
 0xcda   :  { %1553 = vmatpush.msrb.mxu0 %v1526_v42 }
 0xd40   :  { %v1475_v58 = vpop.xlane.xlu0 %1474 }
 0xd41   :  { %v1479_v51 = vmul.f32 %v1475_v58, %v4067_v47 }
 0xd43   :  { %v1481_v52 = vsub.f32 %v1471_v13, %v1479_v51  ;;  %v1565_v13 = vld [vmem:[%s4837_s5 + $0x10] sm:$0xff] }
 0xd44   :  { %1593 = vmatpush.msra.mxu1 %v1565_v13 }
 0xd45   :  { %v1483_v54 = vmul.f32 %v1481_v52, %v1481_v52 }
 0xd46   :  { %1594 = vmatpush.msra.mxu1 %v1564_v62 }
 0xd47   :  { %v1485_v55 = vsel %vm76_vm0, %v1483_v54, 0.0 }
 0xd48   :  { %1486 = vadd.xlane.f32.xlu2 %v1485_v55  ;;  %1595 = vmatpush.msra.mxu1 %v1563_v43  ;;  %v3561_v55 = vld [vmem:[%s4838_s6 + $0x7] ss:$0 sm:$0xff] }
 0xd49   :  { %v1478_v57 = vpop.xlane.xlu1 %1477 }
 0xd4a   :  { %v1480_v32 = vmul.f32 %v1478_v57, %v4067_v47 }
 0xd4c   :  { %v1482_v29 = vsub.f32 %v1472_v49, %v1480_v32 }
 0xd4e   :  { %v1484_v17 = vmul.f32 %v1482_v29, %v1482_v29 }
 0xd50   :  { %v1488_v56 = vsel %vm76_vm0, %v1484_v17, 0.0 }
 0xd51   :  { %1489 = vadd.xlane.f32.xlu0 %v1488_v56 }
 0xdbb   :  { %v1487_v59 = vpop.xlane.xlu2 %1486 }
 0xdbc   :  { %v1491_v36 = vmul.f32 %v1487_v59, %v4067_v47 }
 0xdbe   :  { %v1493_v60 = vadd.f32 1e-05, %v1491_v36 }
 0xdc0   :  { %3650 = vrsqrt.f32 %v1493_v60  ;;  %vm1501_vm2 = vweird.f32 %v1493_v60 }
 0xdc4   :  { %v1490_v61 = vpop.xlane.xlu0 %1489 }
 0xdc5   :  { %v1492_v18 = vmul.f32 %v1490_v61, %v4067_v47 }
 0xdc6   :  { %v3651_v8 = vpop.eup %3650 }
 0xdc7   :  { %v1496_v9 = vmul.f32 %v3651_v8, %v1493_v60  ;;  %v1494_v21 = vadd.f32 1e-05, %v1492_v18  ;;  %vm1502_vm15 = vweird.f32 %v3651_v8 }
 0xdc8   :  { %vm1503_vm4 = vmor %vm1501_vm2, %vm1502_vm15 }
 0xdc9   :  { %v1497_v24 = vmul.f32 %v3651_v8, %v1496_v9  ;;  %3652 = vrsqrt.f32 %v1494_v21  ;;  %vm1511_vm6 = vweird.f32 %v1494_v21  ;;  %v1662_v9 = vld [vmem:[#allocation2 + $0xb0] sm:$0xff] }
 0xdcb   :  { %v1498_v53 = vmul.f32 0.5, %v1497_v24 }
 0xdcd   :  { %v1499_v16 = vsub.f32 1.5, %v1498_v53 }
 0xdcf   :  { %v3653_v25 = vpop.eup %3652  ;;  %v1500_v20 = vmul.f32 %v3651_v8, %v1499_v16 }
 0xdd0   :  { %v1506_v23 = vmul.f32 %v3653_v25, %v1494_v21  ;;  %vm1512_vm5 = vweird.f32 %v3653_v25  ;;  %v1661_v21 = vld [vmem:[#allocation2 + $0xa8] sm:$0xff] }
 0xdd1   :  { %v1504_v26 = vsel %vm1503_vm4, %v3651_v8, %v1500_v20  ;;  %vm1513_vm7 = vmor %vm1511_vm6, %vm1512_vm5  ;;  %v1663_v8 = vld [vmem:[#allocation2 + $0xb8] sm:$0xff] }
 0xdd2   :  { %v1515_v28 = vmul.f32 %v1504_v26, %v1481_v52  ;;  %v1507_v11 = vmul.f32 %v3653_v25, %v1506_v23  ;;  %1690 = vmatpush.msrb.mxu2 %v1663_v8 }
 0xdd4   :  { %v1519_v31 = vmul.f32 %v3558_v22, %v1515_v28  ;;  %v1508_v33 = vmul.f32 0.5, %v1507_v11  ;;  %1691 = vmatpush.msrb.mxu2 %v1662_v9 }
 0xdd6   :  { %v1509_v4 = vsub.f32 1.5, %v1508_v33  ;;  %v1523_v34 = vadd.f32 %v3559_v30, %v1519_v31  ;;  %1692 = vmatpush.msrb.mxu2 %v1661_v21 }
 0xdd8   :  { %v1510_v35 = vmul.f32 %v3653_v25, %v1509_v4  ;;  %3322 = vmatmul.msk.f32.vlgmr.msrb.gmra.mxu0 %vm76_vm0, %v1523_v34  ;;  %1693 = vmatpush.msrb.mxu2 %v1660_v14  ;;  %v3562_v4 = vld [vmem:[%s4838_s6 + $0xc] ss:$0 sm:$0xff] }
 0xdda   :  { %v1514_v7 = vsel %vm1513_vm7, %v3653_v25, %v1510_v35 }
 0xddb   :  { %v1516_v37 = vmul.f32 %v1514_v7, %v1482_v29  ;;  %v3563_v7 = vld [vmem:[%s4838_s6 + $0xd] ss:$0 sm:$0xff] }
 0xddd   :  { %v1520_v38 = vmul.f32 %v3558_v22, %v1516_v37 }
 0xddf   :  { %v1524_v39 = vadd.f32 %v3559_v30, %v1520_v38 }
 0xde1   :  { %3323 = vmatmul.msk.f32.gmra.mxu0 %vm76_vm0, %v1524_v39 }
 0xe55   :  { %v1555_v49 = vpop.f32.mrf.mxu0 }
 0xe56   :  { %v1556_v50 = vadd.f32 %v3560_v48, %v1555_v49  ;;  %v4374_v49 = vld [vmem:[%s4834_s2] sm:$0xff] }
 0xe58   :  { %v1561_v58 = vmax.f32 %v1556_v50, 0.0 }
 0xe5a   :  { %3324 = vmatmul.msk.f32.vlgmr.msra.gmra.mxu1 %vm1573_vm8, %v1561_v58 }
 0xe5e   :  { %v1558_v51 = vpop.f32.mrf.mxu0 }
 0xe5f   :  { %v1559_v52 = vadd.f32 %v3560_v48, %v1558_v51 }
 0xe61   :  { %v1562_v54 = vmax.f32 %v1559_v52, 0.0 }
 0xe63   :  { %3325 = vmatmul.msk.f32.gmra.mxu1 %vm1573_vm8, %v1562_v54 }
 0xed7   :  { %v1597_v57 = vpop.f32.mrf.mxu1 }
 0xed8   :  { %v1598_v32 = vadd.f32 %v3561_v55, %v1597_v57 }
 0xeda   :  { %v1603_v29 = vadd.f32 %v1598_v32, %v1523_v34  ;;  %v3564_v32 = vld [vmem:[%s4838_s6 + $0xe] ss:$0 sm:$0xff] }
 0xedc   :  { %v1605_v17 = vsel %vm76_vm0, %v1603_v29, 0.0 }
 0xedd   :  { %1606 = vadd.xlane.f32.xlu1 %v1605_v17 }
 0xee0   :  { %v1600_v56 = vpop.f32.mrf.mxu1 }
 0xee1   :  { %v1601_v41 = vadd.f32 %v3561_v55, %v1600_v56  ;;  %v4384_v55 = vld [vmem:[%s4834_s2 + $0x8] sm:$0xff] }
 0xee3   :  { %v1604_v19 = vadd.f32 %v1601_v41, %v1524_v39 }
 0xee5   :  { %v1608_v44 = vsel %vm76_vm0, %v1604_v19, 0.0 }
 0xee6   :  { %1609 = vadd.xlane.f32.xlu2 %v1608_v44 }
 0xf50   :  { %v1607_v42 = vpop.xlane.xlu1 %1606 }
 0xf51   :  { %v1611_v59 = vmul.f32 %v1607_v42, %v4067_v47 }
 0xf53   :  { %v1613_v36 = vsub.f32 %v1603_v29, %v1611_v59 }
 0xf55   :  { %v1615_v60 = vmul.f32 %v1613_v36, %v1613_v36 }
 0xf57   :  { %v1617_v63 = vsel %vm76_vm0, %v1615_v60, 0.0 }
 0xf58   :  { %1618 = vadd.xlane.f32.xlu0 %v1617_v63 }
 0xf59   :  { %v1610_v0 = vpop.xlane.xlu2 %1609 }
 0xf5a   :  { %v1612_v1 = vmul.f32 %v1610_v0, %v4067_v47 }
 0xf5c   :  { %v1614_v61 = vsub.f32 %v1604_v19, %v1612_v1 }
 0xf5e   :  { %v1616_v18 = vmul.f32 %v1614_v61, %v1614_v61 }
 0xf60   :  { %v1620_v6 = vsel %vm76_vm0, %v1616_v18, 0.0 }
 0xf61   :  { %1621 = vadd.xlane.f32.xlu1 %v1620_v6 }
 0xfcb   :  { %v1619_v24 = vpop.xlane.xlu0 %1618 }
 0xfcc   :  { %v1623_v53 = vmul.f32 %v1619_v24, %v4067_v47 }
 0xfce   :  { %v1625_v16 = vadd.f32 1e-05, %v1623_v53 }
 0xfd0   :  { %3654 = vrsqrt.f32 %v1625_v16  ;;  %vm1633_vm10 = vweird.f32 %v1625_v16 }
 0xfd4   :  { %v1622_v25 = vpop.xlane.xlu1 %1621 }
 0xfd5   :  { %v1624_v20 = vmul.f32 %v1622_v25, %v4067_v47 }
 0xfd6   :  { %v3655_v22 = vpop.eup %3654 }
 0xfd7   :  { %v1628_v23 = vmul.f32 %v3655_v22, %v1625_v16  ;;  %v1626_v26 = vadd.f32 1e-05, %v1624_v20  ;;  %vm1634_vm9 = vweird.f32 %v3655_v22 }
 0xfd8   :  { %vm1635_vm12 = vmor %vm1633_vm10, %vm1634_vm9 }
 0xfd9   :  { %v1629_v28 = vmul.f32 %v3655_v22, %v1628_v23  ;;  %3656 = vrsqrt.f32 %v1626_v26  ;;  %vm1643_vm14 = vweird.f32 %v1626_v26 }
 0xfdb   :  { %v1630_v11 = vmul.f32 0.5, %v1629_v28 }
 0xfdd   :  { %v1631_v30 = vsub.f32 1.5, %v1630_v11 }
 0xfdf   :  { %v3657_v31 = vpop.eup %3656  ;;  %v1632_v33 = vmul.f32 %v3655_v22, %v1631_v30 }
 0xfe0   :  { %v1638_v34 = vmul.f32 %v3657_v31, %v1626_v26  ;;  %vm1644_vm13 = vweird.f32 %v3657_v31 }
 0xfe1   :  { %v1636_v35 = vsel %vm1635_vm12, %v3655_v22, %v1632_v33  ;;  %vm1645_vm15 = vmor %vm1643_vm14, %vm1644_vm13 }
 0xfe2   :  { %v1647_v37 = vmul.f32 %v1636_v35, %v1613_v36  ;;  %v1639_v38 = vmul.f32 %v3657_v31, %v1638_v34 }
 0xfe4   :  { %v1651_v39 = vmul.f32 %v3562_v4, %v1647_v37  ;;  %v1640_v13 = vmul.f32 0.5, %v1639_v38 }
 0xfe6   :  { %v4369_v62 = vadd.f32 %v3563_v7, %v1651_v39  ;;  %v1641_v43 = vsub.f32 1.5, %v1640_v13 }
 0xfe8   :  { %v1642_v48 = vmul.f32 %v3657_v31, %v1641_v43  ;;  %v1657_v50 = vadd.f32 %v4374_v49, %v4369_v62 }
 0xfea   :  { %v1646_v58 = vsel %vm1645_vm15, %v3657_v31, %v1642_v48  ;;  %3326 = vmatmul.msk.f32.vlgmr.msrb.gmra.mxu2 %vm76_vm0, %v1657_v50 }
 0xfeb   :  { %v1648_v51 = vmul.f32 %v1646_v58, %v1614_v61 }
 0xfed   :  { %v1652_v52 = vmul.f32 %v3562_v4, %v1648_v51 }
 0xfef   :  { %v4379_v54 = vadd.f32 %v3563_v7, %v1652_v52 }
 0xff1   :  { %v1658_v57 = vadd.f32 %v4384_v55, %v4379_v54 }
 0xff3   :  { %3327 = vmatmul.msk.f32.gmra.mxu2 %vm76_vm0, %v1658_v57 }
 0xffb   :  { %3328 = vmatmul.msk.f32.gmra.mxu2 %vm76_vm0, %v4369_v62 }
0x1003   :  { %3329 = vmatmul.msk.f32.gmra.mxu2 %vm76_vm0, %v4379_v54 }
0x106d   :  { %v1695_v29 = vpop.f32.mrf.mxu2 }
0x106e   :  { %v1696_v17 = vadd.f32 %v3564_v32, %v1695_v29 }
0x1070   :  { %1839 = vrot.lane.b32.xlu1 %v1696_v17, %s3797_s19  ;;  %1715 = vrot.lane.b32.xlu0 %v1696_v17, %s3796_s18 }
0x1076   :  { %v1698_v56 = vpop.f32.mrf.mxu2 }
0x1077   :  { %v4398_v41 = vadd.f32 %v3564_v32, %v1698_v56 }
0x1078   :  { %2083 = vrot.lane.b32.xlu1 %v1696_v17, %s3803_s24 }
0x1079   :  { %1717 = vrot.lane.b32.xlu2 %v4398_v41, %s3796_s18 }
0x107e   :  { %v1701_v19 = vpop.f32.mrf.mxu2 }
0x107f   :  { %v1702_v42 = vadd.f32 %v3564_v32, %v1701_v19 }
0x1081   :  { %1835 = vrot.lane.b32.xlu2 %v1696_v17, %s3799_s21 }
0x1086   :  { %v1704_v44 = vpop.f32.mrf.mxu2 }
0x1087   :  { %v1705_v59 = vadd.f32 %v3564_v32, %v1704_v44 }
0x1089   :  { %1841 = vrot.lane.b32.xlu2 %v4398_v41, %s3797_s19  ;;  %v4406_v36 = vpack.i.bf16 %v1702_v42, %v1705_v59 }
0x1091   :  { %2085 = vrot.lane.b32.xlu2 %v4398_v41, %s3803_s24 }
0x1099   :  { %3491 = vrot.lane.b32.xlu2 %v4406_v36, %s3798_s20 }
0x10a1   :  { %1837 = vrot.lane.b32.xlu2 %v4398_v41, %s3799_s21 }
0x10a9   :  { %1961 = vrot.lane.b32.xlu2 %v1696_v17, %s3802_s23 }
0x10b1   :  { %1957 = vrot.lane.b32.xlu2 %v1696_v17, %s3804_s25 }
0x10d3   :  { %v1718_v60 = vpop.permute.xlu2 %1717 }
0x10d4   :  { %3330 = vmatpush.xpose.msk.msrb.mxu3 %vm203_vm1, %v1718_v60 }
0x10db   :  { %v1836_v63 = vpop.permute.xlu2 %1835 }
0x10e2   :  { %v1716_v0 = vpop.permute.xlu0 %1715  ;;  %v1840_v61 = vpop.permute.xlu1 %1839 }
0x10e3   :  { %3331 = vmatpush.xpose.msk.msrb.mxu3 %vm203_vm1, %v1716_v0  ;;  %v1842_v1 = vpop.permute.xlu2 %1841 }
0x10e4   :  { %3336 = vmatpush.xpose.msk.msrb.mxu1 %vm203_vm1, %v1842_v1 }
0x10e6   :  { %3332 = vmatmul.msk.f32.vlgmr.msrb.gmra.mxu3 %vm203_vm1, %v1696_v17 }
0x10e8   :  { %3337 = vmatpush.xpose.msk.msrb.mxu1 %vm203_vm1, %v1840_v61 }
0x10ea   :  { %v2084_v6 = vpop.permute.xlu1 %2083 }
0x10eb   :  { %v2086_v18 = vpop.permute.xlu2 %2085  ;;  %3338 = vmatmul.msk.f32.vlgmr.msrb.gmra.mxu1 %vm203_vm1, %v1836_v63 }
0x10ec   :  { %3348 = vmatpush.xpose.msk.msra.mxu2 %vm203_vm1, %v2086_v18 }
0x10ee   :  { %3333 = vmatmul.msk.f32.gmra.mxu3 %vm203_vm1, %v4398_v41 }
0x10f0   :  { %3349 = vmatpush.xpose.msk.msra.mxu2 %vm203_vm1, %v2084_v6 }
0x10f3   :  { %v3492_v8 = vpop.permute.xlu2 %3491 }
0x10f4   :  { %v3493_v9 = vunpack.i.l.bf16 %v3492_v8  ;;  %v3494_v21 = vunpack.i.h.bf16 %v3492_v8 }
0x10f6   :  { %1826 = vmatpush.msra.mxu0 %v3493_v9 }
0x10f8   :  { %1827 = vmatpush.msra.mxu0 %v3494_v21 }
0x10fb   :  { %v1838_v14 = vpop.permute.xlu2 %1837 }
0x10fc   :  { %3339 = vmatmul.msk.f32.gmra.mxu1 %vm203_vm1, %v1838_v14 }
0x1103   :  { %v1962_v21 = vpop.permute.xlu2 %1961 }
0x1168   :  { %v1868_v24 = vpop.f32.mrf.mxu1 }
0x1169   :  { %v4428_v53 = vadd.f32 %v1868_v24, %v3924_v40  ;;  %v1744_v16 = vpop.f32.mrf.mxu3 }
0x116a   :  { %v1745_v25 = vadd.f32 %v1744_v16, %v3924_v40 }
0x116b   :  { %v1874_v20 = vsel %vm235_vm3, %v4428_v53, -inf }
0x116c   :  { %1875 = vmax.xlane.f32.xlu2 %v1874_v20  ;;  %v1750_v22 = vsel %vm235_vm3, %v1745_v25, -inf }
0x116d   :  { %1751 = vmax.xlane.f32.xlu1 %v1750_v22 }
0x1171   :  { %v1747_v23 = vpop.f32.mrf.mxu3 }
0x1172   :  { %v1748_v26 = vadd.f32 %v1747_v23, %v3928_v45 }
0x1174   :  { %v1753_v28 = vsel %vm235_vm3, %v1748_v26, -inf }
0x1175   :  { %1754 = vmax.xlane.f32.xlu1 %v1753_v28 }
0x1179   :  { %v1871_v13 = vpop.f32.mrf.mxu1 }
0x117a   :  { %v1872_v43 = vadd.f32 %v1871_v13, %v3928_v45 }
0x117c   :  { %v1877_v48 = vsel %vm235_vm3, %v1872_v43, -inf }
0x118e   :  { %2079 = vrot.lane.b32.xlu1 %v1696_v17, %s3805_s26 }
0x11e0   :  { %v1752_v11 = vpop.xlane.xlu1 %1751 }
0x11e1   :  { %v1756_v30 = vsub.f32 %v1745_v25, %v1752_v11  ;;  %v1958_v25 = vpop.permute.xlu2 %1957 }
0x11e3   :  { %v1758_v31 = vmul.f32 1.442695, %v1756_v30 }
0x11e5   :  { %3658 = vpow2.f32 %v1758_v31 }
0x11e8   :  { %v1755_v33 = vpop.xlane.xlu1 %1754 }
0x11e9   :  { %v1757_v4 = vsub.f32 %v1748_v26, %v1755_v33  ;;  %v1876_v31 = vpop.xlane.xlu2 %1875 }
0x11eb   :  { %v3659_v34 = vpop.eup %3658  ;;  %v1760_v35 = vmul.f32 1.442695, %v1757_v4 }
0x11ec   :  { %v1762_v7 = vsel %vm235_vm3, %v3659_v34, 0.0 }
0x11ed   :  { %3660 = vpow2.f32 %v1760_v35  ;;  %1763 = vadd.xlane.f32.xlu1 %v1762_v7 }
0x11f3   :  { %v3661_v37 = vpop.eup %3660 }
0x11f4   :  { %v1765_v38 = vsel %vm235_vm3, %v3661_v37, 0.0 }
0x11f5   :  { %1766 = vadd.xlane.f32.xlu0 %v1765_v38 }
0x1200   :  { %v2080_v39 = vpop.permute.xlu1 %2079 }
0x1201   :  { %3350 = vmatmul.msk.f32.vlgmr.msra.gmra.mxu2 %vm203_vm1, %v2080_v39 }
0x1206   :  { %2081 = vrot.lane.b32.xlu1 %v4398_v41, %s3805_s26 }
0x1209   :  { %1963 = vrot.lane.b32.xlu0 %v4398_v41, %s3802_s23 }
0x120e   :  { %1959 = vrot.lane.b32.xlu1 %v4398_v41, %s3804_s25 }
0x1233   :  { %1878 = vmax.xlane.f32.xlu0 %v1877_v48 }
0x1260   :  { %v1764_v50 = vpop.xlane.xlu1 %1763 }
0x1261   :  { %3662 = vrcp.f32 %v1764_v50  ;;  %v1779_v32 = vand.u32 2147483648, %v1764_v50  ;;  %v1777_v17 = vand.u32 2147483647, %v1764_v50  ;;  %vm1773_vm4 = vweird.f32 %v1764_v50 }
0x1263   :  { %v1780_v19 = vor.u32 1.1754944e-38, %v1779_v32  ;;  %vm1778_vm6 = vcmp.eq.f32.partialorder %v1777_v17, 8.507059e+37 }
0x1267   :  { %v3663_v58 = vpop.eup %3662 }
0x1268   :  { %v1769_v51 = vmul.f32 %v3663_v58, %v1764_v50  ;;  %v1767_v52 = vpop.xlane.xlu0 %1766  ;;  %vm1774_vm2 = vweird.f32 %v3663_v58 }
0x1269   :  { %3664 = vrcp.f32 %v1767_v52  ;;  %vm1775_vm5 = vmor %vm1773_vm4, %vm1774_vm2  ;;  %v1794_v0 = vand.u32 2147483648, %v1767_v52  ;;  %v1792_v61 = vand.u32 2147483647, %v1767_v52  ;;  %vm1788_vm9 = vweird.f32 %v1767_v52 }
0x126a   :  { %v1770_v57 = vsub.f32 1.0, %v1769_v51 }
0x126b   :  { %v1795_v6 = vor.u32 1.1754944e-38, %v1794_v0  ;;  %vm1793_vm12 = vcmp.eq.f32.partialorder %v1792_v61, 8.507059e+37 }
0x126c   :  { %v1771_v29 = vmul.f32 %v3663_v58, %v1770_v57 }
0x126e   :  { %v1772_v56 = vadd.f32 %v3663_v58, %v1771_v29 }
0x126f   :  { %v3665_v41 = vpop.eup %3664 }
0x1270   :  { %v1776_v44 = vsel %vm1775_vm5, %v3663_v58, %v1772_v56  ;;  %v1784_v42 = vmul.f32 %v3665_v41, %v1767_v52  ;;  %vm1789_vm7 = vweird.f32 %v3665_v41 }
0x1271   :  { %v1781_v59 = vsel %vm1778_vm6, %v1780_v19, %v1776_v44  ;;  %vm1790_vm10 = vmor %vm1788_vm9, %vm1789_vm7 }
0x1272   :  { %v1785_v60 = vsub.f32 1.0, %v1784_v42  ;;  %v1782_v63 = vmul.f32 %v3659_v34, %v1781_v59  ;;  %v1880_v34 = vsub.f32 %v4428_v53, %v1876_v31 }
0x1274   :  { %v1786_v1 = vmul.f32 %v3665_v41, %v1785_v60  ;;  %3334 = vmatmul.msk.f32.vlgmr.msra.gmra.mxu0 %vm235_vm3, %v1782_v63 }
0x1276   :  { %v1787_v18 = vadd.f32 %v3665_v41, %v1786_v1 }
0x1278   :  { %v2082_v8 = vpop.permute.xlu1 %2081  ;;  %v1791_v9 = vsel %vm1790_vm10, %v3665_v41, %v1787_v18 }
0x1279   :  { %3351 = vmatmul.msk.f32.gmra.mxu2 %vm203_vm1, %v2082_v8  ;;  %v1796_v14 = vsel %vm1793_vm12, %v1795_v6, %v1791_v9 }
0x127a   :  { %v1797_v24 = vmul.f32 %v3661_v37, %v1796_v14  ;;  %v1882_v37 = vmul.f32 1.442695, %v1880_v34 }
0x127b   :  { %v1964_v16 = vpop.permute.xlu0 %1963 }
0x127c   :  { %3335 = vmatmul.msk.f32.gmra.mxu0 %vm235_vm3, %v1797_v24 }
0x127d   :  { %3342 = vmatpush.xpose.msk.msrb.mxu0 %vm203_vm1, %v1964_v16 }
0x1280   :  { %v1960_v26 = vpop.permute.xlu1 %1959 }
0x1281   :  { %3343 = vmatpush.xpose.msk.msrb.mxu0 %vm203_vm1, %v1962_v21 }
0x1284   :  { %3344 = vmatmul.msk.f32.vlgmr.msrb.gmra.mxu0 %vm203_vm1, %v1958_v25  ;;  %v2112_v20 = vpop.f32.mrf.mxu2 }
0x1285   :  { %v2113_v22 = vadd.f32 %v2112_v20, %v3924_v40 }
0x1287   :  { %v2118_v23 = vsel %vm235_vm3, %v2113_v22, -inf }
0x1288   :  { %2119 = vmax.xlane.f32.xlu1 %v2118_v23 }
0x128c   :  { %3345 = vmatmul.msk.f32.gmra.mxu0 %vm203_vm1, %v1960_v26 }
0x12a6   :  { %v1879_v11 = vpop.xlane.xlu0 %1878 }
0x12a7   :  { %v1881_v30 = vsub.f32 %v1872_v43, %v1879_v11 }
0x12a9   :  { %v1884_v4 = vmul.f32 1.442695, %v1881_v30 }
0x12ab   :  { %3666 = vpow2.f32 %v1884_v4 }
0x12ac   :  { %3668 = vpow2.f32 %v1882_v37 }
0x12b1   :  { %v4465_v50 = vpop.eup %3666 }
0x12b2   :  { %v1889_v51 = vsel %vm235_vm3, %v4465_v50, 0.0  ;;  %v4470_v52 = vpop.eup %3668 }
0x12b3   :  { %v1886_v29 = vsel %vm235_vm3, %v4470_v52, 0.0 }
0x12f1   :  { %v4457_v28 = vpop.f32.mrf.mxu0 }
0x12f9   :  { %v4459_v33 = vpop.f32.mrf.mxu0 }
0x12fb   :  { %v2120_v39 = vpop.xlane.xlu1 %2119 }
0x12fc   :  { %v2115_v35 = vpop.f32.mrf.mxu2  ;;  %v2124_v43 = vsub.f32 %v2113_v22, %v2120_v39 }
0x12fd   :  { %v2116_v7 = vadd.f32 %v2115_v35, %v3928_v45 }
0x12fe   :  { %v2126_v53 = vmul.f32 1.442695, %v2124_v43 }
0x12ff   :  { %v2121_v38 = vsel %vm235_vm3, %v2116_v7, -inf }
0x1300   :  { %2122 = vmax.xlane.f32.xlu0 %v2121_v38  ;;  %3670 = vpow2.f32 %v2126_v53 }
0x1301   :  { %v1990_v13 = vpop.f32.mrf.mxu0 }
0x1302   :  { %v1991_v48 = vadd.f32 %v1990_v13, %v3924_v40 }
0x1304   :  { %v1996_v58 = vsel %vm235_vm3, %v1991_v48, -inf }
0x1305   :  { %1997 = vmax.xlane.f32.xlu2 %v1996_v58 }
0x1306   :  { %v4476_v56 = vpop.eup %3670 }
0x1307   :  { %v2130_v41 = vsel %vm235_vm3, %v4476_v56, 0.0 }
0x1308   :  { %1890 = vadd.xlane.f32.xlu0 %v1889_v51 }
0x1309   :  { %v1993_v57 = vpop.f32.mrf.mxu0 }
0x130a   :  { %v1994_v32 = vadd.f32 %v1993_v57, %v3928_v45 }
0x130c   :  { %v1999_v17 = vsel %vm235_vm3, %v1994_v32, -inf }
0x130d   :  { %1887 = vadd.xlane.f32.xlu2 %v1886_v29  ;;  %2000 = vmax.xlane.f32.xlu1 %v1999_v17 }
0x1315   :  { %2131 = vadd.xlane.f32.xlu1 %v2130_v41 }
0x1325   :  { %3496 = vrot.lane.b32.xlu2 %v4406_v36, %s3801_s22 }
0x1373   :  { %v2123_v19 = vpop.xlane.xlu0 %2122 }
0x1374   :  { %v2125_v44 = vsub.f32 %v2116_v7, %v2123_v19 }
0x1376   :  { %v2128_v42 = vmul.f32 1.442695, %v2125_v44 }
0x1378   :  { %3672 = vpow2.f32 %v2128_v42  ;;  %v1998_v59 = vpop.xlane.xlu2 %1997 }
0x1379   :  { %v2002_v60 = vsub.f32 %v1991_v48, %v1998_v59 }
0x137b   :  { %v2004_v63 = vmul.f32 1.442695, %v2002_v60  ;;  %v1891_v0 = vpop.xlane.xlu0 %1890 }
0x137c   :  { %3674 = vrcp.f32 %v1891_v0  ;;  %v1918_v43 = vand.u32 2147483648, %v1891_v0  ;;  %vm1912_vm5 = vweird.f32 %v1891_v0  ;;  %v1916_v51 = vand.u32 2147483647, %v1891_v0 }
0x137d   :  { %3676 = vpow2.f32 %v2004_v63 }
0x137e   :  { %v4482_v1 = vpop.eup %3672  ;;  %vm1917_vm7 = vcmp.eq.f32.partialorder %v1916_v51, 8.507059e+37 }
0x137f   :  { %v2133_v61 = vsel %vm235_vm3, %v4482_v1, 0.0 }
0x1380   :  { %v1888_v18 = vpop.xlane.xlu2 %1887  ;;  %2134 = vadd.xlane.f32.xlu1 %v2133_v61  ;;  %v2001_v6 = vpop.xlane.xlu1 %2000 }
0x1381   :  { %3678 = vrcp.f32 %v1888_v18  ;;  %v2003_v9 = vsub.f32 %v1994_v32, %v2001_v6  ;;  %v1903_v30 = vand.u32 2147483648, %v1888_v18  ;;  %v1901_v7 = vand.u32 2147483647, %v1888_v18 }
0x1382   :  { %v3675_v8 = vpop.eup %3674  ;;  %vm1897_vm14 = vweird.f32 %v1888_v18  ;;  %v1919_v32 = vor.u32 1.1754944e-38, %v1918_v43 }
0x1383   :  { %v4486_v21 = vpop.eup %3676  ;;  %v1908_v14 = vmul.f32 %v3675_v8, %v1891_v0  ;;  %v2006_v24 = vmul.f32 1.442695, %v2003_v9  ;;  %v1904_v39 = vor.u32 1.1754944e-38, %v1903_v30  ;;  %vm1902_vm2 = vcmp.eq.f32.partialorder %v1901_v7, 8.507059e+37 }
0x1384   :  { %v2008_v16 = vsel %vm235_vm3, %v4486_v21, 0.0  ;;  %vm1913_vm4 = vweird.f32 %v3675_v8 }
0x1385   :  { %2009 = vadd.xlane.f32.xlu0 %v2008_v16  ;;  %3680 = vpow2.f32 %v2006_v24  ;;  %v1909_v20 = vsub.f32 1.0, %v1908_v14  ;;  %vm1914_vm6 = vmor %vm1912_vm5, %vm1913_vm4 }
0x1387   :  { %v3679_v25 = vpop.eup %3678  ;;  %v1910_v34 = vmul.f32 %v3675_v8, %v1909_v20 }
0x1388   :  { %v1893_v22 = vmul.f32 %v3679_v25, %v1888_v18  ;;  %v3497_v23 = vpop.permute.xlu2 %3496  ;;  %vm1898_vm13 = vweird.f32 %v3679_v25  ;;  %v2132_v41 = vpop.xlane.xlu1 %2131 }
0x1389   :  { %v3498_v26 = vunpack.i.l.bf16 %v3497_v23  ;;  %v3499_v31 = vunpack.i.h.bf16 %v3497_v23  ;;  %vm1899_vm15 = vmor %vm1897_vm14, %vm1898_vm13  ;;  %v1911_v48 = vadd.f32 %v3675_v8, %v1910_v34  ;;  %3682 = vrcp.f32 %v2132_v41 }
0x138a   :  { %v1894_v11 = vsub.f32 1.0, %v1893_v22  ;;  %vm2141_vm10 = vweird.f32 %v2132_v41  ;;  %v2145_v14 = vand.u32 2147483647, %v2132_v41 }
0x138b   :  { %1948 = vmatpush.msra.mxu3 %v3498_v26  ;;  %v4490_v4 = vpop.eup %3680  ;;  %v1915_v57 = vsel %vm1914_vm6, %v3675_v8, %v1911_v48  ;;  %v2147_v8 = vand.u32 2147483648, %v2132_v41 }
0x138c   :  { %v1895_v35 = vmul.f32 %v3679_v25, %v1894_v11  ;;  %v2011_v37 = vsel %vm235_vm3, %v4490_v4, 0.0  ;;  %v1920_v29 = vsel %vm1917_vm7, %v1919_v32, %v1915_v57  ;;  %vm2146_vm13 = vcmp.eq.f32.partialorder %v2145_v14, 8.507059e+37  ;;  %v1708_v14 = vld [vmem:[#allocation2 + $0xc0] sm:$0xff] }
0x138d   :  { %1949 = vmatpush.msra.mxu3 %v3499_v31  ;;  %2012 = vadd.xlane.f32.xlu0 %v2011_v37  ;;  %v1921_v17 = vmul.f32 %v4465_v50, %v1920_v29  ;;  %v2148_v20 = vor.u32 1.1754944e-38, %v2147_v8  ;;  %v1711_v8 = vld [vmem:[#allocation2 + $0xd8] sm:$0xff] }
0x138e   :  { %v1896_v38 = vadd.f32 %v3679_v25, %v1895_v35  ;;  %2250 = vmatpush.msra.mxu0 %v1711_v8 }
0x138f   :  { %v3683_v19 = vpop.eup %3682 }
0x1390   :  { %v1900_v13 = vsel %vm1899_vm15, %v3679_v25, %v1896_v38  ;;  %v2137_v42 = vmul.f32 %v3683_v19, %v2132_v41  ;;  %vm2142_vm9 = vweird.f32 %v3683_v19 }
0x1391   :  { %v1905_v58 = vsel %vm1902_vm2, %v1904_v39, %v1900_v13  ;;  %vm2143_vm12 = vmor %vm2141_vm10, %vm2142_vm9 }
0x1392   :  { %v1906_v53 = vmul.f32 %v4470_v52, %v1905_v58  ;;  %v2138_v59 = vsub.f32 1.0, %v2137_v42 }
0x1394   :  { %3340 = vmatmul.msk.f32.vlgmr.msra.gmra.mxu3 %vm235_vm3, %v1906_v53  ;;  %v2139_v0 = vmul.f32 %v3683_v19, %v2138_v59 }
0x1396   :  { %v2140_v6 = vadd.f32 %v3683_v19, %v2139_v0 }
0x1398   :  { %v2144_v16 = vsel %vm2143_vm12, %v3683_v19, %v2140_v6 }
0x1399   :  { %3501 = vrot.lane.b32.xlu1 %v4406_v36, %s3806_s27  ;;  %v2149_v11 = vsel %vm2146_vm13, %v2148_v20, %v2144_v16 }
0x139a   :  { %v2150_v39 = vmul.f32 %v4476_v56, %v2149_v11 }
0x139c   :  { %3341 = vmatmul.msk.f32.gmra.mxu3 %vm235_vm3, %v1921_v17 }
0x13a1   :  { %3506 = vrot.lane.b32.xlu0 %v4406_v36, %s3807_s28 }
0x13f3   :  { %v2135_v52 = vpop.xlane.xlu1 %2134 }
0x13f4   :  { %3684 = vrcp.f32 %v2135_v52  ;;  %v2162_v31 = vand.u32 2147483648, %v2135_v52  ;;  %vm2156_vm2 = vweird.f32 %v2135_v52  ;;  %v2160_v13 = vand.u32 2147483647, %v2135_v52 }
0x13f6   :  { %v2163_v58 = vor.u32 1.1754944e-38, %v2162_v31  ;;  %vm2161_vm7 = vcmp.eq.f32.partialorder %v2160_v13, 8.507059e+37 }
0x13f8   :  { %v2010_v44 = vpop.xlane.xlu0 %2009 }
0x13f9   :  { %3686 = vrcp.f32 %v2010_v44  ;;  %v2025_v38 = vand.u32 2147483648, %v2010_v44  ;;  %vm2019_vm4 = vweird.f32 %v2010_v44  ;;  %v2023_v48 = vand.u32 2147483647, %v2010_v44 }
0x13fa   :  { %v3685_v60 = vpop.eup %3684 }
0x13fb   :  { %v2152_v61 = vmul.f32 %v3685_v60, %v2135_v52  ;;  %vm2157_vm14 = vweird.f32 %v3685_v60  ;;  %v2026_v57 = vor.u32 1.1754944e-38, %v2025_v38  ;;  %vm2024_vm9 = vcmp.eq.f32.partialorder %v2023_v48, 8.507059e+37 }
0x13fc   :  { %vm2158_vm5 = vmor %vm2156_vm2, %vm2157_vm14 }
0x13fd   :  { %v2153_v36 = vsub.f32 1.0, %v2152_v61 }
0x13ff   :  { %v3687_v63 = vpop.eup %3686  ;;  %v2154_v25 = vmul.f32 %v3685_v60, %v2153_v36 }
0x1400   :  { %v4502_v18 = vpop.xlane.xlu0 %2012  ;;  %v2015_v50 = vmul.f32 %v3687_v63, %v2010_v44  ;;  %vm2020_vm15 = vweird.f32 %v3687_v63 }
0x1401   :  { %3688 = vrcp.f32 %v4502_v18  ;;  %v2155_v34 = vadd.f32 %v3685_v60, %v2154_v25  ;;  %vm2021_vm6 = vmor %vm2019_vm4, %vm2020_vm15  ;;  %v2040_v52 = vand.u32 2147483648, %v4502_v18  ;;  %vm2034_vm12 = vweird.f32 %v4502_v18 }
0x1402   :  { %v2016_v9 = vsub.f32 1.0, %v2015_v50 }
0x1403   :  { %v2159_v43 = vsel %vm2158_vm5, %v3685_v60, %v2155_v34  ;;  %v2038_v60 = vand.u32 2147483647, %v4502_v18  ;;  %v2041_v0 = vor.u32 1.1754944e-38, %v2040_v52 }
0x1404   :  { %v2017_v22 = vmul.f32 %v3687_v63, %v2016_v9  ;;  %v2164_v29 = vsel %vm2161_vm7, %v2163_v58, %v2159_v43  ;;  %v1710_v9 = vld [vmem:[#allocation2 + $0xd0] sm:$0xff] }
0x1405   :  { %v2165_v42 = vmul.f32 %v4482_v1, %v2164_v29  ;;  %vm2039_vm14 = vcmp.eq.f32.partialorder %v2038_v60, 8.507059e+37  ;;  %2251 = vmatpush.msra.mxu0 %v1710_v9  ;;  %v3566_v58 = vld [vmem:[%s4838_s6 + $0x11] ss:$0 sm:$0xff] }
0x1406   :  { %v2018_v35 = vadd.f32 %v3687_v63, %v2017_v22 }
0x1407   :  { %v3689_v24 = vpop.eup %3688 }
0x1408   :  { %v2030_v23 = vmul.f32 %v3689_v24, %v4502_v18  ;;  %v2022_v53 = vsel %vm2021_vm6, %v3687_v63, %v2018_v35  ;;  %vm2035_vm10 = vweird.f32 %v3689_v24 }
0x1409   :  { %v2027_v17 = vsel %vm2024_vm9, %v2026_v57, %v2022_v53  ;;  %vm2036_vm13 = vmor %vm2034_vm12, %vm2035_vm10 }
0x140a   :  { %v2031_v7 = vsub.f32 1.0, %v2030_v23  ;;  %v2028_v59 = vmul.f32 %v4486_v21, %v2027_v17 }
0x140b   :  { %v3502_v26 = vpop.permute.xlu1 %3501 }
0x140c   :  { %v3503_v30 = vunpack.i.l.bf16 %v3502_v26  ;;  %v3504_v37 = vunpack.i.h.bf16 %v3502_v26  ;;  %v2032_v51 = vmul.f32 %v3689_v24, %v2031_v7 }
0x140e   :  { %2192 = vmatpush.msrb.mxu3 %v3503_v30  ;;  %v2033_v56 = vadd.f32 %v3689_v24, %v2032_v51 }
0x1410   :  { %2193 = vmatpush.msrb.mxu3 %v3504_v37  ;;  %v2037_v63 = vsel %vm2036_vm13, %v3689_v24, %v2033_v56 }
0x1411   :  { %3352 = vmatmul.msk.f32.vlgmr.msrb.gmra.mxu3 %vm235_vm3, %v2150_v39  ;;  %v2042_v61 = vsel %vm2039_vm14, %v2041_v0, %v2037_v63 }
0x1412   :  { %v2043_v1 = vmul.f32 %v4490_v4, %v2042_v61  ;;  %v1709_v4 = vld [vmem:[#allocation2 + $0xc8] sm:$0xff] }
0x1413   :  { %v3507_v32 = vpop.permute.xlu0 %3506  ;;  %2252 = vmatpush.msra.mxu0 %v1709_v4 }
0x1414   :  { %v3508_v41 = vunpack.i.l.bf16 %v3507_v32  ;;  %v3509_v19 = vunpack.i.h.bf16 %v3507_v32 }
0x1415   :  { %2253 = vmatpush.msra.mxu0 %v1708_v14  ;;  %v3567_v14 = vld [vmem:[%s4838_s6 + $0x16] ss:$0 sm:$0xff] }
0x1416   :  { %2070 = vmatpush.msra.mxu1 %v3508_v41 }
0x1417   :  { %v1951_v44 = vpop.f32.mrf.mxu3 }
0x1418   :  { %2203 = vrot.lane.b32.xlu2 %v1951_v44, %s3795_s30  ;;  %2071 = vmatpush.msra.mxu1 %v3509_v19 }
0x1419   :  { %3353 = vmatmul.msk.f32.gmra.mxu3 %vm235_vm3, %v2165_v42  ;;  %3346 = vmatmul.msk.f32.vlgmr.msra.gmra.mxu1 %vm235_vm3, %v2028_v59 }
0x141f   :  { %v1954_v50 = vpop.f32.mrf.mxu3 }
0x1421   :  { %3347 = vmatmul.msk.f32.gmra.mxu1 %vm235_vm3, %v2043_v1 }
0x1472   :  { %v2204_v24 = vpop.permute.xlu2 %2203 }
0x1473   :  { %v2225_v25 = vsel %vm203_vm1, %v4457_v28, %v2204_v24  ;;  %v3565_v28 = vld [vmem:[%s4838_s6 + $0xf] ss:$0 sm:$0xff] }
0x1494   :  { %v2195_v6 = vpop.f32.mrf.mxu3 }
0x1495   :  { %2219 = vrot.lane.b32.xlu1 %v2195_v6, %s3808_s4 }
0x1496   :  { %v2073_v21 = vpop.f32.mrf.mxu1 }
0x1497   :  { %2211 = vrot.lane.b32.xlu2 %v2073_v21, %s3809_s8 }
0x149c   :  { %v2198_v18 = vpop.f32.mrf.mxu3 }
0x149d   :  { %2221 = vrot.lane.b32.xlu1 %v2198_v18, %s3808_s4 }
0x149e   :  { %v2076_v36 = vpop.f32.mrf.mxu1 }
0x149f   :  { %2205 = vrot.lane.b32.xlu2 %v1954_v50, %s3795_s30  ;;  %2213 = vrot.lane.b32.xlu0 %v2076_v36, %s3809_s8 }
0x14f1   :  { %v2212_v16 = vpop.permute.xlu2 %2211 }
0x14f2   :  { %v2227_v20 = vsel %vm235_vm3, %v2225_v25, %v2212_v16  ;;  %v3568_v25 = vld [vmem:[%s4838_s6 + $0x17] ss:$0 sm:$0xff] }
0x14f9   :  { %v2206_v26 = vpop.permute.xlu2 %2205 }
0x14fa   :  { %v2226_v11 = vsel %vm203_vm1, %v4459_v33, %v2206_v26 }
0x1507   :  { %v2220_v22 = vpop.permute.xlu1 %2219 }
0x1508   :  { %v2229_v23 = vsel %vm715_vm11, %v2227_v20, %v2220_v22 }
0x1509   :  { %3354 = vmatmul.msk.f32.vlgmr.msra.gmra.mxu0 %vm76_vm0, %v2229_v23 }
0x150f   :  { %v2222_v31 = vpop.permute.xlu1 %2221 }
0x1511   :  { %v2214_v30 = vpop.permute.xlu0 %2213 }
0x1512   :  { %v2228_v34 = vsel %vm235_vm3, %v2226_v11, %v2214_v30 }
0x1513   :  { %v2230_v35 = vsel %vm715_vm11, %v2228_v34, %v2222_v31 }
0x1514   :  { %3355 = vmatmul.msk.f32.gmra.mxu0 %vm76_vm0, %v2230_v35 }
0x1586   :  { %v2255_v7 = vpop.f32.mrf.mxu0 }
0x1587   :  { %v2256_v37 = vadd.f32 %v3565_v28, %v2255_v7 }
0x1589   :  { %v2261_v38 = vadd.f32 %v2256_v37, %v4369_v62 }
0x158b   :  { %v2263_v39 = vsel %vm76_vm0, %v2261_v38, 0.0 }
0x158c   :  { %2264 = vadd.xlane.f32.xlu2 %v2263_v39 }
0x1591   :  { %v2258_v33 = vpop.f32.mrf.mxu0 }
0x1592   :  { %v2259_v13 = vadd.f32 %v3565_v28, %v2258_v33 }
0x1594   :  { %v2262_v48 = vadd.f32 %v2259_v13, %v4379_v54 }
0x1596   :  { %v2266_v43 = vsel %vm76_vm0, %v2262_v48, 0.0 }
0x1597   :  { %2267 = vadd.xlane.f32.xlu0 %v2266_v43 }
0x15ab   :  { %2356 = vrot.lane.b32.xlu0 %v3566_v58, %s3798_s20 }
0x15ff   :  { %v2265_v53 = vpop.xlane.xlu2 %2264 }
0x1600   :  { %v2269_v51 = vmul.f32 %v2265_v53, %v4067_v47 }
0x1602   :  { %v2271_v62 = vsub.f32 %v2261_v38, %v2269_v51 }
0x1604   :  { %v2273_v57 = vmul.f32 %v2271_v62, %v2271_v62 }
0x1606   :  { %v2275_v32 = vsel %vm76_vm0, %v2273_v57, 0.0 }
0x1607   :  { %2276 = vadd.xlane.f32.xlu1 %v2275_v32 }
0x160a   :  { %v2268_v29 = vpop.xlane.xlu0 %2267 }
0x160b   :  { %v2270_v54 = vmul.f32 %v2268_v29, %v4067_v47 }
0x160d   :  { %v4547_v17 = vsub.f32 %v2262_v48, %v2270_v54  ;;  %v3569_v54 = vld [vmem:[%s4838_s6 + $0x10] ss:$0 sm:$0xff] }
0x160f   :  { %v2274_v41 = vmul.f32 %v4547_v17, %v4547_v17 }
0x1611   :  { %v2278_v56 = vsel %vm76_vm0, %v2274_v41, 0.0 }
0x1612   :  { %2279 = vadd.xlane.f32.xlu2 %v2278_v56 }
0x161d   :  { %v2357_v52 = vpop.permute.xlu0 %2356 }
0x161e   :  { %v4553_v19 = vadd.f32 %v2357_v52, %v4089_v10  ;;  %v2362_v44 = vadd.f32 %v2357_v52, %v4114_v12  ;;  %v4560_v42 = vadd.f32 %v2357_v52, %v4083_v2  ;;  %v2361_v59 = vadd.f32 %v2357_v52, %v4102_v27  ;;  %v2321_v2 = vld [vmem:[#allocation2 + $0xf8] sm:$0xff]  ;;  %v2320_v10 = vld [vmem:[#allocation2 + $0xf0] sm:$0xff]  ;;  %v2319_v27 = vld [vmem:[#allocation2 + $0xe8] sm:$0xff] }
0x161f   :  { %2342 = vmatpush.msrb.mxu1 %v2321_v2  ;;  %v2318_v12 = vld [vmem:[#allocation2 + $0xe0] sm:$0xff] }
0x1620   :  { %2389 = vrot.lane.b32.xlu1 %v2362_v44, %s3798_s20  ;;  %2385 = vrot.lane.b32.xlu0 %v4553_v19, %s3798_s20 }
0x1621   :  { %2343 = vmatpush.msrb.mxu1 %v2320_v10 }
0x1623   :  { %2344 = vmatpush.msrb.mxu1 %v2319_v27 }
0x1625   :  { %2345 = vmatpush.msrb.mxu1 %v2318_v12 }
0x1628   :  { %2667 = vrot.lane.b32.xlu1 %v2362_v44, %s3807_s28  ;;  %2383 = vrot.lane.b32.xlu0 %v4560_v42, %s3798_s20 }
0x162a   :  { %2387 = vrot.lane.b32.xlu2 %v2361_v59, %s3798_s20 }
0x1630   :  { %2527 = vrot.lane.b32.xlu1 %v4553_v19, %s3801_s22  ;;  %2529 = vrot.lane.b32.xlu0 %v2361_v59, %s3801_s22 }
0x1632   :  { %2531 = vrot.lane.b32.xlu2 %v2362_v44, %s3801_s22 }
0x1638   :  { %2663 = vrot.lane.b32.xlu0 %v4553_v19, %s3807_s28 }
0x163a   :  { %2665 = vrot.lane.b32.xlu2 %v2361_v59, %s3807_s28 }
0x1640   :  { %2661 = vrot.lane.b32.xlu0 %v4560_v42, %s3807_s28 }
0x1642   :  { %2525 = vrot.lane.b32.xlu2 %v4560_v42, %s3801_s22 }
0x1648   :  { %2801 = vrot.lane.b32.xlu0 %v2361_v59, %s3806_s27 }
0x164a   :  { %2803 = vrot.lane.b32.xlu2 %v2362_v44, %s3806_s27 }
0x167a   :  { %v2277_v60 = vpop.xlane.xlu1 %2276 }
0x167b   :  { %v2281_v63 = vmul.f32 %v2277_v60, %v4067_v47 }
0x167d   :  { %v2283_v0 = vadd.f32 1e-05, %v2281_v63 }
0x167f   :  { %3690 = vrsqrt.f32 %v2283_v0  ;;  %vm2291_vm2 = vweird.f32 %v2283_v0 }
0x1685   :  { %v3691_v61 = vpop.eup %3690  ;;  %v2280_v50 = vpop.xlane.xlu2 %2279 }
0x1686   :  { %v2286_v1 = vmul.f32 %v3691_v61, %v2283_v0  ;;  %v2282_v6 = vmul.f32 %v2280_v50, %v4067_v47  ;;  %vm2292_vm15 = vweird.f32 %v3691_v61 }
0x1687   :  { %vm2293_vm4 = vmor %vm2291_vm2, %vm2292_vm15 }
0x1688   :  { %v2287_v21 = vmul.f32 %v3691_v61, %v2286_v1  ;;  %v2284_v18 = vadd.f32 1e-05, %v2282_v6 }
0x168a   :  { %v2288_v36 = vmul.f32 0.5, %v2287_v21  ;;  %3692 = vrsqrt.f32 %v2284_v18  ;;  %vm2301_vm6 = vweird.f32 %v2284_v18 }
0x168c   :  { %v2289_v8 = vsub.f32 1.5, %v2288_v36 }
0x168d   :  { %v2388_v4 = vpop.permute.xlu2 %2387 }
0x168e   :  { %v2290_v9 = vmul.f32 %v3691_v61, %v2289_v8 }
0x1690   :  { %v2294_v24 = vsel %vm2293_vm4, %v3691_v61, %v2290_v9  ;;  %v3693_v16 = vpop.eup %3692 }
0x1691   :  { %v2305_v20 = vmul.f32 %v2294_v24, %v2271_v62  ;;  %v2296_v22 = vmul.f32 %v3693_v16, %v2284_v18  ;;  %vm2302_vm5 = vweird.f32 %v3693_v16 }
0x1692   :  { %v2386_v26 = vpop.permute.xlu0 %2385  ;;  %v2390_v11 = vpop.permute.xlu1 %2389  ;;  %vm2303_vm7 = vmor %vm2301_vm6, %vm2302_vm5 }
0x1693   :  { %v2309_v23 = vmul.f32 %v3567_v14, %v2305_v20  ;;  %v2297_v30 = vmul.f32 %v3693_v16, %v2296_v22  ;;  %3358 = vmatpush.xpose.msk.msrb.mxu2 %vm203_vm1, %v2390_v11 }
0x1695   :  { %v4589_v31 = vadd.f32 %v3568_v25, %v2309_v23  ;;  %v2298_v34 = vmul.f32 0.5, %v2297_v30  ;;  %v2532_v35 = vpop.permute.xlu2 %2531 }
0x1696   :  { %3366 = vmatpush.xpose.msk.msrb.mxu0 %vm203_vm1, %v2532_v35 }
0x1697   :  { %v2315_v28 = vadd.f32 %v4374_v49, %v4589_v31  ;;  %v2299_v7 = vsub.f32 1.5, %v2298_v34  ;;  %3359 = vmatpush.xpose.msk.msrb.mxu2 %vm203_vm1, %v2388_v4 }
0x1699   :  { %3356 = vmatmul.msk.f32.vlgmr.msrb.gmra.mxu1 %vm76_vm0, %v2315_v28  ;;  %v2300_v37 = vmul.f32 %v3693_v16, %v2299_v7 }
0x169a   :  { %v2384_v38 = vpop.permute.xlu0 %2383  ;;  %v2668_v13 = vpop.permute.xlu1 %2667 }
0x169b   :  { %v2304_v39 = vsel %vm2303_vm7, %v3693_v16, %v2300_v37  ;;  %3360 = vmatpush.xpose.msk.msrb.mxu2 %vm203_vm1, %v2386_v26  ;;  %v3570_v16 = vld [vmem:[%s4838_s6 + $0x12] ss:$0 sm:$0xff] }
0x169c   :  { %v2306_v33 = vmul.f32 %v2304_v39, %v4547_v17 }
0x169d   :  { %v2666_v48 = vpop.permute.xlu2 %2665 }
0x169e   :  { %v2310_v43 = vmul.f32 %v3567_v14, %v2306_v33 }
0x169f   :  { %3361 = vmatpush.xpose.msk.msrb.mxu2 %vm203_vm1, %v2384_v38 }
0x16a0   :  { %v4600_v49 = vadd.f32 %v3568_v25, %v2310_v43 }
0x16a2   :  { %v2530_v58 = vpop.permute.xlu0 %2529  ;;  %v2316_v53 = vadd.f32 %v4384_v55, %v4600_v49  ;;  %v2528_v62 = vpop.permute.xlu1 %2527 }
0x16a3   :  { %3374 = vmatpush.xpose.msk.msra.mxu2 %vm203_vm1, %v2668_v13  ;;  %3367 = vmatpush.xpose.msk.msrb.mxu0 %vm203_vm1, %v2530_v58 }
0x16a4   :  { %3357 = vmatmul.msk.f32.gmra.mxu1 %vm76_vm0, %v2316_v53 }
0x16a5   :  { %v2526_v51 = vpop.permute.xlu2 %2525 }
0x16a7   :  { %3375 = vmatpush.xpose.msk.msra.mxu2 %vm203_vm1, %v2666_v48  ;;  %3368 = vmatpush.xpose.msk.msrb.mxu0 %vm203_vm1, %v2528_v62 }
0x16aa   :  { %v2664_v57 = vpop.permute.xlu0 %2663 }
0x16ab   :  { %3369 = vmatpush.xpose.msk.msrb.mxu0 %vm203_vm1, %v2526_v51  ;;  %3376 = vmatpush.xpose.msk.msra.mxu2 %vm203_vm1, %v2664_v57 }
0x16ad   :  { %v2804_v32 = vpop.permute.xlu2 %2803 }
0x16af   :  { %3382 = vmatpush.xpose.msk.msra.mxu0 %vm203_vm1, %v2804_v32 }
0x16b2   :  { %v2662_v29 = vpop.permute.xlu0 %2661 }
0x16b3   :  { %3377 = vmatpush.xpose.msk.msra.mxu2 %vm203_vm1, %v2662_v29 }
0x16ba   :  { %v2802_v55 = vpop.permute.xlu0 %2801 }
0x16bb   :  { %3383 = vmatpush.xpose.msk.msra.mxu0 %vm203_vm1, %v2802_v55 }
0x1716   :  { %v2347_v17 = vpop.f32.mrf.mxu1 }
0x1717   :  { %v2348_v41 = vadd.f32 %v3569_v54, %v2347_v17 }
0x1719   :  { %2521 = vrot.lane.b32.xlu1 %v2348_v41, %s3799_s21  ;;  %3362 = vmatmul.msk.f32.vlgmr.msrb.gmra.mxu2 %vm203_vm1, %v2348_v41 }
0x1721   :  { %2657 = vrot.lane.b32.xlu1 %v2348_v41, %s3804_s25  ;;  %v2350_v56 = vpop.f32.mrf.mxu1 }
0x1722   :  { %v2351_v52 = vadd.f32 %v3569_v54, %v2350_v56 }
0x1724   :  { %2659 = vrot.lane.b32.xlu0 %v2351_v52, %s3804_s25  ;;  %2523 = vrot.lane.b32.xlu2 %v2351_v52, %s3799_s21 }
0x1725   :  { %3363 = vmatmul.msk.f32.gmra.mxu2 %vm203_vm1, %v2351_v52 }
0x1729   :  { %2799 = vrot.lane.b32.xlu1 %v4553_v19, %s3806_s27 }
0x172c   :  { %2795 = vrot.lane.b32.xlu0 %v2351_v52, %s3805_s26  ;;  %2797 = vrot.lane.b32.xlu2 %v4560_v42, %s3806_s27 }
0x1731   :  { %2793 = vrot.lane.b32.xlu1 %v2348_v41, %s3805_s26 }
0x177e   :  { %v2524_v59 = vpop.permute.xlu2 %2523 }
0x1786   :  { %v2798_v42 = vpop.permute.xlu2 %2797 }
0x178b   :  { %v2522_v44 = vpop.permute.xlu1 %2521 }
0x178c   :  { %3370 = vmatmul.msk.f32.vlgmr.msrb.gmra.mxu0 %vm203_vm1, %v2522_v44 }
0x1793   :  { %v2658_v2 = vpop.permute.xlu1 %2657 }
0x1794   :  { %3371 = vmatmul.msk.f32.gmra.mxu0 %vm203_vm1, %v2524_v59  ;;  %3378 = vmatmul.msk.f32.vlgmr.msra.gmra.mxu2 %vm203_vm1, %v2658_v2 }
0x1796   :  { %v2660_v10 = vpop.permute.xlu0 %2659 }
0x179b   :  { %v2800_v27 = vpop.permute.xlu1 %2799 }
0x179c   :  { %v2422_v12 = vpop.f32.mrf.mxu2  ;;  %3379 = vmatmul.msk.f32.gmra.mxu2 %vm203_vm1, %v2660_v10  ;;  %3384 = vmatpush.xpose.msk.msra.mxu0 %vm203_vm1, %v2800_v27 }
0x179d   :  { %v2423_v19 = vadd.f32 %v2422_v12, %v3924_v40 }
0x179e   :  { %v2796_v1 = vpop.permute.xlu0 %2795 }
0x179f   :  { %v2428_v60 = vsel %vm76_vm0, %v2423_v19, -inf }
0x17a0   :  { %2429 = vmax.xlane.f32.xlu2 %v2428_v60  ;;  %3385 = vmatpush.xpose.msk.msra.mxu0 %vm203_vm1, %v2798_v42 }
0x17a3   :  { %v2794_v63 = vpop.permute.xlu1 %2793 }
0x17a4   :  { %3386 = vmatmul.msk.f32.vlgmr.msra.gmra.mxu0 %vm203_vm1, %v2794_v63 }
0x17a8   :  { %v2425_v0 = vpop.f32.mrf.mxu2 }
0x17a9   :  { %v2426_v61 = vadd.f32 %v2425_v0, %v3928_v45 }
0x17ab   :  { %v2431_v50 = vsel %vm76_vm0, %v2426_v61, -inf }
0x17ac   :  { %3387 = vmatmul.msk.f32.gmra.mxu0 %vm203_vm1, %v2796_v1  ;;  %2432 = vmax.xlane.f32.xlu0 %v2431_v50 }
0x1809   :  { %v2562_v6 = vpop.f32.mrf.mxu0 }
0x180a   :  { %v2563_v21 = vadd.f32 %v2562_v6, %v3924_v40 }
0x180c   :  { %v2568_v18 = vsel %vm76_vm0, %v2563_v21, -inf }
0x180d   :  { %2569 = vmax.xlane.f32.xlu1 %v2568_v18 }
0x1811   :  { %v2565_v36 = vpop.f32.mrf.mxu0 }
0x1812   :  { %v2566_v8 = vadd.f32 %v2565_v36, %v3928_v45 }
0x1813   :  { %v2430_v25 = vpop.xlane.xlu2 %2429 }
0x1814   :  { %v2571_v9 = vsel %vm76_vm0, %v2566_v8, -inf }
0x1815   :  { %2572 = vmax.xlane.f32.xlu2 %v2571_v9 }
0x1817   :  { %v2698_v4 = vpop.f32.mrf.mxu2 }
0x1818   :  { %v2699_v14 = vadd.f32 %v2698_v4, %v3924_v40 }
0x181a   :  { %v2704_v24 = vsel %vm76_vm0, %v2699_v14, -inf }
0x181b   :  { %2705 = vmax.xlane.f32.xlu1 %v2704_v24 }
0x181f   :  { %v2701_v39 = vpop.f32.mrf.mxu2  ;;  %v2433_v33 = vpop.xlane.xlu0 %2432 }
0x1820   :  { %v2435_v43 = vsub.f32 %v2426_v61, %v2433_v33 }
0x1822   :  { %v2438_v57 = vmul.f32 1.442695, %v2435_v43 }
0x182d   :  { %2366 = vrot.lane.b32.xlu2 %v3570_v16, %s3796_s18 }
0x1880   :  { %v2570_v13 = vpop.xlane.xlu1 %2569 }
0x1881   :  { %v2574_v58 = vsub.f32 %v2563_v21, %v2570_v13 }
0x1883   :  { %v2576_v32 = vmul.f32 1.442695, %v2574_v58 }
0x1888   :  { %v2573_v20 = vpop.xlane.xlu2 %2572 }
0x1889   :  { %v2575_v22 = vsub.f32 %v2566_v8, %v2573_v20 }
0x188b   :  { %v2578_v23 = vmul.f32 1.442695, %v2575_v22 }
0x188d   :  { %3694 = vpow2.f32 %v2578_v23 }
0x188e   :  { %v2706_v29 = vpop.xlane.xlu1 %2705 }
0x188f   :  { %v2710_v17 = vsub.f32 %v2699_v14, %v2706_v29 }
0x1890   :  { %v2367_v26 = vpop.permute.xlu2 %2366 }
0x1891   :  { %v2369_v11 = vadd.f32 %v2367_v26, %v4168_v46  ;;  %v2370_v30 = vadd.f32 %v2367_v26, %v4172_v3  ;;  %v2371_v34 = vadd.f32 %v2367_v26, %v4175_v5  ;;  %v2372_v35 = vadd.f32 %v2367_v26, %v3893_v15  ;;  %v2834_v3 = vpop.f32.mrf.mxu0 }
0x1892   :  { %v2434_v46 = vsub.f32 %v2423_v19, %v2430_v25  ;;  %v2702_v15 = vadd.f32 %v2701_v39, %v3928_v45  ;;  %v2835_v48 = vadd.f32 %v2834_v3, %v3924_v40  ;;  %v2712_v56 = vmul.f32 1.442695, %v2710_v17 }
0x1893   :  { %v4654_v28 = vpop.eup %3694  ;;  %v3515_v7 = vpack.i.bf16 %v2369_v11, %v2370_v30  ;;  %v4658_v38 = vpack.i.bf16 %v2371_v34, %v2372_v35 }
0x1894   :  { %v2583_v37 = vsel %vm76_vm0, %v4654_v28, 0.0  ;;  %v2436_v5 = vmul.f32 1.442695, %v2434_v46  ;;  %v2707_v53 = vsel %vm76_vm0, %v2702_v15, -inf  ;;  %v2840_v51 = vsel %vm76_vm0, %v2835_v48, -inf }
0x1895   :  { %2584 = vadd.xlane.f32.xlu2 %v2583_v37  ;;  %3516 = vrot.lane.b32.xlu1 %v3515_v7, %s3811_s1 }
0x1896   :  { %3511 = vrot.lane.b32.xlu0 %v4658_v38, %s3811_s1  ;;  %3696 = vpow2.f32 %v2436_v5 }
0x1897   :  { %3698 = vpow2.f32 %v2438_v57 }
0x1898   :  { %3700 = vpow2.f32 %v2576_v32 }
0x1899   :  { %v2837_v62 = vpop.f32.mrf.mxu0  ;;  %3702 = vpow2.f32 %v2712_v56 }
0x189a   :  { %v2838_v54 = vadd.f32 %v2837_v62, %v3928_v45 }
0x189c   :  { %v4667_v55 = vpop.eup %3696  ;;  %v2843_v41 = vsel %vm76_vm0, %v2838_v54, -inf }
0x189d   :  { %v2440_v40 = vsel %vm76_vm0, %v4667_v55, 0.0  ;;  %v4673_v52 = vpop.eup %3698 }
0x189e   :  { %v4675_v44 = vpop.eup %3700  ;;  %v2443_v59 = vsel %vm76_vm0, %v4673_v52, 0.0 }
0x189f   :  { %v2580_v45 = vsel %vm76_vm0, %v4675_v44, 0.0  ;;  %v4681_v2 = vpop.eup %3702 }
0x18a0   :  { %v2716_v10 = vsel %vm76_vm0, %v4681_v2, 0.0 }
0x18bf   :  { %2708 = vmax.xlane.f32.xlu1 %v2707_v53 }
0x18c0   :  { %2841 = vmax.xlane.f32.xlu0 %v2840_v51 }
0x18c7   :  { %2441 = vadd.xlane.f32.xlu1 %v2440_v40 }
0x18c8   :  { %2844 = vmax.xlane.f32.xlu0 %v2843_v41 }
0x18cf   :  { %2444 = vadd.xlane.f32.xlu1 %v2443_v59 }
0x18d0   :  { %2581 = vadd.xlane.f32.xlu0 %v2580_v45 }
0x18d7   :  { %2717 = vadd.xlane.f32.xlu1 %v2716_v10 }
0x18e4   :  { %3521 = vrot.lane.b32.xlu0 %v4658_v38, %s3808_s4 }
0x18f0   :  { %3526 = vrot.lane.b32.xlu1 %v3515_v7, %s3808_s4 }
0x18f8   :  { %3531 = vrot.lane.b32.xlu1 %v4658_v38, %s3809_s8 }
0x1900   :  { %3536 = vrot.lane.b32.xlu1 %v3515_v7, %s3809_s8 }
0x1907   :  { %v3517_v19 = vpop.permute.xlu1 %3516 }
0x1908   :  { %v3512_v27 = vpop.permute.xlu0 %3511  ;;  %3546 = vrot.lane.b32.xlu1 %v3515_v7, %s3795_s30  ;;  %v3518_v60 = vunpack.i.l.bf16 %v3517_v19  ;;  %v3519_v63 = vunpack.i.h.bf16 %v3517_v19 }
0x1909   :  { %v3513_v12 = vunpack.i.l.bf16 %v3512_v27  ;;  %v3514_v42 = vunpack.i.h.bf16 %v3512_v27 }
0x190b   :  { %2510 = vmatpush.msra.mxu3 %v3513_v12 }
0x190d   :  { %2511 = vmatpush.msra.mxu3 %v3514_v42 }
0x190f   :  { %2512 = vmatpush.msra.mxu3 %v3518_v60 }
0x1911   :  { %2513 = vmatpush.msra.mxu3 %v3519_v63 }
0x1932   :  { %v2709_v0 = vpop.xlane.xlu1 %2708 }
0x1933   :  { %v2842_v61 = vpop.xlane.xlu0 %2841  ;;  %v2711_v1 = vsub.f32 %v2702_v15, %v2709_v0  ;;  %v4704_v15 = vpop.xlane.xlu2 %2584 }
0x1934   :  { %v2846_v50 = vsub.f32 %v2835_v48, %v2842_v61 }
0x1935   :  { %v2714_v6 = vmul.f32 1.442695, %v2711_v1 }
0x1936   :  { %v2848_v21 = vmul.f32 1.442695, %v2846_v50 }
0x1937   :  { %3704 = vpow2.f32 %v2714_v6 }
0x1938   :  { %3706 = vpow2.f32 %v2848_v21 }
0x193a   :  { %v2442_v18 = vpop.xlane.xlu1 %2441 }
0x193b   :  { %v2845_v36 = vpop.xlane.xlu0 %2844  ;;  %3708 = vrcp.f32 %v2442_v18  ;;  %v2457_v11 = vand.u32 2147483648, %v2442_v18  ;;  %v2455_v35 = vand.u32 2147483647, %v2442_v18  ;;  %vm2451_vm10 = vweird.f32 %v2442_v18 }
0x193c   :  { %v2847_v8 = vsub.f32 %v2838_v54, %v2845_v36 }
0x193d   :  { %v4692_v9 = vpop.eup %3704  ;;  %v2458_v3 = vor.u32 1.1754944e-38, %v2457_v11  ;;  %vm2456_vm13 = vcmp.eq.f32.partialorder %v2455_v35, 8.507059e+37 }
0x193e   :  { %v4694_v4 = vpop.eup %3706  ;;  %v2850_v14 = vmul.f32 1.442695, %v2847_v8  ;;  %v2719_v24 = vsel %vm76_vm0, %v4692_v9, 0.0  ;;  %v2612_v8 = vand.u32 2147483648, %v4704_v15 }
0x193f   :  { %v2852_v16 = vsel %vm76_vm0, %v4694_v4, 0.0  ;;  %2720 = vadd.xlane.f32.xlu2 %v2719_v24 }
0x1940   :  { %3710 = vpow2.f32 %v2850_v14  ;;  %2853 = vadd.xlane.f32.xlu0 %v2852_v16  ;;  %v2610_v16 = vand.u32 2147483647, %v4704_v15 }
0x1941   :  { %v3709_v25 = vpop.eup %3708 }
0x1942   :  { %v2447_v20 = vmul.f32 %v3709_v25, %v2442_v18  ;;  %v2445_v22 = vpop.xlane.xlu1 %2444  ;;  %vm2452_vm9 = vweird.f32 %v3709_v25 }
0x1943   :  { %3712 = vrcp.f32 %v2445_v22  ;;  %v2582_v26 = vpop.xlane.xlu0 %2581  ;;  %vm2453_vm12 = vmor %vm2451_vm10, %vm2452_vm9  ;;  %v2472_v43 = vand.u32 2147483648, %v2445_v22  ;;  %v2470_v51 = vand.u32 2147483647, %v2445_v22  ;;  %vm2466_vm15 = vweird.f32 %v2445_v22 }
0x1944   :  { %v2448_v23 = vsub.f32 1.0, %v2447_v20  ;;  %3714 = vrcp.f32 %v2582_v26  ;;  %v2597_v60 = vand.u32 2147483648, %v2582_v26  ;;  %vm2591_vm6 = vweird.f32 %v2582_v26 }
0x1945   :  { %3716 = vrcp.f32 %v4704_v15  ;;  %v2473_v32 = vor.u32 1.1754944e-38, %v2472_v43  ;;  %vm2471_vm4 = vcmp.eq.f32.partialorder %v2470_v51, 8.507059e+37  ;;  %v2595_v63 = vand.u32 2147483647, %v2582_v26 }
0x1946   :  { %v4700_v30 = vpop.eup %3710  ;;  %v2449_v34 = vmul.f32 %v3709_v25, %v2448_v23  ;;  %v2598_v1 = vor.u32 1.1754944e-38, %v2597_v60  ;;  %v2613_v20 = vor.u32 1.1754944e-38, %v2612_v8 }
0x1947   :  { %v2855_v7 = vsel %vm76_vm0, %v4700_v30, 0.0  ;;  %vm2596_vm9 = vcmp.eq.f32.partialorder %v2595_v63, 8.507059e+37 }
0x1948   :  { %v2450_v37 = vadd.f32 %v3709_v25, %v2449_v34  ;;  %2856 = vadd.xlane.f32.xlu2 %v2855_v7 }
0x1949   :  { %v3713_v46 = vpop.eup %3712 }
0x194a   :  { %v2454_v39 = vsel %vm2453_vm12, %v3709_v25, %v2450_v37  ;;  %v2462_v5 = vmul.f32 %v3713_v46, %v2445_v22  ;;  %v3715_v48 = vpop.eup %3714  ;;  %vm2467_vm14 = vweird.f32 %v3713_v46  ;;  %v2718_v40 = vpop.xlane.xlu1 %2717  ;;  %vm2606_vm12 = vweird.f32 %v4704_v15 }
0x194b   :  { %v2459_v33 = vsel %vm2456_vm13, %v2458_v3, %v2454_v39  ;;  %v2587_v62 = vmul.f32 %v3715_v48, %v2582_v26  ;;  %vm2468_vm2 = vmor %vm2466_vm15, %vm2467_vm14  ;;  %3718 = vrcp.f32 %v2718_v40  ;;  %vm2592_vm5 = vweird.f32 %v3715_v48 }
0x194c   :  { %v2463_v13 = vsub.f32 1.0, %v2462_v5  ;;  %v2460_v58 = vmul.f32 %v4667_v55, %v2459_v33  ;;  %v3717_v55 = vpop.eup %3716  ;;  %vm2593_vm7 = vmor %vm2591_vm6, %vm2592_vm5  ;;  %vm2611_vm14 = vcmp.eq.f32.partialorder %v2610_v16, 8.507059e+37  ;;  %v2733_v34 = vand.u32 2147483648, %v2718_v40 }
0x194d   :  { %v2588_v17 = vsub.f32 1.0, %v2587_v62  ;;  %v2602_v45 = vmul.f32 %v3717_v55, %v4704_v15  ;;  %vm2607_vm10 = vweird.f32 %v3717_v55 }
0x194e   :  { %v2464_v53 = vmul.f32 %v3713_v46, %v2463_v13  ;;  %3364 = vmatmul.msk.f32.vlgmr.msra.gmra.mxu3 %vm76_vm0, %v2460_v58  ;;  %vm2608_vm13 = vmor %vm2606_vm12, %vm2607_vm10 }
0x194f   :  { %v2589_v10 = vmul.f32 %v3715_v48, %v2588_v17  ;;  %v2603_v12 = vsub.f32 1.0, %v2602_v45 }
0x1950   :  { %v2465_v57 = vadd.f32 %v3713_v46, %v2464_v53 }
0x1951   :  { %v2590_v19 = vadd.f32 %v3715_v48, %v2589_v10  ;;  %v3719_v42 = vpop.eup %3718 }
0x1952   :  { %v2469_v29 = vsel %vm2468_vm2, %v3713_v46, %v2465_v57  ;;  %v2723_v61 = vmul.f32 %v3719_v42, %v2718_v40  ;;  %vm2728_vm15 = vweird.f32 %v3719_v42  ;;  %vm2727_vm2 = vweird.f32 %v2718_v40 }
0x1953   :  { %v2474_v54 = vsel %vm2471_vm4, %v2473_v32, %v2469_v29  ;;  %v2594_v0 = vsel %vm2593_vm7, %v3715_v48, %v2590_v19  ;;  %vm2729_vm4 = vmor %vm2727_vm2, %vm2728_vm15  ;;  %v2734_v46 = vor.u32 1.1754944e-38, %v2733_v34  ;;  %v2376_v34 = vld [vmem:[#allocation2 + $0x110] sm:$0xff] }
0x1954   :  { %v2475_v41 = vmul.f32 %v4673_v52, %v2474_v54  ;;  %v2604_v52 = vmul.f32 %v3717_v55, %v2603_v12  ;;  %v2599_v6 = vsel %vm2596_vm9, %v2598_v1, %v2594_v0  ;;  %v2724_v18 = vsub.f32 1.0, %v2723_v61 }
0x1955   :  { %v2600_v24 = vmul.f32 %v4675_v44, %v2599_v6  ;;  %v2731_v44 = vand.u32 2147483647, %v2718_v40 }
0x1956   :  { %v3522_v56 = vpop.permute.xlu0 %3521  ;;  %3365 = vmatmul.msk.f32.gmra.mxu3 %vm76_vm0, %v2475_v41  ;;  %v2605_v36 = vadd.f32 %v3717_v55, %v2604_v52 }
0x1957   :  { %v3523_v59 = vunpack.i.l.bf16 %v3522_v56  ;;  %v3524_v27 = vunpack.i.h.bf16 %v3522_v56  ;;  %vm2732_vm5 = vcmp.eq.f32.partialorder %v2731_v44, 8.507059e+37 }
0x1958   :  { %v2609_v25 = vsel %vm2608_vm13, %v3717_v55, %v2605_v36 }
0x1959   :  { %2646 = vmatpush.msra.mxu1 %v3523_v59  ;;  %v2614_v26 = vsel %vm2611_vm14, %v2613_v20, %v2609_v25 }
0x195a   :  { %v2615_v7 = vmul.f32 %v4654_v28, %v2614_v26 }
0x195b   :  { %2647 = vmatpush.msra.mxu1 %v3524_v27 }
0x1960   :  { %3541 = vrot.lane.b32.xlu2 %v4658_v38, %s3795_s30  ;;  %v2725_v38 = vmul.f32 %v3719_v42, %v2724_v18 }
0x1962   :  { %v3527_v50 = vpop.permute.xlu1 %3526  ;;  %v2726_v11 = vadd.f32 %v3719_v42, %v2725_v38 }
0x1963   :  { %v3528_v21 = vunpack.i.l.bf16 %v3527_v50  ;;  %v3529_v14 = vunpack.i.h.bf16 %v3527_v50 }
0x1964   :  { %v2730_v37 = vsel %vm2729_vm4, %v3719_v42, %v2726_v11  ;;  %v2377_v11 = vld [vmem:[#allocation2 + $0x118] sm:$0xff] }
0x1965   :  { %2648 = vmatpush.msra.mxu1 %v3528_v21  ;;  %v2735_v39 = vsel %vm2732_vm5, %v2734_v46, %v2730_v37  ;;  %2978 = vmatpush.msrb.mxu2 %v2377_v11 }
0x1966   :  { %v2736_v15 = vmul.f32 %v4681_v2, %v2735_v39 }
0x1967   :  { %2649 = vmatpush.msra.mxu1 %v3529_v14  ;;  %2979 = vmatpush.msrb.mxu2 %v2376_v34  ;;  %v3573_v34 = vld [vmem:[%s4838_s6 + $0x19] ss:$0 sm:$0xff] }
0x1968   :  { %3372 = vmatmul.msk.f32.vlgmr.msra.gmra.mxu1 %vm76_vm0, %v2600_v24 }
0x196a   :  { %v3532_v22 = vpop.permute.xlu1 %3531 }
0x196b   :  { %v3533_v23 = vunpack.i.l.bf16 %v3532_v22  ;;  %v3534_v35 = vunpack.i.h.bf16 %v3532_v22 }
0x196d   :  { %2782 = vmatpush.msrb.mxu3 %v3533_v23 }
0x196f   :  { %2783 = vmatpush.msrb.mxu3 %v3534_v35 }
0x1970   :  { %3373 = vmatmul.msk.f32.gmra.mxu1 %vm76_vm0, %v2615_v7  ;;  %v2374_v7 = vld [vmem:[#allocation2 + $0x100] sm:$0xff] }
0x1972   :  { %v3537_v3 = vpop.permute.xlu1 %3536 }
0x1973   :  { %v3538_v5 = vunpack.i.l.bf16 %v3537_v3  ;;  %v3539_v33 = vunpack.i.h.bf16 %v3537_v3 }
0x1975   :  { %2784 = vmatpush.msrb.mxu3 %v3538_v5 }
0x1977   :  { %2785 = vmatpush.msrb.mxu3 %v3539_v33 }
0x1978   :  { %3380 = vmatmul.msk.f32.vlgmr.msrb.gmra.mxu3 %vm76_vm0, %v2736_v15 }
0x197a   :  { %v3547_v60 = vpop.permute.xlu1 %3546 }
0x197b   :  { %v3548_v50 = vunpack.i.l.bf16 %v3547_v60  ;;  %v3549_v18 = vunpack.i.h.bf16 %v3547_v60  ;;  %v3044_v60 = vld [vmem:[#allocation2 + $0x120] sm:$0xff] }
0x19b2   :  { %v2721_v13 = vpop.xlane.xlu2 %2720 }
0x19b3   :  { %v2854_v48 = vpop.xlane.xlu0 %2853  ;;  %3720 = vrcp.f32 %v2721_v13  ;;  %v2748_v32 = vand.u32 2147483648, %v2721_v13  ;;  %v2746_v54 = vand.u32 2147483647, %v2721_v13  ;;  %vm2742_vm7 = vweird.f32 %v2721_v13 }
0x19b4   :  { %3722 = vrcp.f32 %v2854_v48  ;;  %v2869_v56 = vand.u32 2147483648, %v2854_v48  ;;  %vm2863_vm13 = vweird.f32 %v2854_v48  ;;  %v2867_v45 = vand.u32 2147483647, %v2854_v48 }
0x19b5   :  { %v2749_v41 = vor.u32 1.1754944e-38, %v2748_v32  ;;  %vm2747_vm12 = vcmp.eq.f32.partialorder %v2746_v54, 8.507059e+37 }
0x19b6   :  { %v2870_v0 = vor.u32 1.1754944e-38, %v2869_v56  ;;  %vm2868_vm15 = vcmp.eq.f32.partialorder %v2867_v45, 8.507059e+37 }
0x19b9   :  { %v3721_v28 = vpop.eup %3720 }
0x19ba   :  { %v3723_v43 = vpop.eup %3722  ;;  %v2738_v58 = vmul.f32 %v3721_v28, %v2721_v13  ;;  %vm2743_vm6 = vweird.f32 %v3721_v28 }
0x19bb   :  { %v2859_v53 = vmul.f32 %v3723_v43, %v2854_v48  ;;  %v2857_v51 = vpop.xlane.xlu2 %2856  ;;  %vm2864_vm9 = vweird.f32 %v3723_v43  ;;  %vm2744_vm10 = vmor %vm2742_vm7, %vm2743_vm6 }
0x19bc   :  { %v2739_v62 = vsub.f32 1.0, %v2738_v58  ;;  %3724 = vrcp.f32 %v2857_v51  ;;  %vm2865_vm14 = vmor %vm2863_vm13, %vm2864_vm9  ;;  %v2884_v36 = vand.u32 2147483648, %v2857_v51  ;;  %vm2878_vm4 = vweird.f32 %v2857_v51 }
0x19bd   :  { %v2860_v57 = vsub.f32 1.0, %v2859_v53  ;;  %v3571_v53 = vld [vmem:[%s4838_s6 + $0x13] ss:$0 sm:$0xff] }
0x19be   :  { %v2740_v29 = vmul.f32 %v3721_v28, %v2739_v62  ;;  %v2885_v24 = vor.u32 1.1754944e-38, %v2884_v36 }
0x19bf   :  { %v2861_v2 = vmul.f32 %v3723_v43, %v2860_v57 }
0x19c0   :  { %v2741_v17 = vadd.f32 %v3721_v28, %v2740_v29 }
0x19c1   :  { %v2862_v40 = vadd.f32 %v3723_v43, %v2861_v2 }
0x19c2   :  { %v3725_v55 = vpop.eup %3724  ;;  %v2745_v59 = vsel %vm2744_vm10, %v3721_v28, %v2741_v17 }
0x19c3   :  { %v2874_v10 = vmul.f32 %v3725_v55, %v2857_v51  ;;  %v3542_v27 = vpop.permute.xlu2 %3541  ;;  %v2750_v12 = vsel %vm2747_vm12, %v2749_v41, %v2745_v59  ;;  %v2866_v63 = vsel %vm2865_vm14, %v3723_v43, %v2862_v40  ;;  %vm2879_vm2 = vweird.f32 %v3725_v55 }
0x19c4   :  { %v3543_v19 = vunpack.i.l.bf16 %v3542_v27  ;;  %v2751_v42 = vmul.f32 %v4692_v9, %v2750_v12  ;;  %v3544_v61 = vunpack.i.h.bf16 %v3542_v27  ;;  %v2871_v6 = vsel %vm2868_vm15, %v2870_v0, %v2866_v63  ;;  %vm2880_vm5 = vmor %vm2878_vm4, %vm2879_vm2 }
0x19c5   :  { %v2875_v52 = vsub.f32 1.0, %v2874_v10  ;;  %v2882_v9 = vand.u32 2147483647, %v2857_v51  ;;  %v2872_v8 = vmul.f32 %v4694_v4, %v2871_v6 }
0x19c6   :  { %2918 = vmatpush.msrb.mxu1 %v3543_v19  ;;  %3381 = vmatmul.msk.f32.gmra.mxu3 %vm76_vm0, %v2751_v42  ;;  %v3046_v19 = vld [vmem:[#allocation2 + $0x130] sm:$0xff]  ;;  %v3045_v42 = vld [vmem:[#allocation2 + $0x128] sm:$0xff] }
0x19c7   :  { %v2876_v1 = vmul.f32 %v3725_v55, %v2875_v52  ;;  %vm2883_vm6 = vcmp.eq.f32.partialorder %v2882_v9, 8.507059e+37 }
0x19c8   :  { %2919 = vmatpush.msrb.mxu1 %v3544_v61  ;;  %v3401_v61 = vld [vmem:[%s4837_s5 + $0x78] sm:$0xff] }
0x19c9   :  { %v2877_v21 = vadd.f32 %v3725_v55, %v2876_v1  ;;  %v3400_v1 = vld [vmem:[%s4837_s5 + $0x70] sm:$0xff]  ;;  %3106 = vmatpush.msrb.mxu0 %v3401_v61 }
0x19ca   :  { %2920 = vmatpush.msrb.mxu1 %v3548_v50  ;;  %v3399_v50 = vld [vmem:[%s4837_s5 + $0x68] sm:$0xff] }
0x19cb   :  { %v2881_v14 = vsel %vm2880_vm5, %v3725_v55, %v2877_v21  ;;  %3107 = vmatpush.msrb.mxu0 %v3400_v1 }
0x19cc   :  { %2921 = vmatpush.msrb.mxu1 %v3549_v18  ;;  %v2886_v16 = vsel %vm2883_vm6, %v2885_v24, %v2881_v14  ;;  %v3398_v18 = vld [vmem:[%s4837_s5 + $0x60] sm:$0xff]  ;;  %v3397_v14 = vld [vmem:[%s4837_s5 + $0x58] sm:$0xff] }
0x19cd   :  { %3388 = vmatmul.msk.f32.vlgmr.msrb.gmra.mxu1 %vm76_vm0, %v2872_v8  ;;  %v2887_v38 = vmul.f32 %v4700_v30, %v2886_v16  ;;  %v2375_v30 = vld [vmem:[#allocation2 + $0x108] sm:$0xff]  ;;  %3108 = vmatpush.msrb.mxu0 %v3399_v50 }
0x19ce   :  { %2980 = vmatpush.msrb.mxu2 %v2375_v30 }
0x19cf   :  { %3109 = vmatpush.msrb.mxu0 %v3398_v18 }
0x19d0   :  { %2981 = vmatpush.msrb.mxu2 %v2374_v7 }
0x19d1   :  { %v2515_v20 = vpop.f32.mrf.mxu3  ;;  %3110 = vmatpush.msrb.mxu0 %v3397_v14 }
0x19d5   :  { %3389 = vmatmul.msk.f32.gmra.mxu1 %vm76_vm0, %v2887_v38 }
0x19d9   :  { %v2518_v4 = vpop.f32.mrf.mxu3 }
0x19e5   :  { %v2651_v25 = vpop.f32.mrf.mxu1 }
0x19e6   :  { %2931 = vrot.lane.b32.xlu1 %v2651_v25, %s3795_s30 }
0x19ed   :  { %v2654_v22 = vpop.f32.mrf.mxu1 }
0x19ee   :  { %2933 = vrot.lane.b32.xlu2 %v2654_v22, %s3795_s30  ;;  %v3572_v22 = vld [vmem:[%s4838_s6 + $0x18] ss:$0 sm:$0xff] }
0x19fb   :  { %v2787_v23 = vpop.f32.mrf.mxu3 }
0x19fc   :  { %2939 = vrot.lane.b32.xlu0 %v2787_v23, %s3809_s8 }
0x1a48   :  { %v2934_v15 = vpop.permute.xlu2 %2933 }
0x1a49   :  { %v2790_v35 = vpop.f32.mrf.mxu3  ;;  %v2954_v13 = vsel %vm203_vm1, %v2518_v4, %v2934_v15  ;;  %v3395_v15 = vld [vmem:[%s4837_s5 + $0x48] sm:$0xff] }
0x1a4a   :  { %v2923_v26 = vpop.f32.mrf.mxu1 }
0x1a4b   :  { %2947 = vrot.lane.b32.xlu1 %v2923_v26, %s3808_s4 }
0x1a52   :  { %v2926_v44 = vpop.f32.mrf.mxu1 }
0x1a53   :  { %2949 = vrot.lane.b32.xlu0 %v2926_v44, %s3808_s4  ;;  %2941 = vrot.lane.b32.xlu1 %v2790_v35, %s3809_s8 }
0x1a58   :  { %v2932_v37 = vpop.permute.xlu1 %2931 }
0x1a59   :  { %v2953_v3 = vsel %vm203_vm1, %v2515_v20, %v2932_v37 }
0x1a6e   :  { %v2940_v46 = vpop.permute.xlu0 %2939 }
0x1a6f   :  { %v2955_v39 = vsel %vm235_vm3, %v2953_v3, %v2940_v46 }
0x1abd   :  { %v2948_v5 = vpop.permute.xlu1 %2947 }
0x1abe   :  { %v2957_v33 = vsel %vm715_vm11, %v2955_v39, %v2948_v5 }
0x1abf   :  { %3390 = vmatmul.msk.f32.vlgmr.msrb.gmra.mxu2 %vm76_vm0, %v2957_v33  ;;  %v3396_v33 = vld [vmem:[%s4837_s5 + $0x50] sm:$0xff] }
0x1ac0   :  { %3111 = vmatpush.msrb.mxu0 %v3396_v33 }
0x1ac2   :  { %3112 = vmatpush.msrb.mxu0 %v3395_v15 }
0x1ac5   :  { %v2950_v48 = vpop.permute.xlu0 %2949  ;;  %v2942_v28 = vpop.permute.xlu1 %2941 }
0x1ac6   :  { %v2956_v43 = vsel %vm235_vm3, %v2954_v13, %v2942_v28  ;;  %v3394_v13 = vld [vmem:[%s4837_s5 + $0x40] sm:$0xff] }
0x1ac7   :  { %v2958_v58 = vsel %vm715_vm11, %v2956_v43, %v2950_v48  ;;  %3113 = vmatpush.msrb.mxu0 %v3394_v13  ;;  %v3574_v48 = vld [vmem:[%s4838_s6 + $0x14] ss:$0 sm:$0xff] }
0x1ac8   :  { %3391 = vmatmul.msk.f32.gmra.mxu2 %vm76_vm0, %v2958_v58 }
0x1b42   :  { %v2983_v51 = vpop.f32.mrf.mxu2 }
0x1b43   :  { %v2984_v62 = vadd.f32 %v3571_v53, %v2983_v51 }
0x1b45   :  { %v2989_v57 = vadd.f32 %v2984_v62, %v4589_v31 }
0x1b47   :  { %v2991_v32 = vsel %vm76_vm0, %v2989_v57, 0.0 }
0x1b48   :  { %2992 = vadd.xlane.f32.xlu2 %v2991_v32 }
0x1b4b   :  { %v2986_v29 = vpop.f32.mrf.mxu2 }
0x1b4c   :  { %v2987_v54 = vadd.f32 %v3571_v53, %v2986_v29 }
0x1b4e   :  { %v2990_v2 = vadd.f32 %v2987_v54, %v4600_v49  ;;  %v3047_v49 = vld [vmem:[#allocation2 + $0x138] sm:$0xff] }
0x1b4f   :  { %3068 = vmatpush.msra.mxu3 %v3047_v49 }
0x1b50   :  { %v2994_v17 = vsel %vm76_vm0, %v2990_v2, 0.0 }
0x1b51   :  { %2995 = vadd.xlane.f32.xlu1 %v2994_v17  ;;  %3069 = vmatpush.msra.mxu3 %v3046_v19 }
0x1b53   :  { %3070 = vmatpush.msra.mxu3 %v3045_v42 }
0x1b55   :  { %3071 = vmatpush.msra.mxu3 %v3044_v60 }
0x1bbb   :  { %v2993_v40 = vpop.xlane.xlu2 %2992 }
0x1bbc   :  { %v2997_v41 = vmul.f32 %v2993_v40, %v4067_v47 }
0x1bbe   :  { %v2999_v55 = vsub.f32 %v2989_v57, %v2997_v41  ;;  %v3575_v57 = vld [vmem:[%s4838_s6 + $0x15] ss:$0 sm:$0xff] }
0x1bc0   :  { %v3001_v56 = vmul.f32 %v2999_v55, %v2999_v55 }
0x1bc2   :  { %v3003_v59 = vsel %vm76_vm0, %v3001_v56, 0.0 }
0x1bc3   :  { %3004 = vadd.xlane.f32.xlu0 %v3003_v59 }
0x1bc4   :  { %v2996_v45 = vpop.xlane.xlu1 %2995 }
0x1bc5   :  { %v2998_v31 = vmul.f32 %v2996_v45, %v4067_v47 }
0x1bc7   :  { %v3000_v10 = vsub.f32 %v2990_v2, %v2998_v31 }
0x1bc9   :  { %v3002_v27 = vmul.f32 %v3000_v10, %v3000_v10 }
0x1bcb   :  { %v3006_v12 = vsel %vm76_vm0, %v3002_v27, 0.0 }
0x1bcc   :  { %3007 = vadd.xlane.f32.xlu2 %v3006_v12 }
0x1c36   :  { %v3005_v63 = vpop.xlane.xlu0 %3004 }
0x1c37   :  { %v3009_v52 = vmul.f32 %v3005_v63, %v4067_v47 }
0x1c39   :  { %v3011_v0 = vadd.f32 1e-05, %v3009_v52 }
0x1c3b   :  { %3726 = vrsqrt.f32 %v3011_v0  ;;  %vm3019_vm3 = vweird.f32 %v3011_v0 }
0x1c3f   :  { %v3008_v6 = vpop.xlane.xlu2 %3007 }
0x1c40   :  { %v3010_v21 = vmul.f32 %v3008_v6, %v4067_v47 }
0x1c41   :  { %v3727_v36 = vpop.eup %3726 }
0x1c42   :  { %v3014_v9 = vmul.f32 %v3727_v36, %v3011_v0  ;;  %v3012_v8 = vadd.f32 1e-05, %v3010_v21  ;;  %vm3020_vm1 = vweird.f32 %v3727_v36 }
0x1c43   :  { %vm3021_vm11 = vmor %vm3019_vm3, %vm3020_vm1 }
0x1c44   :  { %v3015_v24 = vmul.f32 %v3727_v36, %v3014_v9  ;;  %3728 = vrsqrt.f32 %v3012_v8  ;;  %vm3029_vm9 = vweird.f32 %v3012_v8 }
0x1c46   :  { %v3016_v16 = vmul.f32 0.5, %v3015_v24  ;;  %v3576_v24 = vld [vmem:[%s4838_s6 + $0x1a] ss:$0 sm:$0xff] }
0x1c48   :  { %v3017_v38 = vsub.f32 1.5, %v3016_v16 }
0x1c4a   :  { %v3729_v25 = vpop.eup %3728  ;;  %v3018_v20 = vmul.f32 %v3727_v36, %v3017_v38 }
0x1c4b   :  { %v3024_v4 = vmul.f32 %v3729_v25, %v3012_v8  ;;  %vm3030_vm7 = vweird.f32 %v3729_v25 }
0x1c4c   :  { %v3022_v23 = vsel %vm3021_vm11, %v3727_v36, %v3018_v20  ;;  %vm3031_vm10 = vmor %vm3029_vm9, %vm3030_vm7  ;;  %v3577_v20 = vld [vmem:[%s4838_s6 + $0x1b] ss:$0 sm:$0xff] }
0x1c4d   :  { %v3033_v26 = vmul.f32 %v3022_v23, %v2999_v55  ;;  %v3025_v11 = vmul.f32 %v3729_v25, %v3024_v4 }
0x1c4f   :  { %v3037_v30 = vmul.f32 %v3572_v22, %v3033_v26  ;;  %v3026_v35 = vmul.f32 0.5, %v3025_v11 }
0x1c51   :  { %v3027_v44 = vsub.f32 1.5, %v3026_v35  ;;  %v3041_v7 = vadd.f32 %v3573_v34, %v3037_v30 }
0x1c53   :  { %v3028_v37 = vmul.f32 %v3729_v25, %v3027_v44  ;;  %3392 = vmatmul.msk.f32.vlgmr.msra.gmra.mxu3 %vm76_vm0, %v3041_v7 }
0x1c55   :  { %v3032_v46 = vsel %vm3031_vm10, %v3729_v25, %v3028_v37 }
0x1c56   :  { %v3034_v3 = vmul.f32 %v3032_v46, %v3000_v10 }
0x1c58   :  { %v3038_v39 = vmul.f32 %v3572_v22, %v3034_v3 }
0x1c5a   :  { %v3042_v5 = vadd.f32 %v3573_v34, %v3038_v39 }
0x1c5c   :  { %3393 = vmatmul.msk.f32.gmra.mxu3 %vm76_vm0, %v3042_v5 }
0x1cd6   :  { %v3073_v28 = vpop.f32.mrf.mxu3 }
0x1cd7   :  { %v3074_v43 = vadd.f32 %v3574_v48, %v3073_v28 }
0x1cd9   :  { %v3079_v58 = vmax.f32 %v3074_v43, 0.0 }
0x1cdb   :  { %3402 = vmatmul.msk.f32.vlgmr.msrb.gmra.mxu0 %vm1573_vm8, %v3079_v58 }
0x1cdf   :  { %v3076_v53 = vpop.f32.mrf.mxu3 }
0x1ce0   :  { %v3077_v51 = vadd.f32 %v3574_v48, %v3076_v53 }
0x1ce2   :  { %v3080_v62 = vmax.f32 %v3077_v51, 0.0 }
0x1ce4   :  { %3403 = vmatmul.msk.f32.gmra.mxu0 %vm1573_vm8, %v3080_v62 }
0x1d58   :  { %v3115_v32 = vpop.f32.mrf.mxu0 }
0x1d59   :  { %v3116_v29 = vadd.f32 %v3575_v57, %v3115_v32 }
0x1d5b   :  { %v3121_v54 = vadd.f32 %v3116_v29, %v3041_v7 }
0x1d5d   :  { %v3123_v2 = vsel %vm76_vm0, %v3121_v54, 0.0 }
0x1d5e   :  { %3124 = vadd.xlane.f32.xlu1 %v3123_v2 }
0x1d61   :  { %v3118_v17 = vpop.f32.mrf.mxu0 }
0x1d62   :  { %v3119_v40 = vadd.f32 %v3575_v57, %v3118_v17 }
0x1d64   :  { %v3122_v41 = vadd.f32 %v3119_v40, %v3042_v5 }
0x1d66   :  { %v3126_v55 = vsel %vm76_vm0, %v3122_v41, 0.0 }
0x1d67   :  { %3127 = vadd.xlane.f32.xlu2 %v3126_v55 }
0x1dd1   :  { %v3125_v56 = vpop.xlane.xlu1 %3124 }
0x1dd2   :  { %v3129_v59 = vmul.f32 %v3125_v56, %v4067_v47  ;;  %v3578_v56 = vld [vmem:[%s4838_s6 + $0x1c] ss:$0 sm:$0xff] }
0x1dd4   :  { %v3131_v45 = vsub.f32 %v3121_v54, %v3129_v59 }
0x1dd6   :  { %v3133_v31 = vmul.f32 %v3131_v45, %v3131_v45 }
0x1dd8   :  { %v3135_v10 = vsel %vm76_vm0, %v3133_v31, 0.0 }
0x1dd9   :  { %3136 = vadd.xlane.f32.xlu0 %v3135_v10  ;;  %v3579_v10 = vld [vmem:[%s4838_s6 + $0x1d] ss:$0 sm:$0xff] }
0x1dda   :  { %v3128_v27 = vpop.xlane.xlu2 %3127 }
0x1ddb   :  { %v3130_v12 = vmul.f32 %v3128_v27, %v4067_v47 }
0x1ddd   :  { %v3132_v49 = vsub.f32 %v3122_v41, %v3130_v12 }
0x1ddf   :  { %v3134_v19 = vmul.f32 %v3132_v49, %v3132_v49 }
0x1de1   :  { %v3138_v42 = vsel %vm76_vm0, %v3134_v19, 0.0 }
0x1de2   :  { %3139 = vadd.xlane.f32.xlu1 %v3138_v42 }
0x1e4c   :  { %v3137_v60 = vpop.xlane.xlu0 %3136 }
0x1e4d   :  { %v3141_v63 = vmul.f32 %v3137_v60, %v4067_v47 }
0x1e4f   :  { %v3143_v52 = vadd.f32 1e-05, %v3141_v63 }
0x1e51   :  { %3730 = vrsqrt.f32 %v3143_v52  ;;  %vm3151_vm12 = vweird.f32 %v3143_v52 }
0x1e55   :  { %v3140_v0 = vpop.xlane.xlu1 %3139 }
0x1e56   :  { %v3142_v61 = vmul.f32 %v3140_v0, %v4067_v47 }
0x1e57   :  { %v3731_v1 = vpop.eup %3730 }
0x1e58   :  { %v3146_v50 = vmul.f32 %v3731_v1, %v3143_v52  ;;  %v3144_v6 = vadd.f32 1e-05, %v3142_v61  ;;  %vm3152_vm8 = vweird.f32 %v3731_v1 }
0x1e59   :  { %vm3153_vm13 = vmor %vm3151_vm12, %vm3152_vm8 }
0x1e5a   :  { %v3147_v21 = vmul.f32 %v3731_v1, %v3146_v50  ;;  %3732 = vrsqrt.f32 %v3144_v6  ;;  %vm3161_vm15 = vweird.f32 %v3144_v6 }
0x1e5c   :  { %v3148_v18 = vmul.f32 0.5, %v3147_v21 }
0x1e5e   :  { %v3149_v36 = vsub.f32 1.5, %v3148_v18 }
0x1e60   :  { %v3733_v9 = vpop.eup %3732  ;;  %v3150_v8 = vmul.f32 %v3731_v1, %v3149_v36 }
0x1e61   :  { %v3156_v14 = vmul.f32 %v3733_v9, %v3144_v6  ;;  %vm3162_vm14 = vweird.f32 %v3733_v9 }
0x1e62   :  { %v3154_v16 = vsel %vm3153_vm13, %v3731_v1, %v3150_v8  ;;  %vm3163_vm2 = vmor %vm3161_vm15, %vm3162_vm14 }
0x1e63   :  { %v3157_v38 = vmul.f32 %v3733_v9, %v3156_v14  ;;  %v3165_v25 = vmul.f32 %v3154_v16, %v3131_v45 }
0x1e65   :  { %v3158_v22 = vmul.f32 0.5, %v3157_v38  ;;  %v3169_v4 = vmul.f32 %v3576_v24, %v3165_v25 }
0x1e67   :  { %v3159_v23 = vsub.f32 1.5, %v3158_v22  ;;  %v3173_v26 = vadd.f32 %v3577_v20, %v3169_v4 }
0x1e69   :  { %v3160_v11 = vmul.f32 %v3733_v9, %v3159_v23  ;;  %v3175_v34 = vsel %vm76_vm0, %v3173_v26, 0.0 }
0x1e6a   :  { %3176 = vadd.xlane.f32.xlu2 %v3175_v34 }
0x1e6b   :  { %v3164_v30 = vsel %vm3163_vm2, %v3733_v9, %v3160_v11 }
0x1e6c   :  { %v3166_v35 = vmul.f32 %v3164_v30, %v3132_v49 }
0x1e6e   :  { %v3170_v44 = vmul.f32 %v3576_v24, %v3166_v35 }
0x1e70   :  { %v3174_v7 = vadd.f32 %v3577_v20, %v3170_v44 }
0x1e72   :  { %v3178_v37 = vsel %vm76_vm0, %v3174_v7, 0.0 }
0x1e73   :  { %3179 = vadd.xlane.f32.xlu0 %v3178_v37 }
0x1edd   :  { %v3177_v46 = vpop.xlane.xlu2 %3176 }
0x1ede   :  { %v3181_v3 = vmul.f32 %v3177_v46, %v4067_v47 }
0x1ee0   :  { %v3183_v39 = vsub.f32 %v3173_v26, %v3181_v3 }
0x1ee2   :  { %v3185_v5 = vmul.f32 %v3183_v39, %v3183_v39 }
0x1ee4   :  { %v3187_v33 = vsel %vm76_vm0, %v3185_v5, 0.0 }
0x1ee5   :  { %3188 = vadd.xlane.f32.xlu1 %v3187_v33 }
0x1ee6   :  { %v3180_v15 = vpop.xlane.xlu0 %3179 }
0x1ee7   :  { %v3182_v13 = vmul.f32 %v3180_v15, %v4067_v47 }
0x1ee9   :  { %v3184_v48 = vsub.f32 %v3174_v7, %v3182_v13 }
0x1eeb   :  { %v3186_v28 = vmul.f32 %v3184_v48, %v3184_v48 }
0x1eed   :  { %v3190_v43 = vsel %vm76_vm0, %v3186_v28, 0.0 }
0x1eee   :  { %3191 = vadd.xlane.f32.xlu2 %v3190_v43 }
0x1f58   :  { %v3189_v58 = vpop.xlane.xlu1 %3188 }
0x1f59   :  { %v3193_v53 = vmul.f32 %v3189_v58, %v4067_v47 }
0x1f5b   :  { %v3195_v51 = vadd.f32 1e-05, %v3193_v53 }
0x1f5d   :  { %3734 = vrsqrt.f32 %v3195_v51  ;;  %vm3203_vm5 = vweird.f32 %v3195_v51 }
0x1f61   :  { %v3192_v62 = vpop.xlane.xlu2 %3191 }
0x1f62   :  { %v3194_v57 = vmul.f32 %v3192_v62, %v4067_v47 }
0x1f63   :  { %v3735_v32 = vpop.eup %3734 }
0x1f64   :  { %v3198_v29 = vmul.f32 %v3735_v32, %v3195_v51  ;;  %v3196_v54 = vadd.f32 1e-05, %v3194_v57  ;;  %vm3204_vm4 = vweird.f32 %v3735_v32 }
0x1f65   :  { %vm3205_vm6 = vmor %vm3203_vm5, %vm3204_vm4 }
0x1f66   :  { %v3199_v2 = vmul.f32 %v3735_v32, %v3198_v29  ;;  %3736 = vrsqrt.f32 %v3196_v54  ;;  %vm3213_vm3 = vweird.f32 %v3196_v54 }
0x1f68   :  { %v3200_v17 = vmul.f32 0.5, %v3199_v2 }
0x1f6a   :  { %v3201_v40 = vsub.f32 1.5, %v3200_v17 }
0x1f6c   :  { %v3737_v41 = vpop.eup %3736  ;;  %v3202_v55 = vmul.f32 %v3735_v32, %v3201_v40 }
0x1f6d   :  { %v3208_v59 = vmul.f32 %v3737_v41, %v3196_v54  ;;  %vm3214_vm1 = vweird.f32 %v3737_v41 }
0x1f6e   :  { %v3206_v45 = vsel %vm3205_vm6, %v3735_v32, %v3202_v55  ;;  %vm3215_vm11 = vmor %vm3213_vm3, %vm3214_vm1 }
0x1f6f   :  { %v3217_v31 = vmul.f32 %v3206_v45, %v3183_v39  ;;  %v3209_v47 = vmul.f32 %v3737_v41, %v3208_v59 }
0x1f71   :  { %v3221_v27 = vmul.f32 %v3578_v56, %v3217_v31  ;;  %v3210_v12 = vmul.f32 0.5, %v3209_v47 }
0x1f73   :  { %v3211_v49 = vsub.f32 1.5, %v3210_v12  ;;  %v3225_v19 = vadd.f32 %v3579_v10, %v3221_v27 }
0x1f75   :  { %v3212_v42 = vmul.f32 %v3737_v41, %v3211_v49  ;;  %3227 = vst.msk [vmem:[#allocation5] sm:$0xff] %vm76_vm0, %v3225_v19 }
0x1f77   :  { %v3216_v60 = vsel %vm3215_vm11, %v3737_v41, %v3212_v42 }
0x1f78   :  { %v3218_v63 = vmul.f32 %v3216_v60, %v3184_v48 }
0x1f7a   :  { %v3222_v52 = vmul.f32 %v3578_v56, %v3218_v63 }
0x1f7c   :  { %v3226_v0 = vadd.f32 %v3579_v10, %v3222_v52 }
0x1f7e   :  { %3228 = vst.msk [vmem:[#allocation5 + $0x8] sm:$0xff] %vm76_vm0, %v3226_v0 }
0x1f7f   :  { %3241 = dma.vmem_to_hbm [thread:$0]  %s3234_s12, 256, %s3236_s3, [#allocation4], %s3794_s29, %s3794_s29, %s3795_s30  }
0x1f80   :  { %3791 = dma.done.wait [#allocation4], 256  }
0x1f81   :  { %3792 = vsyncadd [#allocation4], 4294967040 }
0x1f82   :  { %3246 = vsyncpa [#allocation3], 1 }
0x1f83   :  { %3247 = vsyncpa [#allocation4], 1 }

</bundles_post_ra>
